<compile_context>
chip_gen: v6e
topology: v6e:2x2x1
jax: 0.10.0
libtpu: 0.0.40
codegen_flags: <defaults>
</compile_context>

<pallas_src>
import jax
import jax.numpy as jnp
from jax.experimental import pallas as pl
from jax.experimental.pallas import tpu as pltpu

B = 2            # demo batch (throughput lever is a much larger batch)
T = 8            # sequence length (<= max_length=100 in the torch module)
D = 768          # embedder hidden size (indic-bert / LSTM input_size)
H = 64           # LSTM hidden_size; 4*H = 256 gate lanes (already 128-aligned)
NUM_CLASSES = 2
B_TILE = 8       # batch rows per grid step (sublane multiple).  For real
                 # workloads raise this (v5e ~128, v6e >=256; cap ~64 on v7x
                 # with T=100 to stay inside the 64 MiB VMEM budget).


def lstm_clf_kernel(x_ref, w_ih_ref, w_hh_ref, b_ref, w_out_ref, b_out_ref,
                    out_ref):
    """One batch tile: hoisted bf16 input projection + unrolled f32 LSTM."""
    rows, _ = x_ref.shape                 # rows = B_TILE * T (batch-major)
    b_tile = rows // T

    # Hoisted input projection: one (B_TILE*T, D) @ (D, 4H) bf16 matmul with
    # f32 accumulation.  The only big matmul, and it is off the serial chain.
    gx = jnp.dot(x_ref[...], w_ih_ref[...],
                 preferred_element_type=jnp.float32) + b_ref[...]
    # Free relayout: with T == 8 (one f32 sublane tile) the (B_TILE*T, 4H) and
    # (B_TILE, T, 4H) tiled layouts coincide, so this value reshape is a view.
    gx = gx.reshape(b_tile, T, 4 * H)

    w_hh = w_hh_ref[...]                  # (H, 4H) bf16, VMEM-resident

    h = jnp.zeros((b_tile, H), jnp.float32)
    c = jnp.zeros((b_tile, H), jnp.float32)

    # T = 8 is a small static constant -> full unroll with static slices.
    # Only the tiny (B_TILE, H) @ (H, 4H) recurrent matmul and the f32 gate
    # elementwise math sit on the sequential critical path.
    # TODO(synk): if T grows toward max_length=100, switch to
    # lax.fori_loop(..., unroll=4..8) with pl.ds / pl.multiple_of indexing to
    # avoid vreg-pressure blowup from a full unroll.
    for t in range(T):
        gates = gx[:, t, :] + jnp.dot(h.astype(w_hh.dtype), w_hh,
                                      preferred_element_type=jnp.float32)
        # PyTorch gate order [i, f, g, o].
        i_g = jax.nn.sigmoid(gates[:, 0 * H:1 * H])
        f_g = jax.nn.sigmoid(gates[:, 1 * H:2 * H])
        g_g = jnp.tanh(gates[:, 2 * H:3 * H])
        o_g = jax.nn.sigmoid(gates[:, 3 * H:4 * H])
        c = f_g * c + i_g * g_g
        h = o_g * jnp.tanh(c)

    logits = (jnp.dot(h, w_out_ref[...], preferred_element_type=jnp.float32)
              + b_out_ref[...])
    out_ref[...] = jax.nn.sigmoid(logits)


def prepare_params(w_ih, w_hh, b, w_out, b_out):
    """One-time weight preprocessing.

    No gate padding (4*H = 256 is already lane-aligned).  MXU operands are
    cast to bf16 to halve their HBM->VMEM bytes; biases and the tiny output
    head stay f32 so all accumulation / gate math is f32.
    """
    return (w_ih.astype(jnp.bfloat16),        # (D, 4H)
            w_hh.astype(jnp.bfloat16),        # (H, 4H)
            b.astype(jnp.float32),            # (1, 4H)
            w_out.astype(jnp.float32),        # (H, NUM_CLASSES)
            b_out.astype(jnp.float32))        # (1, NUM_CLASSES)


@jax.jit
def classifier_forward(x_btd, w_ih_bf, w_hh_bf, b_f32, w_out, b_out):
    """x_btd: [B, T, D] float32 (the 'last_hidden_state' embeddings)."""
    b_sz, t_len, d = x_btd.shape

    # Pad the batch to a multiple of B_TILE; batch rows are independent and
    # padded rows are sliced off afterwards.
    b_extra = (-b_sz) % B_TILE
    if b_extra:
        x_btd = jnp.pad(x_btd, ((0, b_extra), (0, 0), (0, 0)))
    bp = b_sz + b_extra
    n_tiles = bp // B_TILE

    # Batch-major flatten + bf16 cast in the wrapper (cheap HBM-side XLA ops);
    # the kernel sees a lane-dense 2-D tile, no in-kernel reshape of x.
    x_flat = x_btd.reshape(bp * t_len, d).astype(jnp.bfloat16)

    cost = pl.CostEstimate(
        flops=(2 * bp * t_len * d * 4 * H          # hoisted input projection
               + 2 * bp * t_len * H * 4 * H        # recurrent matmuls
               + 2 * bp * H * NUM_CLASSES),        # output linear
        transcendentals=5 * bp * t_len * H + bp * NUM_CLASSES,
        bytes_accessed=(x_flat.size * 2 + w_ih_bf.size * 2 + w_hh_bf.size * 2
                        + b_f32.size * 4 + w_out.size * 4 + b_out.size * 4
                        + bp * NUM_CLASSES * 4),
    )

    out = pl.pallas_call(
        lstm_clf_kernel,
        out_shape=jax.ShapeDtypeStruct((bp, NUM_CLASSES), jnp.float32),
        grid_spec=pltpu.PrefetchScalarGridSpec(
            num_scalar_prefetch=0,
            grid=(n_tiles,),                                  # batch-tile grid
            in_specs=[
                # x: one (B_TILE*T, D) batch tile per grid step (pipelined /
                # double-buffered against the recurrence of the previous tile).
                pl.BlockSpec((B_TILE * t_len, d), lambda i: (i, 0)),
                # Weights / biases: constant index_map -> DMA'd once, resident.
                pl.BlockSpec((d, 4 * H), lambda i: (0, 0)),           # W_ih
                pl.BlockSpec((H, 4 * H), lambda i: (0, 0)),           # W_hh
                pl.BlockSpec((1, 4 * H), lambda i: (0, 0)),           # bias
                pl.BlockSpec((H, NUM_CLASSES), lambda i: (0, 0)),     # W_out
                pl.BlockSpec((1, NUM_CLASSES), lambda i: (0, 0)),     # b_out
            ],
            out_specs=pl.BlockSpec((B_TILE, NUM_CLASSES), lambda i: (i, 0)),
        ),
        compiler_params=pltpu.CompilerParams(
            dimension_semantics=("parallel",),   # shards tiles over v7x's 2 TCs
            vmem_limit_bytes=32 * 1024 * 1024),
        cost_estimate=cost,
    )(x_flat, w_ih_bf, w_hh_bf, b_f32, w_out, b_out)

    return out[:b_sz]


def reference_forward(x_btd, w_ih, w_hh, b, w_out, b_out):
    """Plain-JAX f32 reference of the same LSTM + linear + sigmoid."""
    def step(carry, x_t):
        h, c = carry
        gates = x_t @ w_ih + h @ w_hh + b[0]
        i_g = jax.nn.sigmoid(gates[:, 0 * H:1 * H])
        f_g = jax.nn.sigmoid(gates[:, 1 * H:2 * H])
        g_g = jnp.tanh(gates[:, 2 * H:3 * H])
        o_g = jax.nn.sigmoid(gates[:, 3 * H:4 * H])
        c_new = f_g * c + i_g * g_g
        h_new = o_g * jnp.tanh(c_new)
        return (h_new, c_new), None

    x_tbd = jnp.transpose(x_btd, (1, 0, 2))
    h0 = jnp.zeros((x_btd.shape[0], H), jnp.float32)
    (h, _), _ = jax.lax.scan(step, (h0, h0), x_tbd)
    return jax.nn.sigmoid(h @ w_out + b_out[0])


if __name__ == "__main__":
    key = jax.random.PRNGKey(0)
    kx, k1, k2, k3, k4, k5, k6 = jax.random.split(key, 7)

    # Synthetic "last_hidden_state" embeddings (stand-in for the frozen
    # indic-bert embedder output).
    x = jax.random.normal(kx, (B, T, D), dtype=jnp.float32)

    # Deterministic parameter init mimicking torch.nn.LSTM / nn.Linear
    # uniform(-1/sqrt(H), 1/sqrt(H)).  Gate order [i, f, g, o].
    bound = 1.0 / jnp.sqrt(jnp.float32(H))
    w_ih = jax.random.uniform(k1, (D, 4 * H), jnp.float32, -bound, bound)
    w_hh = jax.random.uniform(k2, (H, 4 * H), jnp.float32, -bound, bound)
    b_ih = jax.random.uniform(k3, (1, 4 * H), jnp.float32, -bound, bound)
    b_hh = jax.random.uniform(k4, (1, 4 * H), jnp.float32, -bound, bound)
    b = b_ih + b_hh                               # combined LSTM bias
    w_out = jax.random.uniform(k5, (H, NUM_CLASSES), jnp.float32, -bound, bound)
    b_out = jax.random.uniform(k6, (1, NUM_CLASSES), jnp.float32, -bound, bound)

    # One-time weight preprocessing (dtype only; no padding needed).
    params = prepare_params(w_ih, w_hh, b, w_out, b_out)

    out = classifier_forward(x, *params)
    out = jax.block_until_ready(out)

    ref = reference_forward(x, w_ih, w_hh, b, w_out, b_out)
    assert out.shape == (B, NUM_CLASSES), out.shape
    # bf16 matmul operands (with f32 accumulation and f32 gate math) introduce
    # ~1e-3-level deviation from the pure-f32 reference; outputs are
    # post-sigmoid values in [0, 1].
    assert jnp.allclose(out, ref, atol=2e-2, rtol=2e-2), (out, ref)

    # TODO(synk): tokenizer + pretrained indic-bert embedder (and the unused
    # DistilBertForSequenceClassification head) are external pretrained models
    # with no Pallas equivalent; the kernel starts from the embedding tensor.
    print("KERNEL_OK")
</pallas_src>

<mosaic_0001>
module attributes {stable_mosaic.version = 11 : i64} {
  func.func @lstm_clf_kernel(%arg0: i32, %arg1: memref<64x768xbf16, #tpu.memory_space<vmem>>, %arg2: memref<768x256xbf16, #tpu.memory_space<vmem>>, %arg3: memref<64x256xbf16, #tpu.memory_space<vmem>>, %arg4: memref<1x256xf32, #tpu.memory_space<vmem>>, %arg5: memref<64x2xf32, #tpu.memory_space<vmem>>, %arg6: memref<1x2xf32, #tpu.memory_space<vmem>>, %arg7: memref<8x2xf32, #tpu.memory_space<vmem>>) attributes {dimension_semantics = [#tpu.dimension_semantics<parallel>], iteration_bounds = array<i64: 1>, scalar_prefetch = 0 : i64, scratch_operands = 0 : i64, tpu.core_type = #tpu.core_type<tc>, window_params = [{transform_indices = @transform_0, window_bounds = array<i64: 64, 768>}, {pipeline_mode = #tpu.pipeline_mode<synchronous>, transform_indices = @transform_1, window_bounds = array<i64: 768, 256>}, {pipeline_mode = #tpu.pipeline_mode<synchronous>, transform_indices = @transform_2, window_bounds = array<i64: 64, 256>}, {pipeline_mode = #tpu.pipeline_mode<synchronous>, transform_indices = @transform_3, window_bounds = array<i64: 1, 256>}, {pipeline_mode = #tpu.pipeline_mode<synchronous>, transform_indices = @transform_4, window_bounds = array<i64: 64, 2>}, {pipeline_mode = #tpu.pipeline_mode<synchronous>, transform_indices = @transform_5, window_bounds = array<i64: 1, 2>}, {transform_indices = @transform_6, window_bounds = array<i64: 8, 2>}]} {
    %c0 = arith.constant 0 : index
    %c0_0 = arith.constant 0 : index
    %0 = vector.load %arg1[%c0, %c0_0] : memref<64x768xbf16, #tpu.memory_space<vmem>>, vector<64x768xbf16>
    %c0_1 = arith.constant 0 : index
    %c0_2 = arith.constant 0 : index
    %1 = vector.load %arg2[%c0_1, %c0_2] : memref<768x256xbf16, #tpu.memory_space<vmem>>, vector<768x256xbf16>
    %cst = arith.constant dense<0.000000e+00> : vector<64x256xf32>
    %2 = tpu.matmul %0, %1, %cst {dimension_numbers = #tpu.dot_dimension_numbers<[1], [0], [0], [1], [0, 0, 1, 1], [], []>} : vector<64x768xbf16>, vector<768x256xbf16>, vector<64x256xf32> -> vector<64x256xf32>
    %c0_3 = arith.constant 0 : index
    %c0_4 = arith.constant 0 : index
    %3 = vector.load %arg4[%c0_3, %c0_4] : memref<1x256xf32, #tpu.memory_space<vmem>>, vector<1x256xf32>
    %4 = vector.broadcast %3 : vector<1x256xf32> to vector<64x256xf32>
    %5 = arith.addf %2, %4 : vector<64x256xf32>
    %6 = vector.shape_cast %5 : vector<64x256xf32> to vector<8x8x256xf32>
    %c0_5 = arith.constant 0 : index
    %c0_6 = arith.constant 0 : index
    %7 = vector.load %arg3[%c0_5, %c0_6] : memref<64x256xbf16, #tpu.memory_space<vmem>>, vector<64x256xbf16>
    %cst_7 = arith.constant 0.000000e+00 : f32
    %8 = vector.broadcast %cst_7 : f32 to vector<8x64xf32>
    %cst_8 = arith.constant 0.000000e+00 : f32
    %9 = vector.broadcast %cst_8 : f32 to vector<8x64xf32>
    %10 = vector.extract_strided_slice %6 {offsets = [0, 0, 0], sizes = [8, 1, 256], strides = [1, 1, 1]} : vector<8x8x256xf32> to vector<8x1x256xf32>
    %11 = vector.shape_cast %10 : vector<8x1x256xf32> to vector<8x256xf32>
    %12 = arith.truncf %8 : vector<8x64xf32> to vector<8x64xbf16>
    %cst_9 = arith.constant dense<0.000000e+00> : vector<8x256xf32>
    %13 = tpu.matmul %12, %7, %cst_9 {dimension_numbers = #tpu.dot_dimension_numbers<[1], [0], [0], [1], [0, 0, 1, 1], [], []>} : vector<8x64xbf16>, vector<64x256xbf16>, vector<8x256xf32> -> vector<8x256xf32>
    %14 = arith.addf %11, %13 : vector<8x256xf32>
    %15 = vector.extract_strided_slice %14 {offsets = [0, 0], sizes = [8, 64], strides = [1, 1]} : vector<8x256xf32> to vector<8x64xf32>
    %16 = arith.negf %15 : vector<8x64xf32>
    %17 = math.exp %16 : vector<8x64xf32>
    %cst_10 = arith.constant 1.000000e+00 : f32
    %18 = vector.broadcast %cst_10 : f32 to vector<8x64xf32>
    %19 = arith.addf %18, %17 : vector<8x64xf32>
    %20 = arith.divf %18, %19 : vector<8x64xf32>
    %21 = vector.extract_strided_slice %14 {offsets = [0, 64], sizes = [8, 64], strides = [1, 1]} : vector<8x256xf32> to vector<8x64xf32>
    %22 = arith.negf %21 : vector<8x64xf32>
    %23 = math.exp %22 : vector<8x64xf32>
    %cst_11 = arith.constant 1.000000e+00 : f32
    %24 = vector.broadcast %cst_11 : f32 to vector<8x64xf32>
    %25 = arith.addf %24, %23 : vector<8x64xf32>
    %26 = arith.divf %24, %25 : vector<8x64xf32>
    %27 = vector.extract_strided_slice %14 {offsets = [0, 128], sizes = [8, 64], strides = [1, 1]} : vector<8x256xf32> to vector<8x64xf32>
    %28 = math.tanh %27 : vector<8x64xf32>
    %29 = vector.extract_strided_slice %14 {offsets = [0, 192], sizes = [8, 64], strides = [1, 1]} : vector<8x256xf32> to vector<8x64xf32>
    %30 = arith.negf %29 : vector<8x64xf32>
    %31 = math.exp %30 : vector<8x64xf32>
    %cst_12 = arith.constant 1.000000e+00 : f32
    %32 = vector.broadcast %cst_12 : f32 to vector<8x64xf32>
    %33 = arith.addf %32, %31 : vector<8x64xf32>
    %34 = arith.divf %32, %33 : vector<8x64xf32>
    %35 = arith.mulf %26, %9 : vector<8x64xf32>
    %36 = arith.mulf %20, %28 : vector<8x64xf32>
    %37 = arith.addf %35, %36 : vector<8x64xf32>
    %38 = math.tanh %37 : vector<8x64xf32>
    %39 = arith.mulf %34, %38 : vector<8x64xf32>
    %40 = vector.extract_strided_slice %6 {offsets = [0, 1, 0], sizes = [8, 1, 256], strides = [1, 1, 1]} : vector<8x8x256xf32> to vector<8x1x256xf32>
    %41 = vector.shape_cast %40 : vector<8x1x256xf32> to vector<8x256xf32>
    %42 = arith.truncf %39 : vector<8x64xf32> to vector<8x64xbf16>
    %cst_13 = arith.constant dense<0.000000e+00> : vector<8x256xf32>
    %43 = tpu.matmul %42, %7, %cst_13 {dimension_numbers = #tpu.dot_dimension_numbers<[1], [0], [0], [1], [0, 0, 1, 1], [], []>} : vector<8x64xbf16>, vector<64x256xbf16>, vector<8x256xf32> -> vector<8x256xf32>
    %44 = arith.addf %41, %43 : vector<8x256xf32>
    %45 = vector.extract_strided_slice %44 {offsets = [0, 0], sizes = [8, 64], strides = [1, 1]} : vector<8x256xf32> to vector<8x64xf32>
    %46 = arith.negf %45 : vector<8x64xf32>
    %47 = math.exp %46 : vector<8x64xf32>
    %cst_14 = arith.constant 1.000000e+00 : f32
    %48 = vector.broadcast %cst_14 : f32 to vector<8x64xf32>
    %49 = arith.addf %48, %47 : vector<8x64xf32>
    %50 = arith.divf %48, %49 : vector<8x64xf32>
    %51 = vector.extract_strided_slice %44 {offsets = [0, 64], sizes = [8, 64], strides = [1, 1]} : vector<8x256xf32> to vector<8x64xf32>
    %52 = arith.negf %51 : vector<8x64xf32>
    %53 = math.exp %52 : vector<8x64xf32>
    %cst_15 = arith.constant 1.000000e+00 : f32
    %54 = vector.broadcast %cst_15 : f32 to vector<8x64xf32>
    %55 = arith.addf %54, %53 : vector<8x64xf32>
    %56 = arith.divf %54, %55 : vector<8x64xf32>
    %57 = vector.extract_strided_slice %44 {offsets = [0, 128], sizes = [8, 64], strides = [1, 1]} : vector<8x256xf32> to vector<8x64xf32>
    %58 = math.tanh %57 : vector<8x64xf32>
    %59 = vector.extract_strided_slice %44 {offsets = [0, 192], sizes = [8, 64], strides = [1, 1]} : vector<8x256xf32> to vector<8x64xf32>
    %60 = arith.negf %59 : vector<8x64xf32>
    %61 = math.exp %60 : vector<8x64xf32>
    %cst_16 = arith.constant 1.000000e+00 : f32
    %62 = vector.broadcast %cst_16 : f32 to vector<8x64xf32>
    %63 = arith.addf %62, %61 : vector<8x64xf32>
    %64 = arith.divf %62, %63 : vector<8x64xf32>
    %65 = arith.mulf %56, %37 : vector<8x64xf32>
    %66 = arith.mulf %50, %58 : vector<8x64xf32>
    %67 = arith.addf %65, %66 : vector<8x64xf32>
    %68 = math.tanh %67 : vector<8x64xf32>
    %69 = arith.mulf %64, %68 : vector<8x64xf32>
    %70 = vector.extract_strided_slice %6 {offsets = [0, 2, 0], sizes = [8, 1, 256], strides = [1, 1, 1]} : vector<8x8x256xf32> to vector<8x1x256xf32>
    %71 = vector.shape_cast %70 : vector<8x1x256xf32> to vector<8x256xf32>
    %72 = arith.truncf %69 : vector<8x64xf32> to vector<8x64xbf16>
    %cst_17 = arith.constant dense<0.000000e+00> : vector<8x256xf32>
    %73 = tpu.matmul %72, %7, %cst_17 {dimension_numbers = #tpu.dot_dimension_numbers<[1], [0], [0], [1], [0, 0, 1, 1], [], []>} : vector<8x64xbf16>, vector<64x256xbf16>, vector<8x256xf32> -> vector<8x256xf32>
    %74 = arith.addf %71, %73 : vector<8x256xf32>
    %75 = vector.extract_strided_slice %74 {offsets = [0, 0], sizes = [8, 64], strides = [1, 1]} : vector<8x256xf32> to vector<8x64xf32>
    %76 = arith.negf %75 : vector<8x64xf32>
    %77 = math.exp %76 : vector<8x64xf32>
    %cst_18 = arith.constant 1.000000e+00 : f32
    %78 = vector.broadcast %cst_18 : f32 to vector<8x64xf32>
    %79 = arith.addf %78, %77 : vector<8x64xf32>
    %80 = arith.divf %78, %79 : vector<8x64xf32>
    %81 = vector.extract_strided_slice %74 {offsets = [0, 64], sizes = [8, 64], strides = [1, 1]} : vector<8x256xf32> to vector<8x64xf32>
    %82 = arith.negf %81 : vector<8x64xf32>
    %83 = math.exp %82 : vector<8x64xf32>
    %cst_19 = arith.constant 1.000000e+00 : f32
    %84 = vector.broadcast %cst_19 : f32 to vector<8x64xf32>
    %85 = arith.addf %84, %83 : vector<8x64xf32>
    %86 = arith.divf %84, %85 : vector<8x64xf32>
    %87 = vector.extract_strided_slice %74 {offsets = [0, 128], sizes = [8, 64], strides = [1, 1]} : vector<8x256xf32> to vector<8x64xf32>
    %88 = math.tanh %87 : vector<8x64xf32>
    %89 = vector.extract_strided_slice %74 {offsets = [0, 192], sizes = [8, 64], strides = [1, 1]} : vector<8x256xf32> to vector<8x64xf32>
    %90 = arith.negf %89 : vector<8x64xf32>
    %91 = math.exp %90 : vector<8x64xf32>
    %cst_20 = arith.constant 1.000000e+00 : f32
    %92 = vector.broadcast %cst_20 : f32 to vector<8x64xf32>
    %93 = arith.addf %92, %91 : vector<8x64xf32>
    %94 = arith.divf %92, %93 : vector<8x64xf32>
    %95 = arith.mulf %86, %67 : vector<8x64xf32>
    %96 = arith.mulf %80, %88 : vector<8x64xf32>
    %97 = arith.addf %95, %96 : vector<8x64xf32>
    %98 = math.tanh %97 : vector<8x64xf32>
    %99 = arith.mulf %94, %98 : vector<8x64xf32>
    %100 = vector.extract_strided_slice %6 {offsets = [0, 3, 0], sizes = [8, 1, 256], strides = [1, 1, 1]} : vector<8x8x256xf32> to vector<8x1x256xf32>
    %101 = vector.shape_cast %100 : vector<8x1x256xf32> to vector<8x256xf32>
    %102 = arith.truncf %99 : vector<8x64xf32> to vector<8x64xbf16>
    %cst_21 = arith.constant dense<0.000000e+00> : vector<8x256xf32>
    %103 = tpu.matmul %102, %7, %cst_21 {dimension_numbers = #tpu.dot_dimension_numbers<[1], [0], [0], [1], [0, 0, 1, 1], [], []>} : vector<8x64xbf16>, vector<64x256xbf16>, vector<8x256xf32> -> vector<8x256xf32>
    %104 = arith.addf %101, %103 : vector<8x256xf32>
    %105 = vector.extract_strided_slice %104 {offsets = [0, 0], sizes = [8, 64], strides = [1, 1]} : vector<8x256xf32> to vector<8x64xf32>
    %106 = arith.negf %105 : vector<8x64xf32>
    %107 = math.exp %106 : vector<8x64xf32>
    %cst_22 = arith.constant 1.000000e+00 : f32
    %108 = vector.broadcast %cst_22 : f32 to vector<8x64xf32>
    %109 = arith.addf %108, %107 : vector<8x64xf32>
    %110 = arith.divf %108, %109 : vector<8x64xf32>
    %111 = vector.extract_strided_slice %104 {offsets = [0, 64], sizes = [8, 64], strides = [1, 1]} : vector<8x256xf32> to vector<8x64xf32>
    %112 = arith.negf %111 : vector<8x64xf32>
    %113 = math.exp %112 : vector<8x64xf32>
    %cst_23 = arith.constant 1.000000e+00 : f32
    %114 = vector.broadcast %cst_23 : f32 to vector<8x64xf32>
    %115 = arith.addf %114, %113 : vector<8x64xf32>
    %116 = arith.divf %114, %115 : vector<8x64xf32>
    %117 = vector.extract_strided_slice %104 {offsets = [0, 128], sizes = [8, 64], strides = [1, 1]} : vector<8x256xf32> to vector<8x64xf32>
    %118 = math.tanh %117 : vector<8x64xf32>
    %119 = vector.extract_strided_slice %104 {offsets = [0, 192], sizes = [8, 64], strides = [1, 1]} : vector<8x256xf32> to vector<8x64xf32>
    %120 = arith.negf %119 : vector<8x64xf32>
    %121 = math.exp %120 : vector<8x64xf32>
    %cst_24 = arith.constant 1.000000e+00 : f32
    %122 = vector.broadcast %cst_24 : f32 to vector<8x64xf32>
    %123 = arith.addf %122, %121 : vector<8x64xf32>
    %124 = arith.divf %122, %123 : vector<8x64xf32>
    %125 = arith.mulf %116, %97 : vector<8x64xf32>
    %126 = arith.mulf %110, %118 : vector<8x64xf32>
    %127 = arith.addf %125, %126 : vector<8x64xf32>
    %128 = math.tanh %127 : vector<8x64xf32>
    %129 = arith.mulf %124, %128 : vector<8x64xf32>
    %130 = vector.extract_strided_slice %6 {offsets = [0, 4, 0], sizes = [8, 1, 256], strides = [1, 1, 1]} : vector<8x8x256xf32> to vector<8x1x256xf32>
    %131 = vector.shape_cast %130 : vector<8x1x256xf32> to vector<8x256xf32>
    %132 = arith.truncf %129 : vector<8x64xf32> to vector<8x64xbf16>
    %cst_25 = arith.constant dense<0.000000e+00> : vector<8x256xf32>
    %133 = tpu.matmul %132, %7, %cst_25 {dimension_numbers = #tpu.dot_dimension_numbers<[1], [0], [0], [1], [0, 0, 1, 1], [], []>} : vector<8x64xbf16>, vector<64x256xbf16>, vector<8x256xf32> -> vector<8x256xf32>
    %134 = arith.addf %131, %133 : vector<8x256xf32>
    %135 = vector.extract_strided_slice %134 {offsets = [0, 0], sizes = [8, 64], strides = [1, 1]} : vector<8x256xf32> to vector<8x64xf32>
    %136 = arith.negf %135 : vector<8x64xf32>
    %137 = math.exp %136 : vector<8x64xf32>
    %cst_26 = arith.constant 1.000000e+00 : f32
    %138 = vector.broadcast %cst_26 : f32 to vector<8x64xf32>
    %139 = arith.addf %138, %137 : vector<8x64xf32>
    %140 = arith.divf %138, %139 : vector<8x64xf32>
    %141 = vector.extract_strided_slice %134 {offsets = [0, 64], sizes = [8, 64], strides = [1, 1]} : vector<8x256xf32> to vector<8x64xf32>
    %142 = arith.negf %141 : vector<8x64xf32>
    %143 = math.exp %142 : vector<8x64xf32>
    %cst_27 = arith.constant 1.000000e+00 : f32
    %144 = vector.broadcast %cst_27 : f32 to vector<8x64xf32>
    %145 = arith.addf %144, %143 : vector<8x64xf32>
    %146 = arith.divf %144, %145 : vector<8x64xf32>
    %147 = vector.extract_strided_slice %134 {offsets = [0, 128], sizes = [8, 64], strides = [1, 1]} : vector<8x256xf32> to vector<8x64xf32>
    %148 = math.tanh %147 : vector<8x64xf32>
    %149 = vector.extract_strided_slice %134 {offsets = [0, 192], sizes = [8, 64], strides = [1, 1]} : vector<8x256xf32> to vector<8x64xf32>
    %150 = arith.negf %149 : vector<8x64xf32>
    %151 = math.exp %150 : vector<8x64xf32>
    %cst_28 = arith.constant 1.000000e+00 : f32
    %152 = vector.broadcast %cst_28 : f32 to vector<8x64xf32>
    %153 = arith.addf %152, %151 : vector<8x64xf32>
    %154 = arith.divf %152, %153 : vector<8x64xf32>
    %155 = arith.mulf %146, %127 : vector<8x64xf32>
    %156 = arith.mulf %140, %148 : vector<8x64xf32>
    %157 = arith.addf %155, %156 : vector<8x64xf32>
    %158 = math.tanh %157 : vector<8x64xf32>
    %159 = arith.mulf %154, %158 : vector<8x64xf32>
    %160 = vector.extract_strided_slice %6 {offsets = [0, 5, 0], sizes = [8, 1, 256], strides = [1, 1, 1]} : vector<8x8x256xf32> to vector<8x1x256xf32>
    %161 = vector.shape_cast %160 : vector<8x1x256xf32> to vector<8x256xf32>
    %162 = arith.truncf %159 : vector<8x64xf32> to vector<8x64xbf16>
    %cst_29 = arith.constant dense<0.000000e+00> : vector<8x256xf32>
    %163 = tpu.matmul %162, %7, %cst_29 {dimension_numbers = #tpu.dot_dimension_numbers<[1], [0], [0], [1], [0, 0, 1, 1], [], []>} : vector<8x64xbf16>, vector<64x256xbf16>, vector<8x256xf32> -> vector<8x256xf32>
    %164 = arith.addf %161, %163 : vector<8x256xf32>
    %165 = vector.extract_strided_slice %164 {offsets = [0, 0], sizes = [8, 64], strides = [1, 1]} : vector<8x256xf32> to vector<8x64xf32>
    %166 = arith.negf %165 : vector<8x64xf32>
    %167 = math.exp %166 : vector<8x64xf32>
    %cst_30 = arith.constant 1.000000e+00 : f32
    %168 = vector.broadcast %cst_30 : f32 to vector<8x64xf32>
    %169 = arith.addf %168, %167 : vector<8x64xf32>
    %170 = arith.divf %168, %169 : vector<8x64xf32>
    %171 = vector.extract_strided_slice %164 {offsets = [0, 64], sizes = [8, 64], strides = [1, 1]} : vector<8x256xf32> to vector<8x64xf32>
    %172 = arith.negf %171 : vector<8x64xf32>
    %173 = math.exp %172 : vector<8x64xf32>
    %cst_31 = arith.constant 1.000000e+00 : f32
    %174 = vector.broadcast %cst_31 : f32 to vector<8x64xf32>
    %175 = arith.addf %174, %173 : vector<8x64xf32>
    %176 = arith.divf %174, %175 : vector<8x64xf32>
    %177 = vector.extract_strided_slice %164 {offsets = [0, 128], sizes = [8, 64], strides = [1, 1]} : vector<8x256xf32> to vector<8x64xf32>
    %178 = math.tanh %177 : vector<8x64xf32>
    %179 = vector.extract_strided_slice %164 {offsets = [0, 192], sizes = [8, 64], strides = [1, 1]} : vector<8x256xf32> to vector<8x64xf32>
    %180 = arith.negf %179 : vector<8x64xf32>
    %181 = math.exp %180 : vector<8x64xf32>
    %cst_32 = arith.constant 1.000000e+00 : f32
    %182 = vector.broadcast %cst_32 : f32 to vector<8x64xf32>
    %183 = arith.addf %182, %181 : vector<8x64xf32>
    %184 = arith.divf %182, %183 : vector<8x64xf32>
    %185 = arith.mulf %176, %157 : vector<8x64xf32>
    %186 = arith.mulf %170, %178 : vector<8x64xf32>
    %187 = arith.addf %185, %186 : vector<8x64xf32>
    %188 = math.tanh %187 : vector<8x64xf32>
    %189 = arith.mulf %184, %188 : vector<8x64xf32>
    %190 = vector.extract_strided_slice %6 {offsets = [0, 6, 0], sizes = [8, 1, 256], strides = [1, 1, 1]} : vector<8x8x256xf32> to vector<8x1x256xf32>
    %191 = vector.shape_cast %190 : vector<8x1x256xf32> to vector<8x256xf32>
    %192 = arith.truncf %189 : vector<8x64xf32> to vector<8x64xbf16>
    %cst_33 = arith.constant dense<0.000000e+00> : vector<8x256xf32>
    %193 = tpu.matmul %192, %7, %cst_33 {dimension_numbers = #tpu.dot_dimension_numbers<[1], [0], [0], [1], [0, 0, 1, 1], [], []>} : vector<8x64xbf16>, vector<64x256xbf16>, vector<8x256xf32> -> vector<8x256xf32>
    %194 = arith.addf %191, %193 : vector<8x256xf32>
    %195 = vector.extract_strided_slice %194 {offsets = [0, 0], sizes = [8, 64], strides = [1, 1]} : vector<8x256xf32> to vector<8x64xf32>
    %196 = arith.negf %195 : vector<8x64xf32>
    %197 = math.exp %196 : vector<8x64xf32>
    %cst_34 = arith.constant 1.000000e+00 : f32
    %198 = vector.broadcast %cst_34 : f32 to vector<8x64xf32>
    %199 = arith.addf %198, %197 : vector<8x64xf32>
    %200 = arith.divf %198, %199 : vector<8x64xf32>
    %201 = vector.extract_strided_slice %194 {offsets = [0, 64], sizes = [8, 64], strides = [1, 1]} : vector<8x256xf32> to vector<8x64xf32>
    %202 = arith.negf %201 : vector<8x64xf32>
    %203 = math.exp %202 : vector<8x64xf32>
    %cst_35 = arith.constant 1.000000e+00 : f32
    %204 = vector.broadcast %cst_35 : f32 to vector<8x64xf32>
    %205 = arith.addf %204, %203 : vector<8x64xf32>
    %206 = arith.divf %204, %205 : vector<8x64xf32>
    %207 = vector.extract_strided_slice %194 {offsets = [0, 128], sizes = [8, 64], strides = [1, 1]} : vector<8x256xf32> to vector<8x64xf32>
    %208 = math.tanh %207 : vector<8x64xf32>
    %209 = vector.extract_strided_slice %194 {offsets = [0, 192], sizes = [8, 64], strides = [1, 1]} : vector<8x256xf32> to vector<8x64xf32>
    %210 = arith.negf %209 : vector<8x64xf32>
    %211 = math.exp %210 : vector<8x64xf32>
    %cst_36 = arith.constant 1.000000e+00 : f32
    %212 = vector.broadcast %cst_36 : f32 to vector<8x64xf32>
    %213 = arith.addf %212, %211 : vector<8x64xf32>
    %214 = arith.divf %212, %213 : vector<8x64xf32>
    %215 = arith.mulf %206, %187 : vector<8x64xf32>
    %216 = arith.mulf %200, %208 : vector<8x64xf32>
    %217 = arith.addf %215, %216 : vector<8x64xf32>
    %218 = math.tanh %217 : vector<8x64xf32>
    %219 = arith.mulf %214, %218 : vector<8x64xf32>
    %220 = vector.extract_strided_slice %6 {offsets = [0, 7, 0], sizes = [8, 1, 256], strides = [1, 1, 1]} : vector<8x8x256xf32> to vector<8x1x256xf32>
    %221 = vector.shape_cast %220 : vector<8x1x256xf32> to vector<8x256xf32>
    %222 = arith.truncf %219 : vector<8x64xf32> to vector<8x64xbf16>
    %cst_37 = arith.constant dense<0.000000e+00> : vector<8x256xf32>
    %223 = tpu.matmul %222, %7, %cst_37 {dimension_numbers = #tpu.dot_dimension_numbers<[1], [0], [0], [1], [0, 0, 1, 1], [], []>} : vector<8x64xbf16>, vector<64x256xbf16>, vector<8x256xf32> -> vector<8x256xf32>
    %224 = arith.addf %221, %223 : vector<8x256xf32>
    %225 = vector.extract_strided_slice %224 {offsets = [0, 0], sizes = [8, 64], strides = [1, 1]} : vector<8x256xf32> to vector<8x64xf32>
    %226 = arith.negf %225 : vector<8x64xf32>
    %227 = math.exp %226 : vector<8x64xf32>
    %cst_38 = arith.constant 1.000000e+00 : f32
    %228 = vector.broadcast %cst_38 : f32 to vector<8x64xf32>
    %229 = arith.addf %228, %227 : vector<8x64xf32>
    %230 = arith.divf %228, %229 : vector<8x64xf32>
    %231 = vector.extract_strided_slice %224 {offsets = [0, 64], sizes = [8, 64], strides = [1, 1]} : vector<8x256xf32> to vector<8x64xf32>
    %232 = arith.negf %231 : vector<8x64xf32>
    %233 = math.exp %232 : vector<8x64xf32>
    %cst_39 = arith.constant 1.000000e+00 : f32
    %234 = vector.broadcast %cst_39 : f32 to vector<8x64xf32>
    %235 = arith.addf %234, %233 : vector<8x64xf32>
    %236 = arith.divf %234, %235 : vector<8x64xf32>
    %237 = vector.extract_strided_slice %224 {offsets = [0, 128], sizes = [8, 64], strides = [1, 1]} : vector<8x256xf32> to vector<8x64xf32>
    %238 = math.tanh %237 : vector<8x64xf32>
    %239 = vector.extract_strided_slice %224 {offsets = [0, 192], sizes = [8, 64], strides = [1, 1]} : vector<8x256xf32> to vector<8x64xf32>
    %240 = arith.negf %239 : vector<8x64xf32>
    %241 = math.exp %240 : vector<8x64xf32>
    %cst_40 = arith.constant 1.000000e+00 : f32
    %242 = vector.broadcast %cst_40 : f32 to vector<8x64xf32>
    %243 = arith.addf %242, %241 : vector<8x64xf32>
    %244 = arith.divf %242, %243 : vector<8x64xf32>
    %245 = arith.mulf %236, %217 : vector<8x64xf32>
    %246 = arith.mulf %230, %238 : vector<8x64xf32>
    %247 = arith.addf %245, %246 : vector<8x64xf32>
    %248 = math.tanh %247 : vector<8x64xf32>
    %249 = arith.mulf %244, %248 : vector<8x64xf32>
    %c0_41 = arith.constant 0 : index
    %c0_42 = arith.constant 0 : index
    %250 = vector.load %arg5[%c0_41, %c0_42] : memref<64x2xf32, #tpu.memory_space<vmem>>, vector<64x2xf32>
    %cst_43 = arith.constant dense<0.000000e+00> : vector<8x2xf32>
    %251 = tpu.matmul %249, %250, %cst_43 {dimension_numbers = #tpu.dot_dimension_numbers<[1], [0], [0], [1], [0, 0, 1, 1], [], []>} : vector<8x64xf32>, vector<64x2xf32>, vector<8x2xf32> -> vector<8x2xf32>
    %c0_44 = arith.constant 0 : index
    %c0_45 = arith.constant 0 : index
    %252 = vector.load %arg6[%c0_44, %c0_45] : memref<1x2xf32, #tpu.memory_space<vmem>>, vector<1x2xf32>
    %253 = vector.broadcast %252 : vector<1x2xf32> to vector<8x2xf32>
    %254 = arith.addf %251, %253 : vector<8x2xf32>
    %255 = arith.negf %254 : vector<8x2xf32>
    %256 = math.exp %255 : vector<8x2xf32>
    %cst_46 = arith.constant 1.000000e+00 : f32
    %257 = vector.broadcast %cst_46 : f32 to vector<8x2xf32>
    %258 = arith.addf %257, %256 : vector<8x2xf32>
    %259 = arith.divf %257, %258 : vector<8x2xf32>
    %c0_47 = arith.constant 0 : index
    %c0_48 = arith.constant 0 : index
    %260 = vector.load %arg7[%c0_47, %c0_48] : memref<8x2xf32, #tpu.memory_space<vmem>>, vector<8x2xf32>
    tpu.vector_store %arg7[%c0_47, %c0_48], %259 {strides = array<i32>} : memref<8x2xf32, #tpu.memory_space<vmem>>, vector<8x2xf32>,
    return
  }
  func.func @transform_0(%arg0: i32) -> (i32, i32) {
    %c0_i32 = arith.constant 0 : i32
    %c0_i32_0 = arith.constant 0 : i32
    return %arg0, %c0_i32 : i32, i32
  }
  func.func @transform_1(%arg0: i32) -> (i32, i32) {
    %c0_i32 = arith.constant 0 : i32
    %c0_i32_0 = arith.constant 0 : i32
    %c0_i32_1 = arith.constant 0 : i32
    return %c0_i32, %c0_i32_0 : i32, i32
  }
  func.func @transform_2(%arg0: i32) -> (i32, i32) {
    %c0_i32 = arith.constant 0 : i32
    %c0_i32_0 = arith.constant 0 : i32
    %c0_i32_1 = arith.constant 0 : i32
    return %c0_i32, %c0_i32_0 : i32, i32
  }
  func.func @transform_3(%arg0: i32) -> (i32, i32) {
    %c0_i32 = arith.constant 0 : i32
    %c0_i32_0 = arith.constant 0 : i32
    %c0_i32_1 = arith.constant 0 : i32
    return %c0_i32, %c0_i32_0 : i32, i32
  }
  func.func @transform_4(%arg0: i32) -> (i32, i32) {
    %c0_i32 = arith.constant 0 : i32
    %c0_i32_0 = arith.constant 0 : i32
    %c0_i32_1 = arith.constant 0 : i32
    return %c0_i32, %c0_i32_0 : i32, i32
  }
  func.func @transform_5(%arg0: i32) -> (i32, i32) {
    %c0_i32 = arith.constant 0 : i32
    %c0_i32_0 = arith.constant 0 : i32
    %c0_i32_1 = arith.constant 0 : i32
    return %c0_i32, %c0_i32_0 : i32, i32
  }
  func.func @transform_6(%arg0: i32) -> (i32, i32) {
    %c0_i32 = arith.constant 0 : i32
    %c0_i32_0 = arith.constant 0 : i32
    return %arg0, %c0_i32 : i32, i32
  }
}

</mosaic_0001>

<bundles_post_ra>
// kernel: classifier_forward.1
= control target key start
LH: loop header
LB: loop body
LE: loop exit
PB: predicated region body
PF: predicated region fallthrough
CT: control target
= control target key end

     0   :  { %11 = vsyncpa [#allocation3], 0  ;;  %s5072_s21 = smov [#allocation2]   ;;  %s6521_s0 = inlined_call_operand.vmem [shape: bf16[64,768], index: 0, kind: input, shape index: {}]   ;;  %s6522_s1 = inlined_call_operand.hbm [shape: bf16[768,256], index: 1, kind: input, shape index: {}]   ;;  %s6523_s2 = inlined_call_operand.vmem [shape: bf16[64,256], index: 2, kind: input, shape index: {}]   ;;  %s6524_s3 = inlined_call_operand.vmem [shape: f32[1,256], index: 3, kind: input, shape index: {}]   ;;  %s6525_s4 = inlined_call_operand.vmem [shape: f32[64,2], index: 4, kind: input, shape index: {}]   ;;  %s6526_s5 = inlined_call_operand.vmem [shape: f32[1,2], index: 5, kind: input, shape index: {}]   ;;  %s6527_s6 = inlined_call_operand.vmem [shape: f32[8,2], index: 6, kind: output, shape index: {}]  }
   0x1   :  { %s19_s22 = sshll.u32 %s5072_s21, 4  ;;  %s20_s22 = int_to_ptr.vmem [resolvable:$true] %s19_s22 }
   0x2   :  { %s5058_s23 = scalar_lea.vmem %s20_s22, 12288  ;;  %p5063_p1 = scmp.lt.s32.totalorder %s20_s22, %s20_s22 }
   0x3   :  { %p5059_p0 = scmp.ne.s32.totalorder %s20_s22, %s5058_s23  ;;  %p5064_p2 = scmp.lt.s32.totalorder %s5058_s23, %s5058_s23 }
   0x5   :  { %p5065_p3 = por %p5064_p2, %p5063_p1 }
   0x7   :  { %p5066_p4 = pnand %p5065_p3, %p5059_p0 }
   0x9   :  { %5069 = shalt.err (!%p5066_p4)
}
   0xa   :  { %s5073_s24 = smov 128   ;;  %s5074_s25 = smov 8  }
   0xb   :  { %25 = dma.hbm_to_vmem [thread:$0]  %s6522_s1, 12288, %s20_s22, [#allocation3], %s5073_s24, %s5073_s24, %s5074_s25  }
   0xc   :  { %5070 = dma.done.wait [#allocation3], 12288  }
   0xd   :  { %5071 = vsyncadd [#allocation3], 4294955008  ;;  %v4069_v0 = vld [vmem:[#allocation2 + $0x74] ss:$8 sps:$4 sm:$0xff]   ;;  %v4071_v1 = vld [vmem:[#allocation2 + $0x70] ss:$8 sps:$4 sm:$0xff]  }
   0xe   :  { %770 = vmatprep.subr.bf16.mxu0 %v4069_v0  ;;  %v4072_v2 = vld [vmem:[#allocation2 + $0x174] ss:$8 sps:$4 sm:$0xff]   ;;  %v4074_v3 = vld [vmem:[#allocation2 + $0x170] ss:$8 sps:$4 sm:$0xff]   ;;  %v4075_v4 = vld [vmem:[#allocation2 + $0x64] ss:$8 sps:$4 sm:$0xff]  }
   0xf   :  { %771 = vmatpush1.bf16.msra.mxu0 %v4071_v1  ;;  %v4077_v5 = vld [vmem:[#allocation2 + $0x60] ss:$8 sps:$4 sm:$0xff]   ;;  %843 = vmatprep.subr.bf16.mxu1 %v4072_v2  ;;  %v4078_v6 = vld [vmem:[#allocation2 + $0x164] ss:$8 sps:$4 sm:$0xff]   ;;  %v4081_v8 = vld [vmem:[#allocation2 + $0x54] ss:$8 sps:$4 sm:$0xff]  }
  0x10   :  { %844 = vmatpush1.bf16.msra.mxu1 %v4074_v3  ;;  %772 = vmatprep.subr.bf16.mxu0 %v4075_v4  ;;  %v4080_v7 = vld [vmem:[#allocation2 + $0x160] ss:$8 sps:$4 sm:$0xff]   ;;  %v4083_v9 = vld [vmem:[#allocation2 + $0x50] ss:$8 sps:$4 sm:$0xff]   ;;  %v4084_v10 = vld [vmem:[#allocation2 + $0x154] ss:$8 sps:$4 sm:$0xff]  }
  0x11   :  { %845 = vmatprep.subr.bf16.mxu1 %v4078_v6  ;;  %v4087_v11 = vld [vmem:[#allocation2 + $0x44] ss:$8 sps:$4 sm:$0xff]   ;;  %v4086_v12 = vld [vmem:[#allocation2 + $0x150] ss:$8 sps:$4 sm:$0xff]   ;;  %v4089_v14 = vld [vmem:[#allocation2 + $0x40] ss:$8 sps:$4 sm:$0xff]  }
  0x12   :  { %v4090_v13 = vld [vmem:[#allocation2 + $0x144] ss:$8 sps:$4 sm:$0xff]   ;;  %v4093_v15 = vld [vmem:[#allocation2 + $0x34] ss:$8 sps:$4 sm:$0xff]   ;;  %v4092_v16 = vld [vmem:[#allocation2 + $0x140] ss:$8 sps:$4 sm:$0xff]  }
  0x13   :  { %773 = vmatpush1.bf16.msra.mxu0 %v4077_v5  ;;  %v4096_v17 = vld [vmem:[#allocation2 + $0x134] ss:$8 sps:$4 sm:$0xff]   ;;  %v4095_v18 = vld [vmem:[#allocation2 + $0x30] ss:$8 sps:$4 sm:$0xff]   ;;  %v4099_v19 = vld [vmem:[#allocation2 + $0x24] ss:$8 sps:$4 sm:$0xff]  }
  0x14   :  { %774 = vmatprep.subr.bf16.mxu0 %v4081_v8  ;;  %846 = vmatpush1.bf16.msra.mxu1 %v4080_v7  ;;  %v4098_v20 = vld [vmem:[#allocation2 + $0x130] ss:$8 sps:$4 sm:$0xff]   ;;  %v4102_v21 = vld [vmem:[#allocation2 + $0x124] ss:$8 sps:$4 sm:$0xff]   ;;  %v4101_v22 = vld [vmem:[#allocation2 + $0x20] ss:$8 sps:$4 sm:$0xff]  }
  0x15   :  { %847 = vmatprep.subr.bf16.mxu1 %v4084_v10  ;;  %v4105_v23 = vld [vmem:[#allocation2 + $0x14] ss:$8 sps:$4 sm:$0xff]   ;;  %v4104_v24 = vld [vmem:[#allocation2 + $0x120] ss:$8 sps:$4 sm:$0xff]   ;;  %v4107_v26 = vld [vmem:[#allocation2 + $0x10] ss:$8 sps:$4 sm:$0xff]  }
  0x16   :  { %v4108_v25 = vld [vmem:[#allocation2 + $0x114] ss:$8 sps:$4 sm:$0xff]   ;;  %v4111_v27 = vld [vmem:[#allocation2 + $0x4] ss:$8 sps:$4 sm:$0xff]   ;;  %v4110_v28 = vld [vmem:[#allocation2 + $0x110] ss:$8 sps:$4 sm:$0xff]  }
  0x17   :  { %775 = vmatpush1.bf16.msra.mxu0 %v4083_v9  ;;  %v4114_v29 = vld [vmem:[#allocation2 + $0x104] ss:$8 sps:$4 sm:$0xff]   ;;  %v4113_v30 = vld [vmem:[#allocation2] ss:$8 sps:$4 sm:$0xff]   ;;  %v4117_v31 = vld [vmem:[#allocation2 + $0xf4] ss:$8 sps:$4 sm:$0xff]  }
  0x18   :  { %776 = vmatprep.subr.bf16.mxu0 %v4087_v11  ;;  %848 = vmatpush1.bf16.msra.mxu1 %v4086_v12  ;;  %v4116_v32 = vld [vmem:[#allocation2 + $0x100] ss:$8 sps:$4 sm:$0xff]   ;;  %v4120_v33 = vld [vmem:[#allocation2 + $0x1f4] ss:$8 sps:$4 sm:$0xff]   ;;  %v4119_v34 = vld [vmem:[#allocation2 + $0xf0] ss:$8 sps:$4 sm:$0xff]  }
  0x19   :  { %849 = vmatprep.subr.bf16.mxu1 %v4090_v13  ;;  %v4123_v35 = vld [vmem:[#allocation2 + $0xe4] ss:$8 sps:$4 sm:$0xff]   ;;  %v4122_v36 = vld [vmem:[#allocation2 + $0x1f0] ss:$8 sps:$4 sm:$0xff]   ;;  %v4125_v38 = vld [vmem:[#allocation2 + $0xe0] ss:$8 sps:$4 sm:$0xff]  }
  0x1a   :  { %v4126_v37 = vld [vmem:[#allocation2 + $0x1e4] ss:$8 sps:$4 sm:$0xff]   ;;  %v4129_v39 = vld [vmem:[#allocation2 + $0xd4] ss:$8 sps:$4 sm:$0xff]   ;;  %v4128_v40 = vld [vmem:[#allocation2 + $0x1e0] ss:$8 sps:$4 sm:$0xff]  }
  0x1b   :  { %777 = vmatpush1.bf16.msra.mxu0 %v4089_v14  ;;  %v4132_v41 = vld [vmem:[#allocation2 + $0x1d4] ss:$8 sps:$4 sm:$0xff]   ;;  %v4131_v42 = vld [vmem:[#allocation2 + $0xd0] ss:$8 sps:$4 sm:$0xff]   ;;  %v4135_v43 = vld [vmem:[#allocation2 + $0xc4] ss:$8 sps:$4 sm:$0xff]  }
  0x1c   :  { %778 = vmatprep.subr.bf16.mxu0 %v4093_v15  ;;  %850 = vmatpush1.bf16.msra.mxu1 %v4092_v16  ;;  %v4134_v44 = vld [vmem:[#allocation2 + $0x1d0] ss:$8 sps:$4 sm:$0xff]   ;;  %v4138_v45 = vld [vmem:[#allocation2 + $0x1c4] ss:$8 sps:$4 sm:$0xff]   ;;  %v4137_v46 = vld [vmem:[#allocation2 + $0xc0] ss:$8 sps:$4 sm:$0xff]  }
  0x1d   :  { %851 = vmatprep.subr.bf16.mxu1 %v4096_v17  ;;  %v4166_v47 = vld [vmem:[%s6521_s0 + $0x4] ss:$24 sps:$4 sm:$0xff]   ;;  %v4140_v49 = vld [vmem:[#allocation2 + $0x1c0] ss:$8 sps:$4 sm:$0xff]   ;;  %v4143_v52 = vld [vmem:[#allocation2 + $0xb0] ss:$8 sps:$4 sm:$0xff]  }
  0x1e   :  { %v4141_v48 = vld [vmem:[#allocation2 + $0xb4] ss:$8 sps:$4 sm:$0xff]   ;;  %802 = vmatprep.mubr.bf16.mxu0 %v4166_v47  ;;  %v4173_v51 = vld [vmem:[%s6521_s0 + $0xc] ss:$24 sps:$4 sm:$0xff]   ;;  %v4146_v54 = vld [vmem:[#allocation2 + $0x1b0] ss:$8 sps:$4 sm:$0xff]  }
  0x1f   :  { %779 = vmatpush1.bf16.msra.mxu0 %v4095_v18  ;;  %v4144_v50 = vld [vmem:[#allocation2 + $0x1b4] ss:$8 sps:$4 sm:$0xff]   ;;  %v4147_v53 = vld [vmem:[#allocation2 + $0xa4] ss:$8 sps:$4 sm:$0xff]   ;;  %875 = vmatprep.mubr.bf16.mxu1 %v4173_v51  ;;  %v4149_v56 = vld [vmem:[#allocation2 + $0xa0] ss:$8 sps:$4 sm:$0xff]  }
  0x20   :  { %780 = vmatprep.subr.bf16.mxu0 %v4099_v19  ;;  %852 = vmatpush1.bf16.msra.mxu1 %v4098_v20  ;;  %v4150_v55 = vld [vmem:[#allocation2 + $0x1a4] ss:$8 sps:$4 sm:$0xff]   ;;  %v4153_v57 = vld [vmem:[#allocation2 + $0x94] ss:$8 sps:$4 sm:$0xff]   ;;  %v4152_v58 = vld [vmem:[#allocation2 + $0x1a0] ss:$8 sps:$4 sm:$0xff]  }
  0x21   :  { %853 = vmatprep.subr.bf16.mxu1 %v4102_v21  ;;  %v4156_v59 = vld [vmem:[#allocation2 + $0x194] ss:$8 sps:$4 sm:$0xff]   ;;  %v4155_v60 = vld [vmem:[#allocation2 + $0x90] ss:$8 sps:$4 sm:$0xff]   ;;  %v4159_v61 = vld [vmem:[#allocation2 + $0x84] ss:$8 sps:$4 sm:$0xff]  }
  0x22   :  { %v4158_v62 = vld [vmem:[#allocation2 + $0x190] ss:$8 sps:$4 sm:$0xff]   ;;  %v4162_v63 = vld [vmem:[#allocation2 + $0x184] ss:$8 sps:$4 sm:$0xff]   ;;  %v4161_v0 = vld [vmem:[#allocation2 + $0x80] ss:$8 sps:$4 sm:$0xff]  }
  0x23   :  { %781 = vmatpush1.bf16.msra.mxu0 %v4101_v22  ;;  %v4170_v1 = vld [vmem:[#allocation2 + $0x274] ss:$8 sps:$4 sm:$0xff]   ;;  %v4167_v2 = vld [vmem:[#allocation2 + $0x180] ss:$8 sps:$4 sm:$0xff]   ;;  %v4168_v4 = vld [vmem:[#allocation2 + $0x270] ss:$8 sps:$4 sm:$0xff]  }
  0x24   :  { %782 = vmatprep.subr.bf16.mxu0 %v4105_v23  ;;  %854 = vmatpush1.bf16.msra.mxu1 %v4104_v24  ;;  %v4164_v3 = vld [vmem:[%s6521_s0] ss:$24 sps:$4 sm:$0xff]   ;;  %v4198_v6 = vld [vmem:[%s6521_s0 + $0x34] ss:$24 sps:$4 sm:$0xff]   ;;  %v4200_v14 = vld [vmem:[%s6521_s0 + $0x30] ss:$24 sps:$4 sm:$0xff]  }
  0x25   :  { %855 = vmatprep.subr.bf16.mxu1 %v4108_v25  ;;  %v4171_v5 = vld [vmem:[%s6521_s0 + $0x8] ss:$24 sps:$4 sm:$0xff]   ;;  %v4176_v7 = vld [vmem:[#allocation2 + $0x264] ss:$8 sps:$4 sm:$0xff]   ;;  %v4201_v8 = vld [vmem:[%s6521_s0 + $0x3c] ss:$24 sps:$4 sm:$0xff]  }
  0x26   :  { %v4174_v9 = vld [vmem:[#allocation2 + $0x260] ss:$8 sps:$4 sm:$0xff]   ;;  %v5138_v10 = vld [vmem:[%s6523_s2 + $0x34] ss:$8 sps:$4 sm:$0xff]   ;;  %v5143_v11 = vld [vmem:[%s6523_s2 + $0x30] ss:$8 sps:$4 sm:$0xff]  }
  0x27   :  { %783 = vmatpush1.bf16.msra.mxu0 %v4107_v26  ;;  %v4179_v12 = vld [vmem:[#allocation2 + $0x254] ss:$8 sps:$4 sm:$0xff]   ;;  %v4177_v13 = vld [vmem:[#allocation2 + $0x250] ss:$8 sps:$4 sm:$0xff]   ;;  %v4182_v15 = vld [vmem:[#allocation2 + $0x244] ss:$8 sps:$4 sm:$0xff]  }
  0x28   :  { %784 = vmatprep.subr.bf16.mxu0 %v4111_v27  ;;  %856 = vmatpush1.bf16.msra.mxu1 %v4110_v28  ;;  %v4210_v16 = vld [vmem:[%s6521_s0 + $0x64] ss:$24 sps:$4 sm:$0xff]   ;;  %v4203_v17 = vld [vmem:[%s6521_s0 + $0x38] ss:$24 sps:$4 sm:$0xff]   ;;  %v5167_v20 = vld [vmem:[%s6523_s2 + $0x20] ss:$8 sps:$4 sm:$0xff]  }
  0x29   :  { %857 = vmatprep.subr.bf16.mxu1 %v4114_v29  ;;  %v4213_v18 = vld [vmem:[%s6521_s0 + $0x6c] ss:$24 sps:$4 sm:$0xff]   ;;  %v4180_v21 = vld [vmem:[#allocation2 + $0x240] ss:$8 sps:$4 sm:$0xff]   ;;  %v4185_v22 = vld [vmem:[#allocation2 + $0x234] ss:$8 sps:$4 sm:$0xff]  }
  0x2a   :  { %v5162_v19 = vld [vmem:[%s6523_s2 + $0x24] ss:$8 sps:$4 sm:$0xff]   ;;  %v5172_v23 = vld [vmem:[%s6523_s2 + $0x14] ss:$8 sps:$4 sm:$0xff]   ;;  %v4183_v24 = vld [vmem:[#allocation2 + $0x230] ss:$8 sps:$4 sm:$0xff]  }
  0x2b   :  { %785 = vmatpush1.bf16.msra.mxu0 %v4113_v30  ;;  %v4188_v25 = vld [vmem:[#allocation2 + $0x224] ss:$8 sps:$4 sm:$0xff]   ;;  %v4212_v26 = vld [vmem:[%s6521_s0 + $0x60] ss:$24 sps:$4 sm:$0xff]   ;;  %v4228_v30 = vld [vmem:[%s6521_s0 + $0x9c] ss:$24 sps:$4 sm:$0xff]  }
  0x2c   :  { %786 = vmatprep.subr.bf16.mxu0 %v4117_v31  ;;  %858 = vmatpush1.bf16.msra.mxu1 %v4116_v32  ;;  %v5182_v27 = vld [vmem:[%s6523_s2 + $0x10] ss:$8 sps:$4 sm:$0xff]   ;;  %v4225_v28 = vld [vmem:[%s6521_s0 + $0x94] ss:$24 sps:$4 sm:$0xff]   ;;  %v4215_v29 = vld [vmem:[%s6521_s0 + $0x68] ss:$24 sps:$4 sm:$0xff]  }
  0x2d   :  { %859 = vmatprep.subr.bf16.mxu1 %v4120_v33  ;;  %v5197_v31 = vld [vmem:[%s6523_s2 + $0x4] ss:$8 sps:$4 sm:$0xff]   ;;  %v5203_v32 = vld [vmem:[%s6523_s2] ss:$8 sps:$4 sm:$0xff]   ;;  %v4207_v47 = vld [vmem:[#allocation2 + $0x2d0] ss:$8 sps:$4 sm:$0xff]  }
  0x2e   :  { %v4186_v33 = vld [vmem:[#allocation2 + $0x220] ss:$8 sps:$4 sm:$0xff]   ;;  %v4222_v51 = vld [vmem:[#allocation2 + $0x2b0] ss:$8 sps:$4 sm:$0xff]   ;;  %vm1331_vm0 = vcmask 1041409   ;;  %vm1334_vm1 = vcmask 1042434  }
  0x2f   :  { %787 = vmatpush2.bf16.msra.mxu0 %v4119_v34  ;;  %v4191_v34 = vld [vmem:[#allocation2 + $0x214] ss:$8 sps:$4 sm:$0xff]   ;;  %vm1337_vm2 = vcmask 1043459   ;;  %vm1340_vm3 = vcmask 1044484   ;;  %vm1343_vm4 = vcmask 1045509   ;;  %vm1346_vm5 = vcmask 1046534  }
  0x30   :  { %788 = vmatprep.subr.bf16.mxu0 %v4123_v35  ;;  %860 = vmatpush2.bf16.msra.mxu1 %v4122_v36  ;;  %v4227_v35 = vld [vmem:[%s6521_s0 + $0x90] ss:$24 sps:$4 sm:$0xff]   ;;  %vm1349_vm6 = vcmask 1047559   ;;  %vm1037_vm7 = vcmask 523264   ;;  %vm5078_vm8 = vmmov 0   ;;  %vm3761_vm9 = vcmask 15360  }
  0x31   :  { %861 = vmatprep.subr.bf16.mxu1 %v4126_v37  ;;  %v4189_v36 = vld [vmem:[#allocation2 + $0x210] ss:$8 sps:$4 sm:$0xff]   ;;  %v4250_v37 = vld [vmem:[%s6521_s0 + $0x14] ss:$24 sps:$4 sm:$0xff]  }
  0x33   :  { %789 = vmatpush2.bf16.msra.mxu0 %v4125_v38  ;;  %v4194_v38 = vld [vmem:[#allocation2 + $0x204] ss:$8 sps:$4 sm:$0xff]  }
  0x34   :  { %790 = vmatprep.subr.bf16.mxu0 %v4129_v39  ;;  %862 = vmatpush2.bf16.msra.mxu1 %v4128_v40  ;;  %v4230_v39 = vld [vmem:[%s6521_s0 + $0x98] ss:$24 sps:$4 sm:$0xff]   ;;  %v4192_v40 = vld [vmem:[#allocation2 + $0x200] ss:$8 sps:$4 sm:$0xff]  }
  0x35   :  { %863 = vmatprep.subr.bf16.mxu1 %v4132_v41  ;;  %v4197_v41 = vld [vmem:[#allocation2 + $0x2f4] ss:$8 sps:$4 sm:$0xff]  }
  0x37   :  { %791 = vmatpush2.bf16.msra.mxu0 %v4131_v42  ;;  %v5075_v42 = vmov 0  }
  0x38   :  { %792 = vmatprep.subr.bf16.mxu0 %v4135_v43  ;;  %864 = vmatpush2.bf16.msra.mxu1 %v4134_v44  ;;  %v4195_v43 = vld [vmem:[#allocation2 + $0x2f0] ss:$8 sps:$4 sm:$0xff]   ;;  %v4206_v44 = vld [vmem:[#allocation2 + $0x2e4] ss:$8 sps:$4 sm:$0xff]  }
  0x39   :  { %865 = vmatprep.subr.bf16.mxu1 %v4138_v45  ;;  %v4204_v45 = vld [vmem:[#allocation2 + $0x2e0] ss:$8 sps:$4 sm:$0xff]  }
  0x3b   :  { %793 = vmatpush2.bf16.msra.mxu0 %v4137_v46  ;;  %v4209_v46 = vld [vmem:[#allocation2 + $0x2d4] ss:$8 sps:$4 sm:$0xff]  }
  0x3c   :  { %794 = vmatprep.subr.bf16.mxu0 %v4141_v48  ;;  %866 = vmatpush2.bf16.msra.mxu1 %v4140_v49  ;;  %v4218_v48 = vld [vmem:[#allocation2 + $0x2c4] ss:$8 sps:$4 sm:$0xff]   ;;  %v4216_v49 = vld [vmem:[#allocation2 + $0x2c0] ss:$8 sps:$4 sm:$0xff]  }
  0x3d   :  { %867 = vmatprep.subr.bf16.mxu1 %v4144_v50  ;;  %v4224_v50 = vld [vmem:[#allocation2 + $0x2b4] ss:$8 sps:$4 sm:$0xff]  }
  0x3f   :  { %795 = vmatpush2.bf16.msra.mxu0 %v4143_v52  ;;  %v4233_v52 = vld [vmem:[#allocation2 + $0x2a4] ss:$8 sps:$4 sm:$0xff]  }
  0x40   :  { %796 = vmatprep.subr.bf16.mxu0 %v4147_v53  ;;  %868 = vmatpush2.bf16.msra.mxu1 %v4146_v54  ;;  %v4231_v53 = vld [vmem:[#allocation2 + $0x2a0] ss:$8 sps:$4 sm:$0xff]   ;;  %v4239_v54 = vld [vmem:[#allocation2 + $0x294] ss:$8 sps:$4 sm:$0xff]  }
  0x41   :  { %869 = vmatprep.subr.bf16.mxu1 %v4150_v55  ;;  %v4237_v55 = vld [vmem:[#allocation2 + $0x290] ss:$8 sps:$4 sm:$0xff]  }
  0x43   :  { %797 = vmatpush2.bf16.msra.mxu0 %v4149_v56  ;;  %v4245_v56 = vld [vmem:[#allocation2 + $0x284] ss:$8 sps:$4 sm:$0xff]  }
  0x44   :  { %798 = vmatprep.subr.bf16.mxu0 %v4153_v57  ;;  %870 = vmatpush2.bf16.msra.mxu1 %v4152_v58  ;;  %v4243_v57 = vld [vmem:[#allocation2 + $0x280] ss:$8 sps:$4 sm:$0xff]  }
  0x45   :  { %871 = vmatprep.subr.bf16.mxu1 %v4156_v59  ;;  %v4248_v58 = vld [vmem:[%s6521_s0 + $0x10] ss:$24 sps:$4 sm:$0xff]   ;;  %v4252_v59 = vld [vmem:[%s6521_s0 + $0x44] ss:$24 sps:$4 sm:$0xff]  }
  0x47   :  { %799 = vmatpush2.bf16.msra.mxu0 %v4155_v60  ;;  %v4254_v60 = vld [vmem:[%s6521_s0 + $0x40] ss:$24 sps:$4 sm:$0xff]  }
  0x48   :  { %800 = vmatprep.subr.bf16.mxu0 %v4159_v61  ;;  %872 = vmatpush2.bf16.msra.mxu1 %v4158_v62  ;;  %v4255_v61 = vld [vmem:[%s6521_s0 + $0x74] ss:$24 sps:$4 sm:$0xff]   ;;  %v4257_v62 = vld [vmem:[%s6521_s0 + $0x70] ss:$24 sps:$4 sm:$0xff]  }
  0x49   :  { %873 = vmatprep.subr.bf16.mxu1 %v4162_v63  ;;  %v4258_v63 = vld [vmem:[%s6521_s0 + $0xa4] ss:$24 sps:$4 sm:$0xff]  }
  0x4b   :  { %801 = vmatpush2.bf16.msra.mxu0 %v4161_v0  ;;  %v4260_v0 = vld [vmem:[%s6521_s0 + $0xa0] ss:$24 sps:$4 sm:$0xff]  }
  0x4c   :  { %916 = vmatprep.subr.bf16.mxu0 %v4170_v1  ;;  %874 = vmatpush2.bf16.msra.mxu1 %v4167_v2 }
  0x4d   :  { %1049 = vmatprep.subr.bf16.mxu1 %v5138_v10 }
  0x4e   :  { %803 = vmatmul.mubr.bf16.vlgmr.msra.gmra.mxu0 %v4164_v3 }
  0x4f   :  { %917 = vmatpush1.bf16.msra.mxu0 %v4168_v4  ;;  %812 = vmatprep.mubr.bf16.mxu0 %v4198_v6 }
  0x50   :  { %876 = vmatmul.mubr.bf16.vlgmr.msra.gmra.mxu1 %v4171_v5  ;;  %918 = vmatprep.subr.bf16.mxu0 %v4176_v7 }
  0x51   :  { %885 = vmatprep.mubr.bf16.mxu1 %v4201_v8  ;;  %1050 = vmatpush1.bf16.msra.mxu1 %v5143_v11 }
  0x52   :  { %1051 = vmatprep.subr.bf16.mxu1 %v5162_v19 }
  0x53   :  { %919 = vmatpush1.bf16.msra.mxu0 %v4174_v9 }
  0x54   :  { %920 = vmatprep.subr.bf16.mxu0 %v4179_v12 }
  0x55   :  { %1052 = vmatpush1.bf16.msra.mxu1 %v5167_v20 }
  0x56   :  { %813 = vmatmul.mubr.bf16.gmra.mxu0 %v4200_v14  ;;  %1053 = vmatprep.subr.bf16.mxu1 %v5172_v23 }
  0x57   :  { %921 = vmatpush1.bf16.msra.mxu0 %v4177_v13  ;;  %822 = vmatprep.mubr.bf16.mxu0 %v4210_v16 }
  0x58   :  { %922 = vmatprep.subr.bf16.mxu0 %v4182_v15  ;;  %886 = vmatmul.mubr.bf16.gmra.mxu1 %v4203_v17 }
  0x59   :  { %895 = vmatprep.mubr.bf16.mxu1 %v4213_v18  ;;  %1054 = vmatpush1.bf16.msra.mxu1 %v5182_v27 }
  0x5a   :  { %1055 = vmatprep.subr.bf16.mxu1 %v5197_v31 }
  0x5b   :  { %923 = vmatpush1.bf16.msra.mxu0 %v4180_v21 }
  0x5c   :  { %924 = vmatprep.subr.bf16.mxu0 %v4185_v22 }
  0x5d   :  { %1056 = vmatpush1.bf16.msra.mxu1 %v5203_v32 }
  0x5e   :  { %823 = vmatmul.mubr.bf16.gmra.mxu0 %v4212_v26  ;;  %1365 = vmatprep.subr.bf16.mxu1 %v5138_v10 }
  0x5f   :  { %925 = vmatpush1.bf16.msra.mxu0 %v4183_v24  ;;  %832 = vmatprep.mubr.bf16.mxu0 %v4225_v28 }
  0x60   :  { %926 = vmatprep.subr.bf16.mxu0 %v4188_v25  ;;  %896 = vmatmul.mubr.bf16.gmra.mxu1 %v4215_v29 }
  0x61   :  { %905 = vmatprep.mubr.bf16.mxu1 %v4228_v30 }
  0x63   :  { %927 = vmatpush1.bf16.msra.mxu0 %v4186_v33 }
  0x64   :  { %928 = vmatprep.subr.bf16.mxu0 %v4191_v34 }
  0x66   :  { %833 = vmatmul.mubr.bf16.gmra.mxu0 %v4227_v35 }
  0x67   :  { %929 = vmatpush1.bf16.msra.mxu0 %v4189_v36  ;;  %948 = vmatprep.mubr.bf16.mxu0 %v4250_v37 }
  0x68   :  { %930 = vmatprep.subr.bf16.mxu0 %v4194_v38  ;;  %906 = vmatmul.mubr.bf16.gmra.mxu1 %v4230_v39  ;;  %v160_v38 = vlaneseq }
  0x69   :  { %1073 = vmatprep.mubr.bf16.mxu1 %v5075_v42 }
  0x6b   :  { %931 = vmatpush1.bf16.msra.mxu0 %v4192_v40  ;;  %v161_v40 = vshrl.u32 %v160_v38, 7 }
  0x6c   :  { %932 = vmatprep.subr.bf16.mxu0 %v4197_v41 }
  0x6f   :  { %933 = vmatpush2.bf16.msra.mxu0 %v4195_v43  ;;  %v162_v43 = vsub.s32 0, %v161_v40 }
  0x70   :  { %934 = vmatprep.subr.bf16.mxu0 %v4206_v44  ;;  %1074 = vmatmul.mubr.bf16.vlgmr.msra.gmra.mxu1 %v5075_v42  ;;  %v158_v44 = vld [vmem:[%s6524_s3] sm:$0x3]  ;;  %s5076_s3 = smov 64  }
  0x71   :  { %1366 = vmatpush1.bf16.msra.mxu1 %v5143_v11  ;;  %1389 = vmatprep.mubr.bf16.mxu1 %v5075_v42 }
  0x72   :  { %1367 = vmatprep.subr.bf16.mxu1 %v5162_v19 }
  0x73   :  { %935 = vmatpush2.bf16.msra.mxu0 %v4204_v45 }
  0x74   :  { %936 = vmatprep.subr.bf16.mxu0 %v4209_v46  ;;  %v5300_v46 = vrot.slane %v158_v44, %v162_v43 }
  0x75   :  { %1368 = vmatpush1.bf16.msra.mxu1 %v5167_v20 }
  0x76   :  { %1369 = vmatprep.subr.bf16.mxu1 %v5172_v23 }
  0x77   :  { %937 = vmatpush2.bf16.msra.mxu0 %v4207_v47 }
  0x78   :  { %938 = vmatprep.subr.bf16.mxu0 %v4218_v48 }
  0x79   :  { %1370 = vmatpush1.bf16.msra.mxu1 %v5182_v27 }
  0x7a   :  { %1371 = vmatprep.subr.bf16.mxu1 %v5197_v31 }
  0x7b   :  { %939 = vmatpush2.bf16.msra.mxu0 %v4216_v49 }
  0x7c   :  { %940 = vmatprep.subr.bf16.mxu0 %v4224_v50 }
  0x7d   :  { %1372 = vmatpush1.bf16.msra.mxu1 %v5203_v32 }
  0x7e   :  { %1698 = vmatprep.subr.bf16.mxu1 %v5138_v10 }
  0x7f   :  { %941 = vmatpush2.bf16.msra.mxu0 %v4222_v51 }
  0x80   :  { %942 = vmatprep.subr.bf16.mxu0 %v4233_v52  ;;  %v166_v52 = vsub.s32 1, %v161_v40 }
  0x83   :  { %943 = vmatpush2.bf16.msra.mxu0 %v4231_v53 }
  0x84   :  { %944 = vmatprep.subr.bf16.mxu0 %v4239_v54 }
  0x87   :  { %945 = vmatpush2.bf16.msra.mxu0 %v4237_v55 }
  0x88   :  { %946 = vmatprep.subr.bf16.mxu0 %v4245_v56 }
  0x8b   :  { %947 = vmatpush2.bf16.msra.mxu0 %v4243_v57 }
  0x8c   :  { %2364 = vmatprep.subr.bf16.mxu0 %v5138_v10 }
  0x8e   :  { %949 = vmatmul.mubr.bf16.vlgmr.msra.gmra.mxu0 %v4248_v58 }
  0x8f   :  { %958 = vmatprep.mubr.bf16.mxu0 %v4252_v59  ;;  %2365 = vmatpush1.bf16.msra.mxu0 %v5143_v11 }
  0x90   :  { %2366 = vmatprep.subr.bf16.mxu0 %v5162_v19 }
  0x93   :  { %2367 = vmatpush1.bf16.msra.mxu0 %v5167_v20 }
  0x94   :  { %2368 = vmatprep.subr.bf16.mxu0 %v5172_v23 }
  0x96   :  { %959 = vmatmul.mubr.bf16.gmra.mxu0 %v4254_v60  ;;  %v5314_v60 = vrot.slane %v158_v44, %v166_v52 }
  0x97   :  { %968 = vmatprep.mubr.bf16.mxu0 %v4255_v61  ;;  %2369 = vmatpush1.bf16.msra.mxu0 %v5182_v27 }
  0x98   :  { %2370 = vmatprep.subr.bf16.mxu0 %v5197_v31 }
  0x9b   :  { %2371 = vmatpush1.bf16.msra.mxu0 %v5203_v32 }
  0x9c   :  { %3030 = vmatprep.subr.bf16.mxu0 %v5138_v10 }
  0x9e   :  { %969 = vmatmul.mubr.bf16.gmra.mxu0 %v4257_v62 }
  0x9f   :  { %978 = vmatprep.mubr.bf16.mxu0 %v4258_v63 }
  0xa6   :  { %979 = vmatmul.mubr.bf16.gmra.mxu0 %v4260_v0 }
  0xa7   :  { %2388 = vmatprep.mubr.bf16.mxu0 %v5075_v42 }
 0x10e   :  { %v804_v2 = vpop.f32.mrf.mxu0 }
 0x10f   :  { %v805_v48 = vadd.f32 %v804_v2, %v5300_v46 }
 0x110   :  { %v877_v1 = vpop.f32.mrf.mxu1  ;;  %v806_v5 = vpop.f32.mrf.mxu0 }
 0x111   :  { %v878_v50 = vadd.f32 %v877_v1, %v805_v48 }
 0x112   :  { %v5259_v3 = vpop.f32.mrf.mxu1  ;;  %v808_v8 = vpop.f32.mrf.mxu0 }
 0x113   :  { %v809_v51 = vadd.f32 %v808_v8, %v5300_v46 }
 0x114   :  { %v881_v4 = vpop.f32.mrf.mxu1  ;;  %v5265_v11 = vpop.f32.mrf.mxu0 }
 0x115   :  { %v882_v57 = vadd.f32 %v881_v4, %v809_v51 }
 0x116   :  { %v5261_v6 = vpop.f32.mrf.mxu1  ;;  %v814_v13 = vpop.f32.mrf.mxu0 }
 0x117   :  { %v815_v55 = vadd.f32 %v814_v13, %v5300_v46  ;;  %v807_v13 = vadd.f32 %v806_v5, %v5314_v60 }
 0x118   :  { %v887_v7 = vpop.f32.mrf.mxu1  ;;  %v816_v16 = vpop.f32.mrf.mxu0 }
 0x119   :  { %v888_v0 = vadd.f32 %v887_v7, %v815_v55  ;;  %v880_v48 = vadd.f32 %v5259_v3, %v807_v13 }
 0x11a   :  { %v5263_v9 = vpop.f32.mrf.mxu1  ;;  %v818_v21 = vpop.f32.mrf.mxu0 }
 0x11b   :  { %v819_v2 = vadd.f32 %v818_v21, %v5300_v46 }
 0x11c   :  { %v891_v10 = vpop.f32.mrf.mxu1  ;;  %v5281_v25 = vpop.f32.mrf.mxu0 }
 0x11d   :  { %v892_v44 = vadd.f32 %v891_v10, %v819_v2 }
 0x11e   :  { %v5267_v12 = vpop.f32.mrf.mxu1  ;;  %v824_v29 = vpop.f32.mrf.mxu0 }
 0x11f   :  { %v825_v40 = vadd.f32 %v824_v29, %v5300_v46 }
 0x120   :  { %v5269_v14 = vpop.f32.mrf.mxu1  ;;  %v5291_v34 = vpop.f32.mrf.mxu0 }
 0x121   :  { %v898_v29 = vadd.f32 %v5269_v14, %v825_v40 }
 0x122   :  { %v5271_v15 = vpop.f32.mrf.mxu1  ;;  %v828_v37 = vpop.f32.mrf.mxu0 }
 0x124   :  { %v5273_v17 = vpop.f32.mrf.mxu1  ;;  %v5293_v39 = vpop.f32.mrf.mxu0 }
 0x126   :  { %v5275_v18 = vpop.f32.mrf.mxu1  ;;  %v834_v41 = vpop.f32.mrf.mxu0 }
 0x128   :  { %v5277_v22 = vpop.f32.mrf.mxu1  ;;  %v5298_v45 = vpop.f32.mrf.mxu0 }
 0x12a   :  { %v5279_v24 = vpop.f32.mrf.mxu1  ;;  %v5302_v47 = vpop.f32.mrf.mxu0 }
 0x12c   :  { %v5283_v26 = vpop.f32.mrf.mxu1  ;;  %v5305_v49 = vpop.f32.mrf.mxu0 }
 0x12e   :  { %v5285_v28 = vpop.f32.mrf.mxu1 }
 0x130   :  { %v5287_v30 = vpop.f32.mrf.mxu1 }
 0x131   :  { %v1084_v58 = vrot.slane %v5287_v30, 1  ;;  %v1086_v8 = vrot.slane %v5287_v30, 2  ;;  %v1088_v7 = vrot.slane %v5287_v30, 3 }
 0x132   :  { %v5289_v33 = vpop.f32.mrf.mxu1 }
 0x133   :  { %v1087_v13 = vrot.slane %v5289_v33, 2 }
 0x134   :  { %v1079_v35 = vpop.f32.mrf.mxu1 }
 0x136   :  { %v1080_v36 = vpop.f32.mrf.mxu1 }
 0x14e   :  { %v950_v53 = vpop.f32.mrf.mxu0 }
 0x14f   :  { %v5308_v54 = vadd.f32 %v950_v53, %v878_v50  ;;  %v811_v50 = vadd.f32 %v5265_v11, %v5314_v60  ;;  %v817_v53 = vadd.f32 %v816_v16, %v5314_v60 }
 0x150   :  { %v952_v56 = vpop.f32.mrf.mxu0 }
 0x151   :  { %v1114_v59 = vadd.f32 %v5287_v30, %v5308_v54  ;;  %v5334_v55 = vadd.f32 %v952_v56, %v880_v48  ;;  %v884_v11 = vadd.f32 %v5261_v6, %v811_v50  ;;  %v890_v16 = vadd.f32 %v5263_v9, %v817_v53 }
 0x152   :  { %v954_v61 = vpop.f32.mrf.mxu0  ;;  %v821_v9 = vadd.f32 %v5281_v25, %v5314_v60  ;;  %v839_v25 = vadd.f32 %v5302_v47, %v5300_v46  ;;  %v827_v50 = vadd.f32 %v5291_v34, %v5314_v60  ;;  %v1094_v53 = vrot.slane %v5287_v30, 6 }
 0x153   :  { %v5316_v62 = vadd.f32 %v954_v61, %v882_v57  ;;  %v3896_v63 = vmul.f32 -1.442695, %v1114_v59  ;;  %v829_v57 = vadd.f32 %v828_v37, %v5300_v46  ;;  %v5347_v56 = vadd.f32 %v5289_v33, %v5334_v55 }
 0x154   :  { %v956_v1 = vpop.f32.mrf.mxu0  ;;  %v1085_v37 = vrot.slane %v5289_v33, 1  ;;  %v894_v48 = vadd.f32 %v5267_v12, %v821_v9 }
 0x155   :  { %4261 = vpow2.f32 %v3896_v63  ;;  %v1116_v4 = vadd.f32 %v1084_v58, %v5316_v62  ;;  %v1090_v58 = vrot.slane %v5287_v30, 4  ;;  %v902_v2 = vadd.f32 %v5273_v17, %v829_v57 }
 0x156   :  { %v960_v35 = vpop.f32.mrf.mxu0 }
 0x157   :  { %v5322_v36 = vadd.f32 %v960_v35, %v888_v0  ;;  %v3897_v38 = vmul.f32 -1.442695, %v1116_v4  ;;  %v5343_v0 = vadd.f32 %v956_v1, %v884_v11 }
 0x158   :  { %v962_v43 = vpop.f32.mrf.mxu0 }
 0x159   :  { %4263 = vpow2.f32 %v3897_v38  ;;  %v1118_v21 = vadd.f32 %v1086_v8, %v5322_v36  ;;  %v835_v8 = vadd.f32 %v834_v41, %v5300_v46  ;;  %v5356_v35 = vadd.f32 %v962_v43, %v890_v16 }
 0x15a   :  { %v964_v51 = vpop.f32.mrf.mxu0  ;;  %v5363_v41 = vadd.f32 %v1085_v37, %v5343_v0  ;;  %v1089_v46 = vrot.slane %v5289_v33, 3 }
 0x15b   :  { %v5330_v5 = vadd.f32 %v964_v51, %v892_v44  ;;  %v3898_v52 = vmul.f32 -1.442695, %v1118_v21  ;;  %v1092_v44 = vrot.slane %v5287_v30, 5  ;;  %v908_v21 = vadd.f32 %v5277_v22, %v835_v8 }
 0x15c   :  { %v966_v10 = vpop.f32.mrf.mxu0  ;;  %v5376_v22 = vadd.f32 %v1087_v13, %v5356_v35 }
 0x15d   :  { %4265 = vpow2.f32 %v3898_v52  ;;  %v1120_v3 = vadd.f32 %v1088_v7, %v5330_v5  ;;  %v5379_v47 = vadd.f32 %v966_v10, %v894_v48 }
 0x15e   :  { %v970_v59 = vpop.f32.mrf.mxu0 }
 0x15f   :  { %v5340_v61 = vadd.f32 %v970_v59, %v898_v29  ;;  %v3899_v63 = vmul.f32 -1.442695, %v1120_v3  ;;  %v5389_v10 = vadd.f32 %v1089_v46, %v5379_v47 }
 0x160   :  { %v972_v14 = vpop.f32.mrf.mxu0 }
 0x161   :  { %4267 = vpow2.f32 %v3899_v63  ;;  %v1122_v6 = vadd.f32 %v1090_v58, %v5340_v61  ;;  %v912_v58 = vadd.f32 %v5283_v26, %v839_v25  ;;  %v900_v63 = vadd.f32 %v5271_v15, %v827_v50 }
 0x162   :  { %v4262_v4 = vpop.eup %4261  ;;  %v974_v1 = vpop.f32.mrf.mxu0  ;;  %4269 = vtanh.f32 %v5347_v56  ;;  %v1096_v26 = vrot.slane %v5287_v30, 7  ;;  %v1091_v15 = vrot.slane %v5289_v33, 4 }
 0x163   :  { %v5358_v38 = vadd.f32 %v974_v1, %v902_v2  ;;  %v1154_v40 = vadd.f32 1.0, %v4262_v4  ;;  %v3900_v7 = vmul.f32 -1.442695, %v1122_v6  ;;  %v831_v2 = vadd.f32 %v5293_v39, %v5314_v60 }
 0x164   :  { %v976_v17 = vpop.f32.mrf.mxu0  ;;  %v5394_v8 = vadd.f32 %v972_v14, %v900_v63 }
 0x165   :  { %4271 = vrcp.f32 %v1154_v40  ;;  %v1124_v52 = vadd.f32 %v1092_v44, %v5358_v38  ;;  %v904_v40 = vadd.f32 %v5275_v18, %v831_v2  ;;  %v837_v44 = vadd.f32 %v5298_v45, %v5314_v60 }
 0x166   :  { %v4264_v43 = vpop.eup %4263  ;;  %v980_v51 = vpop.f32.mrf.mxu0  ;;  %4273 = vpow2.f32 %v3900_v7  ;;  %v5401_v39 = vadd.f32 %v1091_v15, %v5394_v8  ;;  %v1093_v18 = vrot.slane %v5289_v33, 5 }
 0x167   :  { %v5373_v29 = vadd.f32 %v980_v51, %v908_v21  ;;  %v1155_v57 = vadd.f32 1.0, %v4264_v43  ;;  %4275 = vtanh.f32 %v5363_v41  ;;  %v3901_v34 = vmul.f32 -1.442695, %v1124_v52 }
 0x168   :  { %v982_v12 = vpop.f32.mrf.mxu0  ;;  %v5407_v7 = vadd.f32 %v976_v17, %v904_v40  ;;  %v910_v51 = vadd.f32 %v5279_v24, %v837_v44 }
 0x169   :  { %4277 = vrcp.f32 %v1155_v57  ;;  %v1126_v59 = vadd.f32 %v1094_v53, %v5373_v29  ;;  %v841_v53 = vadd.f32 %v5305_v49, %v5314_v60 }
 0x16a   :  { %v4266_v3 = vpop.eup %4265  ;;  %v984_v11 = vpop.f32.mrf.mxu0  ;;  %4279 = vtanh.f32 %v5376_v22  ;;  %v1125_v17 = vadd.f32 %v1093_v18, %v5407_v7  ;;  %v5420_v46 = vadd.f32 %v982_v12, %v910_v51  ;;  %v3904_v51 = vmul.f32 -1.442695, %v5347_v56 }
 0x16b   :  { %v5385_v16 = vadd.f32 %v984_v11, %v912_v58  ;;  %v1156_v37 = vadd.f32 1.0, %v4266_v3  ;;  %4281 = vpow2.f32 %v3901_v34  ;;  %v3902_v4 = vmul.f32 -1.442695, %v1126_v59 }
 0x16c   :  { %v1095_v3 = vrot.slane %v5289_v33, 6  ;;  %v986_v24 = vpop.f32.mrf.mxu0  ;;  %v914_v59 = vadd.f32 %v5285_v28, %v841_v53  ;;  %v3907_v53 = vmul.f32 -1.442695, %v5389_v10  ;;  %v3909_v56 = vmul.f32 -1.442695, %v1125_v17 }
 0x16d   :  { %4283 = vrcp.f32 %v1156_v37  ;;  %v1128_v1 = vadd.f32 %v1096_v26, %v5385_v16  ;;  %v1097_v26 = vrot.slane %v5289_v33, 7 }
 0x16e   :  { %v4268_v6 = vpop.eup %4267  ;;  %4285 = vtanh.f32 %v5389_v10  ;;  %v1127_v49 = vadd.f32 %v1095_v3, %v5420_v46  ;;  %v5432_v12 = vadd.f32 %v986_v24, %v914_v59 }
 0x16f   :  { %v1157_v9 = vadd.f32 1.0, %v4268_v6  ;;  %v4270_v13 = vpop.eup %4269  ;;  %v3903_v25 = vmul.f32 -1.442695, %v1128_v1 }
 0x171   :  { %4287 = vrcp.f32 %v1157_v9 }
 0x172   :  { %v5403_v30 = vpop.eup %4271  ;;  %4289 = vpow2.f32 %v3902_v4  ;;  %v1129_v4 = vadd.f32 %v1097_v26, %v5432_v12  ;;  %v3910_v26 = vmul.f32 -1.442695, %v1127_v49 }
 0x173   :  { %v4274_v14 = vpop.eup %4273  ;;  %v1242_v21 = vmul.f32 %v5403_v30, %v4270_v13  ;;  %4291 = vtanh.f32 %v5401_v39 }
 0x174   :  { %v1158_v43 = vadd.f32 1.0, %v4274_v14  ;;  %v4276_v48 = vpop.eup %4275 }
 0x175   :  { %1258 = vrot.lane.b32.xlu1 %v1242_v21, %s5076_s3 }
 0x176   :  { %v5413_v50 = vpop.eup %4277  ;;  %4293 = vrcp.f32 %v1158_v43 }
 0x177   :  { %v1243_v45 = vmul.f32 %v5413_v50, %v4276_v48  ;;  %4295 = vpow2.f32 %v3903_v25  ;;  %v4280_v52 = vpop.eup %4279  ;;  %v1235_v10 = vmul.f32 0.0, %v5413_v50 }
 0x178   :  { %v4282_v57 = vpop.eup %4281  ;;  %4297 = vtanh.f32 %v1125_v17 }
 0x179   :  { %1260 = vrot.lane.b32.xlu0 %v1243_v45, %s5076_s3  ;;  %v1159_v58 = vadd.f32 1.0, %v4282_v57  ;;  %v3905_v45 = vmul.f32 -1.442695, %v5363_v41 }
 0x17a   :  { %v5423_v34 = vpop.eup %4283 }
 0x17b   :  { %v1244_v11 = vmul.f32 %v5423_v34, %v4280_v52  ;;  %4299 = vrcp.f32 %v1159_v58  ;;  %v4286_v63 = vpop.eup %4285  ;;  %v3906_v52 = vmul.f32 -1.442695, %v5376_v22  ;;  %v3908_v58 = vmul.f32 -1.442695, %v5401_v39 }
 0x17c   :  { %4301 = vtanh.f32 %v1127_v49 }
 0x17d   :  { %1262 = vrot.lane.b32.xlu0 %v1244_v11, %s5076_s3  ;;  %v1234_v11 = vmul.f32 0.0, %v5403_v30  ;;  %v1236_v30 = vmul.f32 0.0, %v5423_v34 }
 0x17e   :  { %v5430_v60 = vpop.eup %4287 }
 0x17f   :  { %v4290_v37 = vpop.eup %4289  ;;  %v1245_v2 = vmul.f32 %v5430_v60, %v4286_v63  ;;  %v1237_v50 = vmul.f32 0.0, %v5430_v60 }
 0x180   :  { %v1160_v6 = vadd.f32 1.0, %v4290_v37  ;;  %v4292_v28 = vpop.eup %4291 }
 0x181   :  { %1264 = vrot.lane.b32.xlu1 %v1245_v2, %s5076_s3 }
 0x182   :  { %4303 = vrcp.f32 %v1160_v6 }
 0x183   :  { %v5438_v15 = vpop.eup %4293  ;;  %4305 = vtanh.f32 %v1129_v4 }
 0x184   :  { %v4296_v9 = vpop.eup %4295  ;;  %v1246_v1 = vmul.f32 %v5438_v15, %v4292_v28 }
 0x185   :  { %v1161_v13 = vadd.f32 1.0, %v4296_v9  ;;  %v4298_v40 = vpop.eup %4297 }
 0x186   :  { %1266 = vrot.lane.b32.xlu0 %v1246_v1, %s5076_s3 }
 0x187   :  { %4307 = vrcp.f32 %v1161_v13  ;;  %v3911_v13 = vmul.f32 -1.442695, %v1129_v4 }
 0x188   :  { %v5442_v33 = vpop.eup %4299  ;;  %4309 = vpow2.f32 %v3904_v51 }
 0x189   :  { %v1247_v14 = vmul.f32 %v5442_v33, %v4298_v40  ;;  %v4302_v44 = vpop.eup %4301  ;;  %4311 = vpow2.f32 %v3905_v45 }
 0x18a   :  { %4313 = vpow2.f32 %v3906_v52 }
 0x18b   :  { %1268 = vrot.lane.b32.xlu1 %v1247_v14, %s5076_s3  ;;  %4315 = vpow2.f32 %v3907_v53 }
 0x18c   :  { %4317 = vpow2.f32 %v3908_v58  ;;  %v1239_v58 = vmul.f32 0.0, %v5442_v33 }
 0x18f   :  { %v5446_v21 = vpop.eup %4303 }
 0x190   :  { %v1248_v25 = vmul.f32 %v5446_v21, %v4302_v44  ;;  %v4306_v43 = vpop.eup %4305  ;;  %v1240_v33 = vmul.f32 0.0, %v5446_v21 }
 0x192   :  { %1270 = vrot.lane.b32.xlu0 %v1248_v25, %s5076_s3  ;;  %v1238_v25 = vmul.f32 0.0, %v5438_v15 }
 0x194   :  { %v5450_v48 = vpop.eup %4307 }
 0x195   :  { %v1249_v18 = vmul.f32 %v5450_v48, %v4306_v43  ;;  %v4310_v57 = vpop.eup %4309  ;;  %v1241_v21 = vmul.f32 0.0, %v5450_v48 }
 0x196   :  { %v1210_v3 = vadd.f32 1.0, %v4310_v57  ;;  %v4312_v24 = vpop.eup %4311 }
 0x197   :  { %1272 = vrot.lane.b32.xlu1 %v1249_v18, %s5076_s3  ;;  %v4314_v41 = vpop.eup %4313  ;;  %v1211_v22 = vadd.f32 1.0, %v4312_v24 }
 0x198   :  { %4319 = vrcp.f32 %v1210_v3  ;;  %v1212_v2 = vadd.f32 1.0, %v4314_v41  ;;  %v4316_v6 = vpop.eup %4315 }
 0x199   :  { %v1213_v9 = vadd.f32 1.0, %v4316_v6  ;;  %v4318_v1 = vpop.eup %4317 }
 0x19a   :  { %v1214_v44 = vadd.f32 1.0, %v4318_v1 }
 0x1a5   :  { %v4320_v49 = vpop.eup %4319 }
 0x1e7   :  { %v1259_v59 = vpop.permute.xlu1 %1258 }
 0x1e8   :  { %v5460_v63 = vadd.f32 %v1259_v59, %v1234_v11 }
 0x1ea   :  { %4321 = vtanh.f32 %v5460_v63 }
 0x1eb   :  { %v1261_v37 = vpop.permute.xlu0 %1260  ;;  %4323 = vpow2.f32 %v3909_v56 }
 0x1ec   :  { %v5464_v39 = vadd.f32 %v1261_v37, %v1235_v10  ;;  %4325 = vrcp.f32 %v1211_v22 }
 0x1ee   :  { %4327 = vtanh.f32 %v5464_v39 }
 0x1ef   :  { %v1263_v17 = vpop.permute.xlu0 %1262  ;;  %4329 = vrcp.f32 %v1212_v2 }
 0x1f0   :  { %v5468_v28 = vadd.f32 %v1263_v17, %v1236_v30  ;;  %4331 = vpow2.f32 %v3910_v26 }
 0x1f2   :  { %4333 = vtanh.f32 %v5468_v28 }
 0x1f3   :  { %v1265_v40 = vpop.permute.xlu1 %1264  ;;  %4335 = vrcp.f32 %v1213_v9 }
 0x1f4   :  { %v5472_v14 = vadd.f32 %v1265_v40, %v1237_v50 }
 0x1f6   :  { %4337 = vtanh.f32 %v5472_v14 }
 0x1f7   :  { %v4322_v34 = vpop.eup %4321  ;;  %4339 = vpow2.f32 %v3911_v13 }
 0x1f8   :  { %v1298_v43 = vmul.f32 %v4322_v34, %v4320_v49  ;;  %v1267_v18 = vpop.permute.xlu0 %1266  ;;  %v4324_v51 = vpop.eup %4323  ;;  %4341 = vrcp.f32 %v1214_v44 }
 0x1f9   :  { %v5476_v45 = vadd.f32 %v1267_v18, %v1238_v25  ;;  %v4326_v60 = vpop.eup %4325  ;;  %v1215_v52 = vadd.f32 1.0, %v4324_v51 }
 0x1fa   :  { %v1306_v24 = vpack.c.bf16 %v1298_v43, %v1298_v43 }
 0x1fb   :  { %v4328_v4 = vpop.eup %4327  ;;  %4343 = vtanh.f32 %v5476_v45 }
 0x1fc   :  { %v1299_v53 = vmul.f32 %v4328_v4, %v4326_v60  ;;  %v4330_v57 = vpop.eup %4329  ;;  %4345 = vrcp.f32 %v1215_v52  ;;  %v1322_v2 = vunpack.c.l.b16 %v1306_v24 }
 0x1fd   :  { %v4332_v3 = vpop.eup %4331  ;;  %v1269_v59 = vpop.permute.xlu1 %1268 }
 0x1fe   :  { %v1307_v11 = vpack.c.bf16 %v1299_v53, %v1299_v53  ;;  %v5480_v56 = vadd.f32 %v1269_v59, %v1239_v58  ;;  %v1216_v37 = vadd.f32 1.0, %v4332_v3 }
 0x1ff   :  { %v4334_v15 = vpop.eup %4333 }
 0x200   :  { %v1323_v41 = vunpack.c.l.b16 %v1307_v11  ;;  %v1300_v22 = vmul.f32 %v4334_v15, %v4330_v57  ;;  %4347 = vtanh.f32 %v5480_v56  ;;  %v4336_v10 = vpop.eup %4335 }
 0x201   :  { %4349 = vrcp.f32 %v1216_v37 }
 0x202   :  { %v1330_v26 = vrot.slane %v1323_v41, 7  ;;  %v1308_v6 = vpack.c.bf16 %v1300_v22, %v1300_v22 }
 0x203   :  { %v4338_v30 = vpop.eup %4337 }
 0x204   :  { %v4340_v17 = vpop.eup %4339  ;;  %v1324_v9 = vunpack.c.l.b16 %v1308_v6  ;;  %v1301_v50 = vmul.f32 %v4338_v30, %v4336_v10  ;;  %v1271_v1 = vpop.permute.xlu0 %1270  ;;  %v1332_v13 = vsel %vm1331_vm0, %v1330_v26, %v1322_v2 }
 0x205   :  { %v5485_v40 = vadd.f32 %v1271_v1, %v1240_v33  ;;  %v4342_v34 = vpop.eup %4341  ;;  %v1217_v25 = vadd.f32 1.0, %v4340_v17 }
 0x206   :  { %v1333_v49 = vrot.slane %v1324_v9, 6  ;;  %v1309_v44 = vpack.c.bf16 %v1301_v50, %v1301_v50 }
 0x207   :  { %4351 = vtanh.f32 %v5485_v40 }
 0x208   :  { %v4344_v43 = vpop.eup %4343  ;;  %v1325_v18 = vunpack.c.l.b16 %v1309_v44  ;;  %v1335_v51 = vsel %vm1334_vm1, %v1333_v49, %v1332_v13  ;;  %4353 = vrcp.f32 %v1217_v25 }
 0x209   :  { %v1302_v60 = vmul.f32 %v4344_v43, %v4342_v34  ;;  %v1273_v4 = vpop.permute.xlu1 %1272  ;;  %v4346_v3 = vpop.eup %4345 }
 0x20a   :  { %v5490_v52 = vadd.f32 %v1273_v4, %v1241_v21  ;;  %v1336_v53 = vrot.slane %v1325_v18, 5  ;;  %v5503_v21 = vld [vmem:[%s6523_s2 + $0x30] ss:$8 sps:$4 sm:$0xff]  }
 0x20b   :  { %v1310_v57 = vpack.c.bf16 %v1302_v60, %v1302_v60 }
 0x20c   :  { %4355 = vtanh.f32 %v5490_v52  ;;  %v1338_v58 = vsel %vm1337_vm2, %v1336_v53, %v1335_v51  ;;  %v5516_v51 = vld [vmem:[%s6523_s2 + $0x34] ss:$8 sps:$4 sm:$0xff]  }
 0x20d   :  { %v1326_v24 = vunpack.c.l.b16 %v1310_v57  ;;  %v4348_v11 = vpop.eup %4347 }
 0x20e   :  { %v1303_v59 = vmul.f32 %v4348_v11, %v4346_v3  ;;  %v4350_v22 = vpop.eup %4349 }
 0x20f   :  { %v1339_v48 = vrot.slane %v1326_v24, 4 }
 0x210   :  { %v1311_v15 = vpack.c.bf16 %v1303_v59, %v1303_v59 }
 0x211   :  { %v1341_v41 = vsel %vm1340_vm3, %v1339_v48, %v1338_v58 }
 0x212   :  { %v1327_v10 = vunpack.c.l.b16 %v1311_v15 }
 0x214   :  { %v4352_v37 = vpop.eup %4351  ;;  %v1342_v26 = vrot.slane %v1327_v10, 3 }
 0x215   :  { %v1304_v2 = vmul.f32 %v4352_v37, %v4350_v22  ;;  %v4354_v33 = vpop.eup %4353 }
 0x216   :  { %v1344_v30 = vsel %vm1343_vm4, %v1342_v26, %v1341_v41 }
 0x217   :  { %v1312_v6 = vpack.c.bf16 %v1304_v2, %v1304_v2 }
 0x219   :  { %v4356_v17 = vpop.eup %4355  ;;  %v1328_v9 = vunpack.c.l.b16 %v1312_v6 }
 0x21a   :  { %v1305_v50 = vmul.f32 %v4356_v17, %v4354_v33 }
 0x21b   :  { %v1345_v1 = vrot.slane %v1328_v9, 2 }
 0x21c   :  { %v1313_v13 = vpack.c.bf16 %v1305_v50, %v1305_v50 }
 0x21d   :  { %v1347_v49 = vsel %vm1346_vm5, %v1345_v1, %v1344_v30 }
 0x21e   :  { %v1329_v44 = vunpack.c.l.b16 %v1313_v13 }
 0x220   :  { %v1348_v34 = vrot.slane %v1329_v44, 1 }
 0x222   :  { %v1350_v25 = vsel %vm1349_vm6, %v1348_v34, %v1347_v49 }
 0x223   :  { %v1351_v43 = vpack.c.b16 %v1350_v25, %v1350_v25 }
 0x225   :  { %1352 = vrot.lane.b32.xlu0 %v1351_v43, %s5076_s3 }
 0x297   :  { %v1353_v18 = vpop.permute.xlu0 %1352 }
 0x298   :  { %3912 = vmatmul.mubr.msk.bf16.vlgmr.msra.gmra.mxu1 %vm1037_vm7, %v1353_v18 }
 0x299   :  { %1699 = vmatpush1.bf16.msra.mxu1 %v5503_v21  ;;  %1722 = vmatprep.mubr.bf16.mxu1 %v5075_v42 }
 0x29a   :  { %1700 = vmatprep.subr.bf16.mxu1 %v5162_v19 }
 0x29d   :  { %1701 = vmatpush1.bf16.msra.mxu1 %v5167_v20 }
 0x29e   :  { %1702 = vmatprep.subr.bf16.mxu1 %v5172_v23 }
 0x2a1   :  { %1703 = vmatpush1.bf16.msra.mxu1 %v5182_v27 }
 0x2a2   :  { %1704 = vmatprep.subr.bf16.mxu1 %v5197_v31 }
 0x2a5   :  { %1705 = vmatpush1.bf16.msra.mxu1 %v5203_v32 }
 0x2a6   :  { %2031 = vmatprep.subr.bf16.mxu1 %v5516_v51 }
 0x358   :  { %v1391_v60 = vpop.f32.mrf.mxu1 }
 0x359   :  { %v1402_v4 = vrot.slane %v1391_v60, 1  ;;  %v1400_v19 = vrot.slane %v1391_v60, 7  ;;  %v1432_v20 = vadd.f32 %v1391_v60, %v5316_v62  ;;  %v1404_v57 = vrot.slane %v1391_v60, 2 }
 0x35a   :  { %v5520_v53 = vpop.f32.mrf.mxu1  ;;  %v1406_v24 = vrot.slane %v1391_v60, 3  ;;  %v1408_v48 = vrot.slane %v1391_v60, 4  ;;  %v1410_v6 = vrot.slane %v1391_v60, 5  ;;  %v1412_v34 = vrot.slane %v1391_v60, 6 }
 0x35b   :  { %v1434_v23 = vadd.f32 %v1402_v4, %v5322_v36  ;;  %v3914_v27 = vmul.f32 -1.442695, %v1432_v20  ;;  %v1430_v32 = vadd.f32 %v1400_v19, %v5308_v54  ;;  %v1436_v11 = vadd.f32 %v1404_v57, %v5330_v5 }
 0x35c   :  { %v1395_v31 = vpop.f32.mrf.mxu1  ;;  %v1438_v15 = vadd.f32 %v1406_v24, %v5340_v61  ;;  %v1440_v22 = vadd.f32 %v1408_v48, %v5358_v38  ;;  %v1403_v37 = vrot.slane %v5520_v53, 1  ;;  %v5530_v2 = vadd.f32 %v5520_v53, %v5343_v0 }
 0x35d   :  { %4357 = vpow2.f32 %v3914_v27  ;;  %v3915_v58 = vmul.f32 -1.442695, %v1434_v23  ;;  %v3913_v59 = vmul.f32 -1.442695, %v1430_v32  ;;  %v3916_v41 = vmul.f32 -1.442695, %v1436_v11 }
 0x35e   :  { %v1396_v3 = vpop.f32.mrf.mxu1  ;;  %v3917_v10 = vmul.f32 -1.442695, %v1438_v15  ;;  %v3918_v30 = vmul.f32 -1.442695, %v1440_v22  ;;  %v1401_v17 = vrot.slane %v5520_v53, 7  ;;  %v5535_v9 = vadd.f32 %v1403_v37, %v5356_v35 }
 0x35f   :  { %4359 = vpow2.f32 %v3915_v58  ;;  %v1442_v1 = vadd.f32 %v1410_v6, %v5373_v29  ;;  %v1405_v13 = vrot.slane %v5520_v53, 2  ;;  %v1407_v18 = vrot.slane %v5520_v53, 3 }
 0x360   :  { %4361 = vpow2.f32 %v3913_v59  ;;  %v5541_v44 = vadd.f32 %v1401_v17, %v5334_v55  ;;  %v1444_v23 = vadd.f32 %v1412_v34, %v5385_v16  ;;  %v1409_v27 = vrot.slane %v5520_v53, 4 }
 0x361   :  { %4363 = vpow2.f32 %v3916_v41  ;;  %v3919_v43 = vmul.f32 -1.442695, %v1442_v1  ;;  %v5545_v19 = vadd.f32 %v1405_v13, %v5379_v47  ;;  %v5551_v60 = vadd.f32 %v1407_v18, %v5394_v8 }
 0x362   :  { %4365 = vpow2.f32 %v3917_v10  ;;  %v1559_v58 = vrot.slane %v5464_v39, 7  ;;  %v3920_v3 = vmul.f32 -1.442695, %v1444_v23  ;;  %v5557_v59 = vadd.f32 %v1409_v27, %v5407_v7 }
 0x363   :  { %4367 = vtanh.f32 %v5530_v2  ;;  %v1560_v10 = vrot.slane %v5468_v28, 7  ;;  %v1411_v37 = vrot.slane %v5520_v53, 5  ;;  %v1558_v17 = vrot.slane %v5460_v63, 7 }
 0x364   :  { %v1562_v27 = vrot.slane %v5476_v45, 7 }
 0x365   :  { %v5570_v28 = vadd.f32 %v1411_v37, %v5420_v46 }
 0x36a   :  { %v4358_v26 = vpop.eup %4357 }
 0x36b   :  { %v1471_v33 = vadd.f32 1.0, %v4358_v26 }
 0x36c   :  { %v4360_v50 = vpop.eup %4359 }
 0x36d   :  { %4369 = vrcp.f32 %v1471_v33  ;;  %v1472_v49 = vadd.f32 1.0, %v4360_v50  ;;  %v4362_v25 = vpop.eup %4361 }
 0x36e   :  { %4371 = vpow2.f32 %v3918_v30  ;;  %v1470_v4 = vadd.f32 1.0, %v4362_v25  ;;  %v4364_v20 = vpop.eup %4363  ;;  %v1561_v25 = vrot.slane %v5472_v14, 7 }
 0x36f   :  { %4373 = vtanh.f32 %v5535_v9  ;;  %v1473_v31 = vadd.f32 1.0, %v4364_v20  ;;  %v4366_v57 = vpop.eup %4365 }
 0x370   :  { %4375 = vrcp.f32 %v1472_v49  ;;  %v4368_v32 = vpop.eup %4367  ;;  %v1474_v24 = vadd.f32 1.0, %v4366_v57 }
 0x371   :  { %4377 = vtanh.f32 %v5541_v44 }
 0x372   :  { %4379 = vrcp.f32 %v1470_v4 }
 0x373   :  { %4381 = vpow2.f32 %v3919_v43  ;;  %v1413_v43 = vrot.slane %v5520_v53, 6 }
 0x374   :  { %4383 = vtanh.f32 %v5545_v19 }
 0x375   :  { %4385 = vrcp.f32 %v1473_v31  ;;  %v1445_v14 = vadd.f32 %v1413_v43, %v5432_v12 }
 0x376   :  { %4387 = vtanh.f32 %v5551_v60 }
 0x377   :  { %4389 = vrcp.f32 %v1474_v24 }
 0x378   :  { %4391 = vpow2.f32 %v3920_v3  ;;  %v1563_v3 = vrot.slane %v5480_v56, 7 }
 0x379   :  { %4393 = vtanh.f32 %v5557_v59 }
 0x37a   :  { %v4370_v11 = vpop.eup %4369 }
 0x37b   :  { %v1583_v48 = vmul.f32 %v4370_v11, %v4368_v32  ;;  %v5559_v15 = vmul.f32 %v4370_v11, %v1559_v58  ;;  %v4372_v41 = vpop.eup %4371 }
 0x37c   :  { %v4374_v22 = vpop.eup %4373  ;;  %v1475_v39 = vadd.f32 1.0, %v4372_v41 }
 0x37d   :  { %1600 = vrot.lane.b32.xlu1 %v1583_v48, %s5076_s3  ;;  %v4376_v26 = vpop.eup %4375 }
 0x37e   :  { %v1584_v6 = vmul.f32 %v4376_v26, %v4374_v22  ;;  %4395 = vrcp.f32 %v1475_v39  ;;  %v5565_v30 = vmul.f32 %v4376_v26, %v1560_v10  ;;  %v4378_v33 = vpop.eup %4377  ;;  %v1564_v22 = vrot.slane %v5485_v40, 7 }
 0x37f   :  { %v4380_v50 = vpop.eup %4379  ;;  %4397 = vtanh.f32 %v5570_v28  ;;  %v1565_v26 = vrot.slane %v5490_v52, 7  ;;  %v3921_v40 = vmul.f32 -1.442695, %v5541_v44  ;;  %v3925_v52 = vmul.f32 -1.442695, %v5551_v60 }
 0x380   :  { %1602 = vrot.lane.b32.xlu0 %v1584_v6, %s5076_s3  ;;  %v4382_v1 = vpop.eup %4381  ;;  %v1582_v13 = vmul.f32 %v4380_v50, %v4378_v33  ;;  %v5572_v49 = vmul.f32 %v4380_v50, %v1558_v17  ;;  %v3922_v50 = vmul.f32 -1.442695, %v5530_v2  ;;  %v3927_v44 = vmul.f32 -1.442695, %v5570_v28 }
 0x381   :  { %v4384_v34 = vpop.eup %4383  ;;  %v1476_v18 = vadd.f32 1.0, %v4382_v1  ;;  %v3923_v1 = vmul.f32 -1.442695, %v5535_v9 }
 0x382   :  { %v4386_v4 = vpop.eup %4385  ;;  %1598 = vrot.lane.b32.xlu1 %v1582_v13, %s5076_s3  ;;  %v3924_v13 = vmul.f32 -1.442695, %v5545_v19 }
 0x383   :  { %v1585_v63 = vmul.f32 %v4386_v4, %v4384_v34  ;;  %4399 = vrcp.f32 %v1476_v18  ;;  %v5578_v20 = vmul.f32 %v4386_v4, %v1561_v25  ;;  %v4388_v23 = vpop.eup %4387  ;;  %v3926_v25 = vmul.f32 -1.442695, %v5557_v59 }
 0x384   :  { %v4390_v31 = vpop.eup %4389  ;;  %4401 = vtanh.f32 %v1445_v14 }
 0x385   :  { %1604 = vrot.lane.b32.xlu0 %v1585_v63, %s5076_s3  ;;  %v1586_v57 = vmul.f32 %v4390_v31, %v4388_v23  ;;  %v5583_v53 = vmul.f32 %v4390_v31, %v1562_v27  ;;  %v4392_v32 = vpop.eup %4391 }
 0x386   :  { %v4394_v58 = vpop.eup %4393  ;;  %v1477_v24 = vadd.f32 1.0, %v4392_v32 }
 0x387   :  { %1606 = vrot.lane.b32.xlu1 %v1586_v57, %s5076_s3  ;;  %v3928_v57 = vmul.f32 -1.442695, %v1445_v14 }
 0x388   :  { %4403 = vrcp.f32 %v1477_v24 }
 0x389   :  { %4405 = vpow2.f32 %v3922_v50 }
 0x38a   :  { %4407 = vpow2.f32 %v3923_v1 }
 0x38b   :  { %v4396_v11 = vpop.eup %4395  ;;  %4409 = vpow2.f32 %v3921_v40 }
 0x38c   :  { %v1587_v48 = vmul.f32 %v4396_v11, %v4394_v58  ;;  %v5587_v45 = vmul.f32 %v4396_v11, %v1563_v3  ;;  %v4398_v41 = vpop.eup %4397  ;;  %4411 = vpow2.f32 %v3924_v13 }
 0x38d   :  { %4413 = vpow2.f32 %v3925_v52 }
 0x38e   :  { %1608 = vrot.lane.b32.xlu0 %v1587_v48, %s5076_s3  ;;  %4415 = vpow2.f32 %v3926_v25 }
 0x390   :  { %v4400_v10 = vpop.eup %4399 }
 0x391   :  { %v1588_v37 = vmul.f32 %v4400_v10, %v4398_v41  ;;  %v5591_v39 = vmul.f32 %v4400_v10, %v1564_v22  ;;  %v4402_v56 = vpop.eup %4401 }
 0x393   :  { %1610 = vrot.lane.b32.xlu1 %v1588_v37, %s5076_s3 }
 0x395   :  { %v4404_v6 = vpop.eup %4403 }
 0x396   :  { %v1589_v33 = vmul.f32 %v4404_v6, %v4402_v56  ;;  %v5595_v17 = vmul.f32 %v4404_v6, %v1565_v26  ;;  %v4406_v34 = vpop.eup %4405 }
 0x397   :  { %v4408_v43 = vpop.eup %4407  ;;  %v1527_v18 = vadd.f32 1.0, %v4406_v34 }
 0x398   :  { %1612 = vrot.lane.b32.xlu0 %v1589_v33, %s5076_s3  ;;  %v1528_v4 = vadd.f32 1.0, %v4408_v43  ;;  %v4410_v19 = vpop.eup %4409 }
 0x399   :  { %4417 = vrcp.f32 %v1527_v18  ;;  %v4412_v60 = vpop.eup %4411  ;;  %v1526_v59 = vadd.f32 1.0, %v4410_v19 }
 0x39a   :  { %v1529_v27 = vadd.f32 1.0, %v4412_v60 }
 0x3ef   :  { %v1601_v2 = vpop.permute.xlu1 %1600 }
 0x3f0   :  { %v5605_v9 = vadd.f32 %v1601_v2, %v5559_v15  ;;  %v4414_v15 = vpop.eup %4413 }
 0x3f1   :  { %v1530_v58 = vadd.f32 1.0, %v4414_v15  ;;  %v4416_v3 = vpop.eup %4415 }
 0x3f2   :  { %4419 = vtanh.f32 %v5605_v9  ;;  %v1603_v63 = vpop.permute.xlu0 %1602  ;;  %v4418_v11 = vpop.eup %4417  ;;  %v1531_v48 = vadd.f32 1.0, %v4416_v3 }
 0x3f3   :  { %4421 = vrcp.f32 %v1528_v4  ;;  %v5610_v23 = vadd.f32 %v1603_v63, %v5565_v30 }
 0x3f4   :  { %4423 = vpow2.f32 %v3927_v44  ;;  %v1599_v31 = vpop.permute.xlu1 %1598 }
 0x3f5   :  { %4425 = vtanh.f32 %v5610_v23  ;;  %v5614_v32 = vadd.f32 %v1599_v31, %v5572_v49 }
 0x3f6   :  { %4427 = vrcp.f32 %v1526_v59 }
 0x3f7   :  { %4429 = vtanh.f32 %v5614_v32  ;;  %v1605_v28 = vpop.permute.xlu0 %1604 }
 0x3f8   :  { %4431 = vrcp.f32 %v1529_v27  ;;  %v5618_v30 = vadd.f32 %v1605_v28, %v5578_v20 }
 0x3f9   :  { %4433 = vpow2.f32 %v3928_v57  ;;  %v1607_v24 = vpop.permute.xlu1 %1606 }
 0x3fa   :  { %4435 = vtanh.f32 %v5618_v30  ;;  %v5622_v14 = vadd.f32 %v1607_v24, %v5583_v53 }
 0x3fb   :  { %4437 = vrcp.f32 %v1530_v58 }
 0x3fc   :  { %4439 = vtanh.f32 %v5622_v14 }
 0x3fd   :  { %4441 = vrcp.f32 %v1531_v48 }
 0x3ff   :  { %v4420_v49 = vpop.eup %4419 }
 0x400   :  { %v1639_v41 = vmul.f32 %v4420_v49, %v4418_v11  ;;  %v4422_v22 = vpop.eup %4421  ;;  %v1609_v10 = vpop.permute.xlu0 %1608 }
 0x401   :  { %v4424_v37 = vpop.eup %4423  ;;  %v5626_v20 = vadd.f32 %v1609_v10, %v5587_v45 }
 0x402   :  { %v4426_v56 = vpop.eup %4425  ;;  %v1532_v53 = vadd.f32 1.0, %v4424_v37  ;;  %v1647_v43 = vpack.c.bf16 %v1639_v41, %v1639_v41 }
 0x403   :  { %v1640_v26 = vmul.f32 %v4426_v56, %v4422_v22  ;;  %4443 = vtanh.f32 %v5626_v20  ;;  %v4428_v6 = vpop.eup %4427 }
 0x404   :  { %v4430_v33 = vpop.eup %4429  ;;  %4445 = vrcp.f32 %v1532_v53  ;;  %v1663_v59 = vunpack.c.l.b16 %v1647_v43 }
 0x405   :  { %v1648_v50 = vpack.c.bf16 %v1640_v26, %v1640_v26  ;;  %v4432_v1 = vpop.eup %4431  ;;  %v1638_v40 = vmul.f32 %v4430_v33, %v4428_v6  ;;  %v1611_v13 = vpop.permute.xlu1 %1610 }
 0x406   :  { %v4434_v52 = vpop.eup %4433  ;;  %v5630_v34 = vadd.f32 %v1611_v13, %v5591_v39 }
 0x407   :  { %v4436_v25 = vpop.eup %4435  ;;  %v1646_v45 = vpack.c.bf16 %v1638_v40, %v1638_v40  ;;  %v1664_v18 = vunpack.c.l.b16 %v1648_v50  ;;  %v1533_v60 = vadd.f32 1.0, %v4434_v52 }
 0x408   :  { %v1641_v2 = vmul.f32 %v4436_v25, %v4432_v1  ;;  %4447 = vtanh.f32 %v5630_v34  ;;  %v4438_v4 = vpop.eup %4437 }
 0x409   :  { %v1662_v44 = vunpack.c.l.b16 %v1646_v45  ;;  %v4440_v19 = vpop.eup %4439  ;;  %v1672_v15 = vrot.slane %v1664_v18, 7  ;;  %4449 = vrcp.f32 %v1533_v60 }
 0x40a   :  { %v1649_v63 = vpack.c.bf16 %v1641_v2, %v1641_v2  ;;  %v1642_v31 = vmul.f32 %v4440_v19, %v4438_v4  ;;  %v1613_v39 = vpop.permute.xlu0 %1612  ;;  %v4442_v28 = vpop.eup %4441 }
 0x40b   :  { %v1670_v27 = vrot.slane %v1662_v44, 1  ;;  %v5634_v58 = vadd.f32 %v1613_v39, %v5595_v17 }
 0x40c   :  { %v1665_v57 = vunpack.c.l.b16 %v1649_v63  ;;  %v1650_v3 = vpack.c.bf16 %v1642_v31, %v1642_v31  ;;  %v5669_v31 = vld [vmem:[%s6523_s2 + $0x10] ss:$8 sps:$4 sm:$0xff]  }
 0x40d   :  { %v1671_v24 = vsel %vm1331_vm0, %v1663_v59, %v1670_v27  ;;  %4451 = vtanh.f32 %v5634_v58  ;;  %v5651_v59 = vld [vmem:[%s6523_s2 + $0x24] ss:$8 sps:$4 sm:$0xff]   ;;  %v5657_v27 = vld [vmem:[%s6523_s2 + $0x20] ss:$8 sps:$4 sm:$0xff]  }
 0x40e   :  { %v1673_v49 = vsel %vm1334_vm1, %v1672_v15, %v1671_v24  ;;  %v1674_v48 = vrot.slane %v1665_v57, 6  ;;  %v1666_v22 = vunpack.c.l.b16 %v1650_v3  ;;  %v5675_v15 = vld [vmem:[%s6523_s2 + $0x4] ss:$8 sps:$4 sm:$0xff]   ;;  %v5681_v57 = vld [vmem:[%s6523_s2] ss:$8 sps:$4 sm:$0xff]  }
 0x410   :  { %v4444_v11 = vpop.eup %4443  ;;  %v1675_v10 = vsel %vm1337_vm2, %v1674_v48, %v1673_v49  ;;  %v1676_v56 = vrot.slane %v1666_v22, 5 }
 0x411   :  { %v1643_v41 = vmul.f32 %v4444_v11, %v4442_v28  ;;  %v4446_v6 = vpop.eup %4445 }
 0x412   :  { %v1677_v17 = vsel %vm1340_vm3, %v1676_v56, %v1675_v10 }
 0x413   :  { %v1651_v37 = vpack.c.bf16 %v1643_v41, %v1643_v41 }
 0x415   :  { %v1667_v26 = vunpack.c.l.b16 %v1651_v37  ;;  %v4448_v53 = vpop.eup %4447 }
 0x416   :  { %v1644_v50 = vmul.f32 %v4448_v53, %v4446_v6  ;;  %v4450_v52 = vpop.eup %4449 }
 0x417   :  { %v1678_v33 = vrot.slane %v1667_v26, 4 }
 0x418   :  { %v1652_v40 = vpack.c.bf16 %v1644_v50, %v1644_v50 }
 0x419   :  { %v1679_v1 = vsel %vm1343_vm4, %v1678_v33, %v1677_v17 }
 0x41a   :  { %v1668_v13 = vunpack.c.l.b16 %v1652_v40  ;;  %v4452_v25 = vpop.eup %4451 }
 0x41b   :  { %v1645_v45 = vmul.f32 %v4452_v25, %v4450_v52 }
 0x41c   :  { %v1680_v43 = vrot.slane %v1668_v13, 3 }
 0x41d   :  { %v1653_v2 = vpack.c.bf16 %v1645_v45, %v1645_v45 }
 0x41e   :  { %v1681_v18 = vsel %vm1346_vm5, %v1680_v43, %v1679_v1 }
 0x41f   :  { %v1669_v4 = vunpack.c.l.b16 %v1653_v2 }
 0x421   :  { %v1682_v44 = vrot.slane %v1669_v4, 2 }
 0x423   :  { %v1683_v19 = vsel %vm1349_vm6, %v1682_v44, %v1681_v18 }
 0x424   :  { %v1684_v63 = vpack.c.b16 %v1683_v19, %v1683_v19 }
 0x426   :  { %1685 = vrot.lane.b32.xlu1 %v1684_v63, %s5076_s3 }
 0x498   :  { %v1686_v60 = vpop.permute.xlu1 %1685 }
 0x499   :  { %3929 = vmatmul.mubr.msk.bf16.vlgmr.msra.gmra.mxu1 %vm1037_vm7, %v1686_v60 }
 0x49a   :  { %2032 = vmatpush1.bf16.msra.mxu1 %v5503_v21  ;;  %2055 = vmatprep.mubr.bf16.mxu1 %v5075_v42  ;;  %v5663_v21 = vld [vmem:[%s6523_s2 + $0x14] ss:$8 sps:$4 sm:$0xff]  }
 0x49b   :  { %2033 = vmatprep.subr.bf16.mxu1 %v5651_v59 }
 0x49e   :  { %2034 = vmatpush1.bf16.msra.mxu1 %v5657_v27 }
 0x49f   :  { %2035 = vmatprep.subr.bf16.mxu1 %v5663_v21 }
 0x4a2   :  { %2036 = vmatpush1.bf16.msra.mxu1 %v5669_v31 }
 0x4a3   :  { %2037 = vmatprep.subr.bf16.mxu1 %v5675_v15 }
 0x4a6   :  { %2038 = vmatpush1.bf16.msra.mxu1 %v5681_v57 }
 0x4a7   :  { %2697 = vmatprep.subr.bf16.mxu1 %v5516_v51 }
 0x559   :  { %v1724_v39 = vpop.f32.mrf.mxu1 }
 0x55a   :  { %v1733_v28 = vrot.slane %v1724_v39, 6  ;;  %v1735_v3 = vrot.slane %v1724_v39, 7  ;;  %v1767_v24 = vadd.f32 %v1724_v39, %v5322_v36  ;;  %v1737_v22 = vrot.slane %v1724_v39, 1 }
 0x55b   :  { %v5686_v11 = vpop.f32.mrf.mxu1  ;;  %v1741_v26 = vrot.slane %v1724_v39, 3  ;;  %v1739_v6 = vrot.slane %v1724_v39, 2  ;;  %v1745_v25 = vrot.slane %v1724_v39, 5 }
 0x55c   :  { %v1763_v49 = vadd.f32 %v1733_v28, %v5308_v54  ;;  %v3932_v48 = vmul.f32 -1.442695, %v1767_v24  ;;  %v1765_v10 = vadd.f32 %v1735_v3, %v5316_v62  ;;  %v1769_v51 = vadd.f32 %v1737_v22, %v5330_v5 }
 0x55d   :  { %v1728_v41 = vpop.f32.mrf.mxu1  ;;  %v1773_v53 = vadd.f32 %v1741_v26, %v5358_v38  ;;  %v1771_v50 = vadd.f32 %v1739_v6, %v5340_v61  ;;  %v1734_v40 = vrot.slane %v5686_v11, 6  ;;  %v5696_v13 = vadd.f32 %v5686_v11, %v5356_v35 }
 0x55e   :  { %v3930_v37 = vmul.f32 -1.442695, %v1763_v49  ;;  %4453 = vpow2.f32 %v3932_v48  ;;  %v3931_v17 = vmul.f32 -1.442695, %v1765_v10  ;;  %v3933_v33 = vmul.f32 -1.442695, %v1769_v51 }
 0x55f   :  { %v1729_v56 = vpop.f32.mrf.mxu1  ;;  %v3935_v1 = vmul.f32 -1.442695, %v1773_v53  ;;  %v3934_v43 = vmul.f32 -1.442695, %v1771_v50  ;;  %v1736_v18 = vrot.slane %v5686_v11, 7  ;;  %v5701_v2 = vadd.f32 %v1734_v40, %v5334_v55 }
 0x560   :  { %4455 = vpow2.f32 %v3930_v37  ;;  %v1777_v44 = vadd.f32 %v1745_v25, %v5385_v16  ;;  %v1738_v19 = vrot.slane %v5686_v11, 1  ;;  %v1743_v28 = vrot.slane %v1724_v39, 4 }
 0x561   :  { %4457 = vpow2.f32 %v3931_v17  ;;  %v5707_v60 = vadd.f32 %v1736_v18, %v5343_v0  ;;  %v1742_v49 = vrot.slane %v5686_v11, 3  ;;  %v1740_v37 = vrot.slane %v5686_v11, 2 }
 0x562   :  { %4459 = vpow2.f32 %v3933_v33  ;;  %v3937_v24 = vmul.f32 -1.442695, %v1777_v44  ;;  %v5711_v41 = vadd.f32 %v1738_v19, %v5379_v47  ;;  %v1775_v10 = vadd.f32 %v1743_v28, %v5373_v29 }
 0x563   :  { %4461 = vpow2.f32 %v3935_v1  ;;  %v5717_v39 = vadd.f32 %v1742_v49, %v5407_v7  ;;  %v1893_v17 = vrot.slane %v5610_v23, 7  ;;  %v5723_v50 = vadd.f32 %v1740_v37, %v5394_v8 }
 0x564   :  { %4463 = vtanh.f32 %v5696_v13  ;;  %v3936_v6 = vmul.f32 -1.442695, %v1775_v10  ;;  %v1744_v10 = vrot.slane %v5686_v11, 4 }
 0x56b   :  { %v4454_v52 = vpop.eup %4453 }
 0x56c   :  { %v1805_v45 = vadd.f32 1.0, %v4454_v52 }
 0x56d   :  { %v4456_v4 = vpop.eup %4455 }
 0x56e   :  { %4465 = vrcp.f32 %v1805_v45  ;;  %v1803_v63 = vadd.f32 1.0, %v4456_v4  ;;  %v4458_v3 = vpop.eup %4457  ;;  %v1746_v45 = vrot.slane %v5686_v11, 5 }
 0x56f   :  { %4467 = vpow2.f32 %v3934_v43  ;;  %v1804_v48 = vadd.f32 1.0, %v4458_v3  ;;  %v4460_v22 = vpop.eup %4459  ;;  %v1891_v43 = vrot.slane %v5614_v32, 7 }
 0x570   :  { %4469 = vtanh.f32 %v5701_v2  ;;  %v1806_v56 = vadd.f32 1.0, %v4460_v22  ;;  %v4462_v26 = vpop.eup %4461  ;;  %v5736_v32 = vadd.f32 %v1746_v45, %v5432_v12  ;;  %v1894_v22 = vrot.slane %v5618_v30, 7 }
 0x571   :  { %4471 = vrcp.f32 %v1803_v63  ;;  %v4464_v51 = vpop.eup %4463  ;;  %v1808_v53 = vadd.f32 1.0, %v4462_v26  ;;  %v1892_v63 = vrot.slane %v5605_v9, 7  ;;  %v1776_v30 = vadd.f32 %v1744_v10, %v5420_v46 }
 0x572   :  { %4473 = vtanh.f32 %v5707_v60  ;;  %v3938_v10 = vmul.f32 -1.442695, %v5701_v2 }
 0x573   :  { %4475 = vrcp.f32 %v1804_v48 }
 0x574   :  { %4477 = vpow2.f32 %v3937_v24 }
 0x575   :  { %4479 = vtanh.f32 %v5711_v41 }
 0x576   :  { %4481 = vrcp.f32 %v1806_v56 }
 0x577   :  { %4483 = vtanh.f32 %v5717_v39 }
 0x578   :  { %4485 = vrcp.f32 %v1808_v53 }
 0x579   :  { %4487 = vpow2.f32 %v3936_v6 }
 0x57a   :  { %4489 = vtanh.f32 %v5723_v50 }
 0x57b   :  { %v4466_v33 = vpop.eup %4465 }
 0x57c   :  { %v1917_v1 = vmul.f32 %v4466_v33, %v4464_v51  ;;  %v5725_v40 = vmul.f32 %v4466_v33, %v1893_v17  ;;  %v4468_v52 = vpop.eup %4467  ;;  %v1896_v17 = vrot.slane %v5626_v20, 7 }
 0x57d   :  { %v4470_v25 = vpop.eup %4469  ;;  %v1807_v23 = vadd.f32 1.0, %v4468_v52  ;;  %v1895_v52 = vrot.slane %v5622_v14, 7 }
 0x57e   :  { %1935 = vrot.lane.b32.xlu1 %v1917_v1, %s5076_s3  ;;  %v4472_v18 = vpop.eup %4471 }
 0x57f   :  { %v1915_v4 = vmul.f32 %v4472_v18, %v4470_v25  ;;  %4491 = vrcp.f32 %v1807_v23  ;;  %v5731_v44 = vmul.f32 %v4472_v18, %v1891_v43  ;;  %v4474_v19 = vpop.eup %4473  ;;  %v1898_v18 = vrot.slane %v5634_v58, 7 }
 0x580   :  { %v4476_v28 = vpop.eup %4475  ;;  %4493 = vtanh.f32 %v5736_v32  ;;  %v3939_v58 = vmul.f32 -1.442695, %v5707_v60  ;;  %v3945_v60 = vmul.f32 -1.442695, %v5736_v32 }
 0x581   :  { %1931 = vrot.lane.b32.xlu0 %v1915_v4, %s5076_s3  ;;  %v4478_v3 = vpop.eup %4477  ;;  %v1916_v24 = vmul.f32 %v4476_v28, %v4474_v19  ;;  %v5738_v49 = vmul.f32 %v4476_v28, %v1892_v63  ;;  %v1897_v28 = vrot.slane %v5630_v34, 7  ;;  %v3943_v34 = vmul.f32 -1.442695, %v5717_v39 }
 0x582   :  { %v4480_v48 = vpop.eup %4479  ;;  %v1810_v37 = vadd.f32 1.0, %v4478_v3 }
 0x583   :  { %v4482_v56 = vpop.eup %4481  ;;  %1933 = vrot.lane.b32.xlu1 %v1916_v24, %s5076_s3 }
 0x584   :  { %v1918_v9 = vmul.f32 %v4482_v56, %v4480_v48  ;;  %4495 = vrcp.f32 %v1810_v37  ;;  %v5744_v26 = vmul.f32 %v4482_v56, %v1894_v22  ;;  %v4484_v51 = vpop.eup %4483  ;;  %v3940_v22 = vmul.f32 -1.442695, %v5696_v13 }
 0x585   :  { %v4486_v6 = vpop.eup %4485  ;;  %4497 = vtanh.f32 %v1776_v30  ;;  %v3941_v37 = vmul.f32 -1.442695, %v5711_v41 }
 0x586   :  { %1937 = vrot.lane.b32.xlu0 %v1918_v9, %s5076_s3  ;;  %v1920_v53 = vmul.f32 %v4486_v6, %v4484_v51  ;;  %v5749_v11 = vmul.f32 %v4486_v6, %v1896_v17  ;;  %v4488_v33 = vpop.eup %4487  ;;  %v3942_v9 = vmul.f32 -1.442695, %v5723_v50 }
 0x587   :  { %v4490_v1 = vpop.eup %4489  ;;  %v1809_v25 = vadd.f32 1.0, %v4488_v33 }
 0x588   :  { %1941 = vrot.lane.b32.xlu1 %v1920_v53, %s5076_s3 }
 0x589   :  { %4499 = vrcp.f32 %v1809_v25  ;;  %v3944_v25 = vmul.f32 -1.442695, %v1776_v30 }
 0x58a   :  { %4501 = vpow2.f32 %v3940_v22 }
 0x58b   :  { %4503 = vpow2.f32 %v3938_v10 }
 0x58c   :  { %v4492_v43 = vpop.eup %4491  ;;  %4505 = vpow2.f32 %v3939_v58 }
 0x58d   :  { %v1919_v45 = vmul.f32 %v4492_v43, %v4490_v1  ;;  %v5753_v20 = vmul.f32 %v4492_v43, %v1895_v52  ;;  %v4494_v23 = vpop.eup %4493  ;;  %4507 = vpow2.f32 %v3941_v37 }
 0x58e   :  { %4509 = vpow2.f32 %v3943_v34 }
 0x58f   :  { %1939 = vrot.lane.b32.xlu0 %v1919_v45, %s5076_s3  ;;  %4511 = vpow2.f32 %v3942_v9 }
 0x591   :  { %v4496_v4 = vpop.eup %4495 }
 0x592   :  { %v1922_v19 = vmul.f32 %v4496_v4, %v4494_v23  ;;  %v5757_v63 = vmul.f32 %v4496_v4, %v1898_v18  ;;  %v4498_v14 = vpop.eup %4497 }
 0x594   :  { %1945 = vrot.lane.b32.xlu1 %v1922_v19, %s5076_s3 }
 0x596   :  { %v4500_v3 = vpop.eup %4499 }
 0x597   :  { %v1921_v24 = vmul.f32 %v4500_v3, %v4498_v14  ;;  %v5761_v48 = vmul.f32 %v4500_v3, %v1897_v28  ;;  %v4502_v56 = vpop.eup %4501 }
 0x598   :  { %v4504_v51 = vpop.eup %4503  ;;  %v1861_v17 = vadd.f32 1.0, %v4502_v56 }
 0x599   :  { %1943 = vrot.lane.b32.xlu0 %v1921_v24, %s5076_s3  ;;  %v1859_v6 = vadd.f32 1.0, %v4504_v51  ;;  %v4506_v41 = vpop.eup %4505 }
 0x59a   :  { %4513 = vrcp.f32 %v1861_v17  ;;  %v4508_v39 = vpop.eup %4507  ;;  %v1860_v50 = vadd.f32 1.0, %v4506_v41 }
 0x59b   :  { %v1862_v1 = vadd.f32 1.0, %v4508_v39 }
 0x5f0   :  { %v1936_v13 = vpop.permute.xlu1 %1935 }
 0x5f1   :  { %v5771_v2 = vadd.f32 %v1936_v13, %v5725_v40  ;;  %v4510_v40 = vpop.eup %4509 }
 0x5f2   :  { %v1864_v45 = vadd.f32 1.0, %v4510_v40  ;;  %v4512_v23 = vpop.eup %4511 }
 0x5f3   :  { %4515 = vtanh.f32 %v5771_v2  ;;  %v1932_v53 = vpop.permute.xlu0 %1931  ;;  %v4514_v4 = vpop.eup %4513  ;;  %v1863_v19 = vadd.f32 1.0, %v4512_v23 }
 0x5f4   :  { %4517 = vrcp.f32 %v1859_v6  ;;  %v5776_v33 = vadd.f32 %v1932_v53, %v5731_v44 }
 0x5f5   :  { %4519 = vpow2.f32 %v3945_v60  ;;  %v1934_v52 = vpop.permute.xlu1 %1933 }
 0x5f6   :  { %4521 = vtanh.f32 %v5776_v33  ;;  %v5780_v43 = vadd.f32 %v1934_v52, %v5738_v49 }
 0x5f7   :  { %4523 = vrcp.f32 %v1860_v50 }
 0x5f8   :  { %4525 = vtanh.f32 %v5780_v43  ;;  %v1938_v32 = vpop.permute.xlu0 %1937 }
 0x5f9   :  { %4527 = vrcp.f32 %v1862_v1  ;;  %v5784_v44 = vadd.f32 %v1938_v32, %v5744_v26 }
 0x5fa   :  { %4529 = vpow2.f32 %v3944_v25  ;;  %v1942_v18 = vpop.permute.xlu1 %1941 }
 0x5fb   :  { %4531 = vtanh.f32 %v5784_v44  ;;  %v5788_v30 = vadd.f32 %v1942_v18, %v5749_v11 }
 0x5fc   :  { %4533 = vrcp.f32 %v1864_v45 }
 0x5fd   :  { %4535 = vtanh.f32 %v5788_v30 }
 0x5fe   :  { %4537 = vrcp.f32 %v1863_v19 }
 0x600   :  { %v4516_v49 = vpop.eup %4515 }
 0x601   :  { %v1973_v14 = vmul.f32 %v4516_v49, %v4514_v4  ;;  %v4518_v28 = vpop.eup %4517  ;;  %v1940_v3 = vpop.permute.xlu0 %1939 }
 0x602   :  { %v4520_v24 = vpop.eup %4519  ;;  %v5792_v26 = vadd.f32 %v1940_v3, %v5753_v20 }
 0x603   :  { %v4522_v22 = vpop.eup %4521  ;;  %v1866_v37 = vadd.f32 1.0, %v4520_v24  ;;  %v1981_v41 = vpack.c.bf16 %v1973_v14, %v1973_v14 }
 0x604   :  { %v1971_v10 = vmul.f32 %v4522_v22, %v4518_v28  ;;  %4539 = vtanh.f32 %v5792_v26  ;;  %v4524_v58 = vpop.eup %4523 }
 0x605   :  { %v4526_v34 = vpop.eup %4525  ;;  %4541 = vrcp.f32 %v1866_v37  ;;  %v1997_v23 = vunpack.c.l.b16 %v1981_v41 }
 0x606   :  { %v1979_v11 = vpack.c.bf16 %v1971_v10, %v1971_v10  ;;  %v4528_v56 = vpop.eup %4527  ;;  %v1972_v9 = vmul.f32 %v4526_v34, %v4524_v58  ;;  %v1946_v51 = vpop.permute.xlu1 %1945 }
 0x607   :  { %v4530_v17 = vpop.eup %4529  ;;  %v5796_v13 = vadd.f32 %v1946_v51, %v5757_v63 }
 0x608   :  { %v4532_v6 = vpop.eup %4531  ;;  %v1995_v60 = vunpack.c.l.b16 %v1979_v11  ;;  %v1980_v20 = vpack.c.bf16 %v1972_v9, %v1972_v9  ;;  %v1865_v52 = vadd.f32 1.0, %v4530_v17 }
 0x609   :  { %v1974_v53 = vmul.f32 %v4532_v6, %v4528_v56  ;;  %4543 = vtanh.f32 %v5796_v13  ;;  %v4534_v39 = vpop.eup %4533 }
 0x60a   :  { %v1996_v50 = vunpack.c.l.b16 %v1980_v20  ;;  %v4536_v1 = vpop.eup %4535  ;;  %v2003_v25 = vrot.slane %v1995_v60, 2  ;;  %4545 = vrcp.f32 %v1865_v52 }
 0x60b   :  { %v1982_v40 = vpack.c.bf16 %v1974_v53, %v1974_v53  ;;  %v1976_v45 = vmul.f32 %v4536_v1, %v4534_v39  ;;  %v1944_v63 = vpop.permute.xlu0 %1943  ;;  %v4538_v4 = vpop.eup %4537 }
 0x60c   :  { %v2004_v32 = vrot.slane %v1996_v50, 1  ;;  %v5800_v49 = vadd.f32 %v1944_v63, %v5761_v48  ;;  %v5042_v63 = vld [vmem:[%s6523_s2 + $0x34] ss:$8 sps:$4 sm:$0xff]  }
 0x60d   :  { %v1998_v18 = vunpack.c.l.b16 %v1982_v40  ;;  %v1984_v28 = vpack.c.bf16 %v1976_v45, %v1976_v45 }
 0x60e   :  { %v2005_v19 = vsel %vm1331_vm0, %v2004_v32, %v2003_v25  ;;  %4547 = vtanh.f32 %v5800_v49 }
 0x60f   :  { %v2006_v3 = vsel %vm1334_vm1, %v1997_v23, %v2005_v19  ;;  %v2007_v24 = vrot.slane %v1998_v18, 7  ;;  %v2000_v11 = vunpack.c.l.b16 %v1984_v28  ;;  %v5815_v18 = vld [vmem:[%s6523_s2 + $0x30] ss:$8 sps:$4 sm:$0xff]  }
 0x611   :  { %v4540_v14 = vpop.eup %4539  ;;  %v2008_v10 = vsel %vm1337_vm2, %v2007_v24, %v2006_v3  ;;  %v2011_v51 = vrot.slane %v2000_v11, 5 }
 0x612   :  { %v1975_v22 = vmul.f32 %v4540_v14, %v4538_v4  ;;  %v4542_v34 = vpop.eup %4541 }
 0x614   :  { %v1983_v58 = vpack.c.bf16 %v1975_v22, %v1975_v22 }
 0x616   :  { %v1999_v37 = vunpack.c.l.b16 %v1983_v58  ;;  %v4544_v56 = vpop.eup %4543 }
 0x617   :  { %v1978_v9 = vmul.f32 %v4544_v56, %v4542_v34  ;;  %v4546_v60 = vpop.eup %4545 }
 0x618   :  { %v2009_v48 = vrot.slane %v1999_v37, 6 }
 0x619   :  { %v1986_v41 = vpack.c.bf16 %v1978_v9, %v1978_v9 }
 0x61a   :  { %v2010_v17 = vsel %vm1340_vm3, %v2009_v48, %v2008_v10 }
 0x61b   :  { %v2012_v6 = vsel %vm1343_vm4, %v2011_v51, %v2010_v17  ;;  %v4548_v20 = vpop.eup %4547  ;;  %v2002_v50 = vunpack.c.l.b16 %v1986_v41 }
 0x61c   :  { %v1977_v53 = vmul.f32 %v4548_v20, %v4546_v60 }
 0x61d   :  { %v2015_v40 = vrot.slane %v2002_v50, 3 }
 0x61e   :  { %v1985_v39 = vpack.c.bf16 %v1977_v53, %v1977_v53 }
 0x620   :  { %v2001_v1 = vunpack.c.l.b16 %v1985_v39 }
 0x622   :  { %v2013_v52 = vrot.slane %v2001_v1, 4 }
 0x624   :  { %v2014_v25 = vsel %vm1346_vm5, %v2013_v52, %v2012_v6 }
 0x625   :  { %v2016_v32 = vsel %vm1349_vm6, %v2015_v40, %v2014_v25 }
 0x626   :  { %v2017_v45 = vpack.c.b16 %v2016_v32, %v2016_v32 }
 0x628   :  { %2018 = vrot.lane.b32.xlu0 %v2017_v45, %s5076_s3 }
 0x69a   :  { %v2019_v23 = vpop.permute.xlu0 %2018 }
 0x69b   :  { %3946 = vmatmul.mubr.msk.bf16.vlgmr.msra.gmra.mxu1 %vm1037_vm7, %v2019_v23 }
 0x69c   :  { %2698 = vmatpush1.bf16.msra.mxu1 %v5815_v18  ;;  %2721 = vmatprep.mubr.bf16.mxu1 %v5075_v42 }
 0x69d   :  { %2699 = vmatprep.subr.bf16.mxu1 %v5651_v59 }
 0x6a0   :  { %2700 = vmatpush1.bf16.msra.mxu1 %v5657_v27 }
 0x6a1   :  { %2701 = vmatprep.subr.bf16.mxu1 %v5663_v21 }
 0x6a4   :  { %2702 = vmatpush1.bf16.msra.mxu1 %v5669_v31 }
 0x6a5   :  { %2703 = vmatprep.subr.bf16.mxu1 %v5675_v15 }
 0x6a8   :  { %2704 = vmatpush1.bf16.msra.mxu1 %v5681_v57 }
 0x6a9   :  { %3363 = vmatprep.subr.bf16.mxu1 %v5042_v63 }
 0x75b   :  { %v2057_v4 = vpop.f32.mrf.mxu1 }
 0x75c   :  { %v2068_v19 = vrot.slane %v2057_v4, 6  ;;  %v2066_v14 = vrot.slane %v2057_v4, 5  ;;  %v2102_v59 = vadd.f32 %v2057_v4, %v5330_v5  ;;  %v2072_v3 = vrot.slane %v2057_v4, 1 }
 0x75d   :  { %v5829_v28 = vpop.f32.mrf.mxu1  ;;  %v2070_v22 = vrot.slane %v2057_v4, 7  ;;  %v2074_v11 = vrot.slane %v2057_v4, 2  ;;  %v2076_v6 = vrot.slane %v2057_v4, 3  ;;  %v2078_v25 = vrot.slane %v2057_v4, 4 }
 0x75e   :  { %v2098_v27 = vadd.f32 %v2068_v19, %v5316_v62  ;;  %v3950_v21 = vmul.f32 -1.442695, %v2102_v59  ;;  %v2096_v15 = vadd.f32 %v2066_v14, %v5308_v54  ;;  %v2104_v10 = vadd.f32 %v2072_v3, %v5340_v61 }
 0x75f   :  { %v2061_v31 = vpop.f32.mrf.mxu1  ;;  %v2100_v37 = vadd.f32 %v2070_v22, %v5322_v36  ;;  %v2106_v56 = vadd.f32 %v2074_v11, %v5358_v38  ;;  %v2069_v9 = vrot.slane %v5829_v28, 6  ;;  %v5839_v51 = vadd.f32 %v5829_v28, %v5379_v47 }
 0x760   :  { %v3948_v57 = vmul.f32 -1.442695, %v2098_v27  ;;  %4549 = vpow2.f32 %v3950_v21  ;;  %v3947_v58 = vmul.f32 -1.442695, %v2096_v15  ;;  %v3951_v34 = vmul.f32 -1.442695, %v2104_v10 }
 0x761   :  { %v2062_v24 = vpop.f32.mrf.mxu1  ;;  %v3949_v48 = vmul.f32 -1.442695, %v2100_v37  ;;  %v3952_v60 = vmul.f32 -1.442695, %v2106_v56  ;;  %v2067_v41 = vrot.slane %v5829_v28, 5  ;;  %v5844_v53 = vadd.f32 %v2069_v9, %v5343_v0 }
 0x762   :  { %4551 = vpow2.f32 %v3948_v57  ;;  %v2108_v50 = vadd.f32 %v2076_v6, %v5373_v29  ;;  %v2073_v1 = vrot.slane %v5829_v28, 1  ;;  %v2071_v23 = vrot.slane %v5829_v28, 7 }
 0x763   :  { %4553 = vpow2.f32 %v3947_v58  ;;  %v5850_v40 = vadd.f32 %v2067_v41, %v5334_v55  ;;  %v2110_v59 = vadd.f32 %v2078_v25, %v5385_v16  ;;  %v2075_v27 = vrot.slane %v5829_v28, 2 }
 0x764   :  { %4555 = vpow2.f32 %v3951_v34  ;;  %v3953_v45 = vmul.f32 -1.442695, %v2108_v50  ;;  %v5854_v19 = vadd.f32 %v2073_v1, %v5394_v8  ;;  %v5860_v4 = vadd.f32 %v2071_v23, %v5356_v35 }
 0x765   :  { %4557 = vpow2.f32 %v3949_v48  ;;  %v2227_v15 = vrot.slane %v5784_v44, 7  ;;  %v3954_v57 = vmul.f32 -1.442695, %v2110_v59  ;;  %v5866_v10 = vadd.f32 %v2075_v27, %v5407_v7 }
 0x766   :  { %4559 = vtanh.f32 %v5839_v51  ;;  %v2225_v56 = vrot.slane %v5780_v43, 7  ;;  %v2077_v48 = vrot.slane %v5829_v28, 3  ;;  %v2228_v25 = vrot.slane %v5792_v26, 7 }
 0x767   :  { %v2226_v59 = vrot.slane %v5771_v2, 7 }
 0x768   :  { %v5879_v43 = vadd.f32 %v2077_v48, %v5420_v46 }
 0x76d   :  { %v4550_v17 = vpop.eup %4549 }
 0x76e   :  { %v2139_v20 = vadd.f32 1.0, %v4550_v17 }
 0x76f   :  { %v4552_v39 = vpop.eup %4551 }
 0x770   :  { %4561 = vrcp.f32 %v2139_v20  ;;  %v2137_v52 = vadd.f32 1.0, %v4552_v39  ;;  %v4554_v32 = vpop.eup %4553  ;;  %v2224_v20 = vrot.slane %v5776_v33, 7 }
 0x771   :  { %4563 = vpow2.f32 %v3952_v60  ;;  %v2136_v63 = vadd.f32 1.0, %v4554_v32  ;;  %v4556_v14 = vpop.eup %4555  ;;  %v2079_v32 = vrot.slane %v5829_v28, 4 }
 0x772   :  { %4565 = vtanh.f32 %v5844_v53  ;;  %v2140_v21 = vadd.f32 1.0, %v4556_v14  ;;  %v4558_v31 = vpop.eup %4557 }
 0x773   :  { %4567 = vrcp.f32 %v2137_v52  ;;  %v4560_v3 = vpop.eup %4559  ;;  %v2138_v24 = vadd.f32 1.0, %v4558_v31  ;;  %v2111_v26 = vadd.f32 %v2079_v32, %v5432_v12 }
 0x774   :  { %4569 = vtanh.f32 %v5850_v40 }
 0x775   :  { %4571 = vrcp.f32 %v2136_v63 }
 0x776   :  { %4573 = vpow2.f32 %v3953_v45 }
 0x777   :  { %4575 = vtanh.f32 %v5854_v19 }
 0x778   :  { %4577 = vrcp.f32 %v2140_v21 }
 0x779   :  { %4579 = vtanh.f32 %v5860_v4 }
 0x77a   :  { %4581 = vrcp.f32 %v2138_v24 }
 0x77b   :  { %4583 = vpow2.f32 %v3954_v57 }
 0x77c   :  { %4585 = vtanh.f32 %v5866_v10 }
 0x77d   :  { %v4562_v22 = vpop.eup %4561 }
 0x77e   :  { %v2251_v58 = vmul.f32 %v4562_v22, %v4560_v3  ;;  %v5868_v11 = vmul.f32 %v4562_v22, %v2227_v15  ;;  %v4564_v37 = vpop.eup %4563  ;;  %v2229_v15 = vrot.slane %v5788_v30, 7 }
 0x77f   :  { %v4566_v34 = vpop.eup %4565  ;;  %v2141_v44 = vadd.f32 1.0, %v4564_v37  ;;  %v2230_v37 = vrot.slane %v5800_v49, 7  ;;  %v3955_v49 = vmul.f32 -1.442695, %v5850_v40  ;;  %v3961_v40 = vmul.f32 -1.442695, %v5879_v43 }
 0x780   :  { %2270 = vrot.lane.b32.xlu1 %v2251_v58, %s5076_s3  ;;  %v4568_v9 = vpop.eup %4567 }
 0x781   :  { %v2249_v17 = vmul.f32 %v4568_v9, %v4566_v34  ;;  %4587 = vrcp.f32 %v2141_v44  ;;  %v5874_v6 = vmul.f32 %v4568_v9, %v2225_v56  ;;  %v4570_v60 = vpop.eup %4569  ;;  %v2231_v44 = vrot.slane %v5796_v13, 7 }
 0x782   :  { %v4572_v41 = vpop.eup %4571  ;;  %4589 = vtanh.f32 %v5879_v43  ;;  %v3957_v13 = vmul.f32 -1.442695, %v5860_v4 }
 0x783   :  { %2266 = vrot.lane.b32.xlu0 %v2249_v17, %s5076_s3  ;;  %v4574_v39 = vpop.eup %4573  ;;  %v2248_v50 = vmul.f32 %v4572_v41, %v4570_v60  ;;  %v5881_v1 = vmul.f32 %v4572_v41, %v2224_v20  ;;  %v3958_v20 = vmul.f32 -1.442695, %v5839_v51  ;;  %v3956_v41 = vmul.f32 -1.442695, %v5844_v53 }
 0x784   :  { %v4576_v52 = vpop.eup %4575  ;;  %v2142_v45 = vadd.f32 1.0, %v4574_v39  ;;  %v3959_v39 = vmul.f32 -1.442695, %v5854_v19 }
 0x785   :  { %v4578_v23 = vpop.eup %4577  ;;  %2264 = vrot.lane.b32.xlu1 %v2248_v50, %s5076_s3 }
 0x786   :  { %v2252_v33 = vmul.f32 %v4578_v23, %v4576_v52  ;;  %4591 = vrcp.f32 %v2142_v45  ;;  %v5887_v63 = vmul.f32 %v4578_v23, %v2228_v25  ;;  %v4580_v14 = vpop.eup %4579  ;;  %v3960_v52 = vmul.f32 -1.442695, %v5866_v10 }
 0x787   :  { %v4582_v27 = vpop.eup %4581  ;;  %4593 = vtanh.f32 %v2111_v26 }
 0x788   :  { %2272 = vrot.lane.b32.xlu0 %v2252_v33, %s5076_s3  ;;  %v2250_v21 = vmul.f32 %v4582_v27, %v4580_v14  ;;  %v5892_v28 = vmul.f32 %v4582_v27, %v2226_v59  ;;  %v4584_v31 = vpop.eup %4583  ;;  %v3962_v27 = vmul.f32 -1.442695, %v2111_v26 }
 0x789   :  { %v4586_v3 = vpop.eup %4585  ;;  %v2143_v57 = vadd.f32 1.0, %v4584_v31 }
 0x78a   :  { %2268 = vrot.lane.b32.xlu1 %v2250_v21, %s5076_s3 }
 0x78b   :  { %4595 = vrcp.f32 %v2143_v57 }
 0x78c   :  { %4597 = vpow2.f32 %v3958_v20 }
 0x78d   :  { %4599 = vpow2.f32 %v3956_v41 }
 0x78e   :  { %v4588_v24 = vpop.eup %4587  ;;  %4601 = vpow2.f32 %v3955_v49 }
 0x78f   :  { %v2253_v22 = vmul.f32 %v4588_v24, %v4586_v3  ;;  %v5896_v2 = vmul.f32 %v4588_v24, %v2229_v15  ;;  %v4590_v58 = vpop.eup %4589  ;;  %4603 = vpow2.f32 %v3959_v39 }
 0x790   :  { %4605 = vpow2.f32 %v3957_v13 }
 0x791   :  { %2274 = vrot.lane.b32.xlu0 %v2253_v22, %s5076_s3  ;;  %4607 = vpow2.f32 %v3960_v52 }
 0x793   :  { %v4592_v34 = vpop.eup %4591 }
 0x794   :  { %v2254_v56 = vmul.f32 %v4592_v34, %v4590_v58  ;;  %v5900_v48 = vmul.f32 %v4592_v34, %v2230_v37  ;;  %v4594_v30 = vpop.eup %4593 }
 0x796   :  { %2276 = vrot.lane.b32.xlu1 %v2254_v56, %s5076_s3 }
 0x798   :  { %v4596_v9 = vpop.eup %4595 }
 0x799   :  { %v2255_v17 = vmul.f32 %v4596_v9, %v4594_v30  ;;  %v5904_v60 = vmul.f32 %v4596_v9, %v2231_v44  ;;  %v4598_v50 = vpop.eup %4597 }
 0x79a   :  { %v4600_v25 = vpop.eup %4599  ;;  %v2195_v32 = vadd.f32 1.0, %v4598_v50 }
 0x79b   :  { %2278 = vrot.lane.b32.xlu0 %v2255_v17, %s5076_s3  ;;  %v2193_v45 = vadd.f32 1.0, %v4600_v25  ;;  %v4602_v19 = vpop.eup %4601 }
 0x79c   :  { %4609 = vrcp.f32 %v2195_v32  ;;  %v4604_v4 = vpop.eup %4603  ;;  %v2192_v10 = vadd.f32 1.0, %v4602_v19 }
 0x79d   :  { %v2196_v14 = vadd.f32 1.0, %v4604_v4 }
 0x7f2   :  { %v2271_v51 = vpop.permute.xlu1 %2270 }
 0x7f3   :  { %v5914_v53 = vadd.f32 %v2271_v51, %v5868_v11  ;;  %v4606_v11 = vpop.eup %4605 }
 0x7f4   :  { %v2194_v31 = vadd.f32 1.0, %v4606_v11  ;;  %v4608_v3 = vpop.eup %4607 }
 0x7f5   :  { %4611 = vtanh.f32 %v5914_v53  ;;  %v2267_v23 = vpop.permute.xlu0 %2266  ;;  %v4610_v57 = vpop.eup %4609  ;;  %v2197_v24 = vadd.f32 1.0, %v4608_v3 }
 0x7f6   :  { %4613 = vrcp.f32 %v2193_v45  ;;  %v5919_v33 = vadd.f32 %v2267_v23, %v5874_v6 }
 0x7f7   :  { %4615 = vpow2.f32 %v3961_v40  ;;  %v2265_v59 = vpop.permute.xlu1 %2264 }
 0x7f8   :  { %4617 = vtanh.f32 %v5919_v33  ;;  %v5923_v21 = vadd.f32 %v2265_v59, %v5881_v1 }
 0x7f9   :  { %4619 = vrcp.f32 %v2192_v10 }
 0x7fa   :  { %4621 = vtanh.f32 %v5923_v21  ;;  %v2273_v43 = vpop.permute.xlu0 %2272 }
 0x7fb   :  { %4623 = vrcp.f32 %v2196_v14  ;;  %v5927_v6 = vadd.f32 %v2273_v43, %v5887_v63 }
 0x7fc   :  { %4625 = vpow2.f32 %v3962_v27  ;;  %v2269_v15 = vpop.permute.xlu1 %2268 }
 0x7fd   :  { %4627 = vtanh.f32 %v5927_v6  ;;  %v5931_v26 = vadd.f32 %v2269_v15, %v5892_v28 }
 0x7fe   :  { %4629 = vrcp.f32 %v2194_v31 }
 0x7ff   :  { %4631 = vtanh.f32 %v5931_v26 }
 0x800   :  { %4633 = vrcp.f32 %v2197_v24 }
 0x802   :  { %v4612_v1 = vpop.eup %4611 }
 0x803   :  { %v2307_v22 = vmul.f32 %v4612_v1, %v4610_v57  ;;  %v4614_v58 = vpop.eup %4613  ;;  %v2275_v37 = vpop.permute.xlu0 %2274 }
 0x804   :  { %v4616_v34 = vpop.eup %4615  ;;  %v5935_v63 = vadd.f32 %v2275_v37, %v5896_v2 }
 0x805   :  { %v4618_v56 = vpop.eup %4617  ;;  %v2198_v28 = vadd.f32 1.0, %v4616_v34  ;;  %v2315_v31 = vpack.c.bf16 %v2307_v22, %v2307_v22 }
 0x806   :  { %v2305_v30 = vmul.f32 %v4618_v56, %v4614_v58  ;;  %4635 = vtanh.f32 %v5935_v63  ;;  %v4620_v44 = vpop.eup %4619 }
 0x807   :  { %v4622_v17 = vpop.eup %4621  ;;  %4637 = vrcp.f32 %v2198_v28  ;;  %v2331_v58 = vunpack.c.l.b16 %v2315_v31 }
 0x808   :  { %v2313_v9 = vpack.c.bf16 %v2305_v30, %v2305_v30  ;;  %v4624_v20 = vpop.eup %4623  ;;  %v2304_v41 = vmul.f32 %v4622_v17, %v4620_v44  ;;  %v2277_v49 = vpop.permute.xlu1 %2276 }
 0x809   :  { %v4626_v39 = vpop.eup %4625  ;;  %v5939_v13 = vadd.f32 %v2277_v49, %v5900_v48 }
 0x80a   :  { %v4628_v50 = vpop.eup %4627  ;;  %v2329_v52 = vunpack.c.l.b16 %v2313_v9  ;;  %v2312_v2 = vpack.c.bf16 %v2304_v41, %v2304_v41  ;;  %v2199_v40 = vadd.f32 1.0, %v4626_v39 }
 0x80b   :  { %v2308_v25 = vmul.f32 %v4628_v50, %v4624_v20  ;;  %4639 = vtanh.f32 %v5939_v13  ;;  %v4630_v32 = vpop.eup %4629 }
 0x80c   :  { %v2328_v51 = vunpack.c.l.b16 %v2312_v2  ;;  %v4632_v45 = vpop.eup %4631  ;;  %v2337_v19 = vrot.slane %v2329_v52, 2  ;;  %4641 = vrcp.f32 %v2199_v40 }
 0x80d   :  { %v2306_v4 = vmul.f32 %v4632_v45, %v4630_v32  ;;  %v2316_v10 = vpack.c.bf16 %v2308_v25, %v2308_v25  ;;  %v2279_v14 = vpop.permute.xlu0 %2278  ;;  %v4634_v59 = vpop.eup %4633 }
 0x80e   :  { %v2336_v23 = vrot.slane %v2328_v51, 3  ;;  %v5943_v48 = vadd.f32 %v2279_v14, %v5904_v60  ;;  %v5984_v14 = vld [vmem:[%s6523_s2 + $0x4] ss:$8 sps:$4 sm:$0xff]  }
 0x80f   :  { %v2314_v11 = vpack.c.bf16 %v2306_v4, %v2306_v4  ;;  %v2332_v57 = vunpack.c.l.b16 %v2316_v10  ;;  %v5966_v4 = vld [vmem:[%s6523_s2 + $0x20] ss:$8 sps:$4 sm:$0xff]   ;;  %v5978_v10 = vld [vmem:[%s6523_s2 + $0x10] ss:$8 sps:$4 sm:$0xff]  }
 0x810   :  { %v2338_v27 = vsel %vm1331_vm0, %v2337_v19, %v2336_v23  ;;  %4643 = vtanh.f32 %v5943_v48  ;;  %v5960_v23 = vld [vmem:[%s6523_s2 + $0x24] ss:$8 sps:$4 sm:$0xff]  }
 0x811   :  { %v2330_v3 = vunpack.c.l.b16 %v2314_v11  ;;  %v2342_v56 = vrot.slane %v2332_v57, 7 }
 0x813   :  { %v4636_v43 = vpop.eup %4635  ;;  %v2339_v1 = vrot.slane %v2330_v3, 1 }
 0x814   :  { %v2309_v15 = vmul.f32 %v4636_v43, %v4634_v59  ;;  %v4638_v30 = vpop.eup %4637  ;;  %v5990_v59 = vld [vmem:[%s6523_s2] ss:$8 sps:$4 sm:$0xff]  }
 0x815   :  { %v2340_v34 = vsel %vm1334_vm1, %v2339_v1, %v2338_v27 }
 0x816   :  { %v2317_v24 = vpack.c.bf16 %v2309_v15, %v2309_v15  ;;  %v2341_v60 = vsel %vm1337_vm2, %v2331_v58, %v2340_v34 }
 0x817   :  { %v2343_v28 = vsel %vm1340_vm3, %v2342_v56, %v2341_v60 }
 0x818   :  { %v2333_v37 = vunpack.c.l.b16 %v2317_v24  ;;  %v4640_v44 = vpop.eup %4639 }
 0x819   :  { %v2310_v9 = vmul.f32 %v4640_v44, %v4638_v30  ;;  %v4642_v49 = vpop.eup %4641 }
 0x81a   :  { %v2344_v22 = vrot.slane %v2333_v37, 6 }
 0x81b   :  { %v2318_v20 = vpack.c.bf16 %v2310_v9, %v2310_v9 }
 0x81c   :  { %v2345_v17 = vsel %vm1343_vm4, %v2344_v22, %v2343_v28 }
 0x81d   :  { %v2334_v41 = vunpack.c.l.b16 %v2318_v20  ;;  %v4644_v39 = vpop.eup %4643 }
 0x81e   :  { %v2311_v52 = vmul.f32 %v4644_v39, %v4642_v49 }
 0x81f   :  { %v2346_v50 = vrot.slane %v2334_v41, 5 }
 0x820   :  { %v2319_v25 = vpack.c.bf16 %v2311_v52, %v2311_v52 }
 0x821   :  { %v2347_v2 = vsel %vm1346_vm5, %v2346_v50, %v2345_v17 }
 0x822   :  { %v2335_v32 = vunpack.c.l.b16 %v2319_v25 }
 0x824   :  { %v2348_v51 = vrot.slane %v2335_v32, 4 }
 0x826   :  { %v2349_v45 = vsel %vm1349_vm6, %v2348_v51, %v2347_v2 }
 0x827   :  { %v2350_v40 = vpack.c.b16 %v2349_v45, %v2349_v45 }
 0x829   :  { %2351 = vrot.lane.b32.xlu1 %v2350_v40, %s5076_s3 }
 0x89b   :  { %v2352_v19 = vpop.permute.xlu1 %2351 }
 0x89c   :  { %3963 = vmatmul.mubr.msk.bf16.vlgmr.msra.gmra.mxu0 %vm1037_vm7, %v2352_v19 }
 0x89d   :  { %3031 = vmatpush1.bf16.msra.mxu0 %v5815_v18  ;;  %3054 = vmatprep.mubr.bf16.mxu0 %v5075_v42  ;;  %v5972_v18 = vld [vmem:[%s6523_s2 + $0x14] ss:$8 sps:$4 sm:$0xff]  }
 0x89e   :  { %3032 = vmatprep.subr.bf16.mxu0 %v5960_v23 }
 0x8a1   :  { %3033 = vmatpush1.bf16.msra.mxu0 %v5966_v4 }
 0x8a2   :  { %3034 = vmatprep.subr.bf16.mxu0 %v5972_v18 }
 0x8a5   :  { %3035 = vmatpush1.bf16.msra.mxu0 %v5978_v10 }
 0x8a6   :  { %3036 = vmatprep.subr.bf16.mxu0 %v5984_v14 }
 0x8a9   :  { %3037 = vmatpush1.bf16.msra.mxu0 %v5990_v59 }
 0x95c   :  { %v2390_v11 = vpop.f32.mrf.mxu0 }
 0x95d   :  { %v2399_v27 = vrot.slane %v2390_v11, 4  ;;  %v2401_v43 = vrot.slane %v2390_v11, 5  ;;  %v2437_v31 = vadd.f32 %v2390_v11, %v5340_v61  ;;  %v2403_v24 = vrot.slane %v2390_v11, 6 }
 0x95e   :  { %v5994_v3 = vpop.f32.mrf.mxu0  ;;  %v2405_v56 = vrot.slane %v2390_v11, 7  ;;  %v2407_v44 = vrot.slane %v2390_v11, 1  ;;  %v2411_v39 = vrot.slane %v2390_v11, 3 }
 0x95f   :  { %v2429_v15 = vadd.f32 %v2399_v27, %v5308_v54  ;;  %v3968_v57 = vmul.f32 -1.442695, %v2437_v31  ;;  %v2431_v58 = vadd.f32 %v2401_v43, %v5316_v62  ;;  %v2433_v30 = vadd.f32 %v2403_v24, %v5322_v36 }
 0x960   :  { %v2394_v1 = vpop.f32.mrf.mxu0  ;;  %v2435_v28 = vadd.f32 %v2405_v56, %v5330_v5  ;;  %v2439_v9 = vadd.f32 %v2407_v44, %v5358_v38  ;;  %v2400_v20 = vrot.slane %v5994_v3, 4  ;;  %v6004_v41 = vadd.f32 %v5994_v3, %v5394_v8 }
 0x961   :  { %v3964_v37 = vmul.f32 -1.442695, %v2429_v15  ;;  %4645 = vpow2.f32 %v3968_v57  ;;  %v3965_v60 = vmul.f32 -1.442695, %v2431_v58  ;;  %v3966_v22 = vmul.f32 -1.442695, %v2433_v30 }
 0x962   :  { %v2395_v34 = vpop.f32.mrf.mxu0  ;;  %v3967_v17 = vmul.f32 -1.442695, %v2435_v28  ;;  %v3969_v50 = vmul.f32 -1.442695, %v2439_v9  ;;  %v2402_v2 = vrot.slane %v5994_v3, 5  ;;  %v6009_v25 = vadd.f32 %v2400_v20, %v5334_v55 }
 0x963   :  { %4647 = vpow2.f32 %v3964_v37  ;;  %v2443_v51 = vadd.f32 %v2411_v39, %v5385_v16  ;;  %v2404_v45 = vrot.slane %v5994_v3, 6  ;;  %v2409_v27 = vrot.slane %v2390_v11, 2 }
 0x964   :  { %4649 = vpow2.f32 %v3965_v60  ;;  %v6015_v19 = vadd.f32 %v2402_v2, %v5343_v0  ;;  %v2406_v15 = vrot.slane %v5994_v3, 7  ;;  %v2408_v37 = vrot.slane %v5994_v3, 1 }
 0x965   :  { %4651 = vpow2.f32 %v3966_v22  ;;  %v3971_v31 = vmul.f32 -1.442695, %v2443_v51  ;;  %v6019_v1 = vadd.f32 %v2404_v45, %v5356_v35  ;;  %v2441_v58 = vadd.f32 %v2409_v27, %v5373_v29 }
 0x966   :  { %4653 = vpow2.f32 %v3967_v17  ;;  %v6025_v11 = vadd.f32 %v2406_v15, %v5379_v47  ;;  %v2561_v60 = vrot.slane %v5927_v6, 7  ;;  %v6031_v9 = vadd.f32 %v2408_v37, %v5407_v7 }
 0x967   :  { %4655 = vtanh.f32 %v6004_v41  ;;  %v3970_v44 = vmul.f32 -1.442695, %v2441_v58  ;;  %v2410_v58 = vrot.slane %v5994_v3, 2 }
 0x96e   :  { %v4646_v49 = vpop.eup %4645 }
 0x96f   :  { %v2473_v52 = vadd.f32 1.0, %v4646_v49 }
 0x970   :  { %v4648_v32 = vpop.eup %4647 }
 0x971   :  { %4657 = vrcp.f32 %v2473_v52  ;;  %v2469_v40 = vadd.f32 1.0, %v4648_v32  ;;  %v4650_v43 = vpop.eup %4649  ;;  %v2412_v52 = vrot.slane %v5994_v3, 3 }
 0x972   :  { %4659 = vpow2.f32 %v3969_v50  ;;  %v2470_v57 = vadd.f32 1.0, %v4650_v43  ;;  %v4652_v24 = vpop.eup %4651  ;;  %v2557_v50 = vrot.slane %v5923_v21, 7 }
 0x973   :  { %4661 = vtanh.f32 %v6009_v25  ;;  %v2471_v34 = vadd.f32 1.0, %v4652_v24  ;;  %v4654_v56 = vpop.eup %4653  ;;  %v6044_v21 = vadd.f32 %v2412_v52, %v5432_v12  ;;  %v2559_v24 = vrot.slane %v5931_v26, 7 }
 0x974   :  { %4663 = vrcp.f32 %v2469_v40  ;;  %v4656_v30 = vpop.eup %4655  ;;  %v2472_v28 = vadd.f32 1.0, %v4654_v56  ;;  %v2558_v40 = vrot.slane %v5919_v33, 7  ;;  %v2442_v26 = vadd.f32 %v2410_v58, %v5420_v46 }
 0x975   :  { %4665 = vtanh.f32 %v6015_v19  ;;  %v3972_v58 = vmul.f32 -1.442695, %v6009_v25 }
 0x976   :  { %4667 = vrcp.f32 %v2470_v57 }
 0x977   :  { %4669 = vpow2.f32 %v3971_v31 }
 0x978   :  { %4671 = vtanh.f32 %v6019_v1 }
 0x979   :  { %4673 = vrcp.f32 %v2471_v34 }
 0x97a   :  { %4675 = vtanh.f32 %v6025_v11 }
 0x97b   :  { %4677 = vrcp.f32 %v2472_v28 }
 0x97c   :  { %4679 = vpow2.f32 %v3970_v44 }
 0x97d   :  { %4681 = vtanh.f32 %v6031_v9 }
 0x97e   :  { %v4658_v22 = vpop.eup %4657 }
 0x97f   :  { %v2585_v17 = vmul.f32 %v4658_v22, %v4656_v30  ;;  %v6033_v20 = vmul.f32 %v4658_v22, %v2561_v60  ;;  %v4660_v49 = vpop.eup %4659  ;;  %v2560_v60 = vrot.slane %v5914_v53, 7 }
 0x980   :  { %v4662_v39 = vpop.eup %4661  ;;  %v2474_v6 = vadd.f32 1.0, %v4660_v49  ;;  %v2562_v49 = vrot.slane %v5935_v63, 7 }
 0x981   :  { %2605 = vrot.lane.b32.xlu1 %v2585_v17, %s5076_s3  ;;  %v4664_v2 = vpop.eup %4663 }
 0x982   :  { %v2581_v32 = vmul.f32 %v4664_v2, %v4662_v39  ;;  %4683 = vrcp.f32 %v2474_v6  ;;  %v6039_v51 = vmul.f32 %v4664_v2, %v2557_v50  ;;  %v4666_v45 = vpop.eup %4665  ;;  %v2564_v2 = vrot.slane %v5943_v48, 7 }
 0x983   :  { %v4668_v27 = vpop.eup %4667  ;;  %4685 = vtanh.f32 %v6044_v21  ;;  %v3973_v48 = vmul.f32 -1.442695, %v6015_v19  ;;  %v3979_v19 = vmul.f32 -1.442695, %v6044_v21 }
 0x984   :  { %2597 = vrot.lane.b32.xlu0 %v2581_v32, %s5076_s3  ;;  %v4670_v43 = vpop.eup %4669  ;;  %v2582_v31 = vmul.f32 %v4668_v27, %v4666_v45  ;;  %v6046_v15 = vmul.f32 %v4668_v27, %v2558_v40  ;;  %v2563_v27 = vrot.slane %v5939_v13, 7  ;;  %v3975_v13 = vmul.f32 -1.442695, %v6025_v11 }
 0x985   :  { %v4672_v57 = vpop.eup %4671  ;;  %v2476_v37 = vadd.f32 1.0, %v4670_v43 }
 0x986   :  { %v4674_v34 = vpop.eup %4673  ;;  %2599 = vrot.lane.b32.xlu1 %v2582_v31, %s5076_s3 }
 0x987   :  { %v2583_v33 = vmul.f32 %v4674_v34, %v4672_v57  ;;  %4687 = vrcp.f32 %v2476_v37  ;;  %v6052_v56 = vmul.f32 %v4674_v34, %v2559_v24  ;;  %v4676_v30 = vpop.eup %4675  ;;  %v3976_v24 = vmul.f32 -1.442695, %v6004_v41 }
 0x988   :  { %v4678_v44 = vpop.eup %4677  ;;  %4689 = vtanh.f32 %v2442_v26  ;;  %v3974_v37 = vmul.f32 -1.442695, %v6019_v1 }
 0x989   :  { %2601 = vrot.lane.b32.xlu0 %v2583_v33, %s5076_s3  ;;  %v2584_v28 = vmul.f32 %v4678_v44, %v4676_v30  ;;  %v6057_v3 = vmul.f32 %v4678_v44, %v2560_v60  ;;  %v4680_v22 = vpop.eup %4679  ;;  %v3977_v33 = vmul.f32 -1.442695, %v6031_v9 }
 0x98a   :  { %v4682_v17 = vpop.eup %4681  ;;  %v2475_v39 = vadd.f32 1.0, %v4680_v22 }
 0x98b   :  { %2603 = vrot.lane.b32.xlu1 %v2584_v28, %s5076_s3 }
 0x98c   :  { %4691 = vrcp.f32 %v2475_v39  ;;  %v3978_v39 = vmul.f32 -1.442695, %v2442_v26 }
 0x98d   :  { %4693 = vpow2.f32 %v3976_v24 }
 0x98e   :  { %4695 = vpow2.f32 %v3972_v58 }
 0x98f   :  { %v4684_v50 = vpop.eup %4683  ;;  %4697 = vpow2.f32 %v3973_v48 }
 0x990   :  { %v2586_v52 = vmul.f32 %v4684_v50, %v4682_v17  ;;  %v6061_v53 = vmul.f32 %v4684_v50, %v2562_v49  ;;  %v4686_v6 = vpop.eup %4685  ;;  %4699 = vpow2.f32 %v3974_v37 }
 0x991   :  { %4701 = vpow2.f32 %v3975_v13 }
 0x992   :  { %2607 = vrot.lane.b32.xlu0 %v2586_v52, %s5076_s3  ;;  %4703 = vpow2.f32 %v3977_v33 }
 0x994   :  { %v4688_v32 = vpop.eup %4687 }
 0x995   :  { %v2588_v45 = vmul.f32 %v4688_v32, %v4686_v6  ;;  %v6065_v40 = vmul.f32 %v4688_v32, %v2564_v2  ;;  %v4690_v63 = vpop.eup %4689 }
 0x997   :  { %2611 = vrot.lane.b32.xlu1 %v2588_v45, %s5076_s3 }
 0x999   :  { %v4692_v43 = vpop.eup %4691 }
 0x99a   :  { %v2587_v31 = vmul.f32 %v4692_v43, %v4690_v63  ;;  %v6069_v57 = vmul.f32 %v4692_v43, %v2563_v27  ;;  %v4694_v34 = vpop.eup %4693 }
 0x99b   :  { %v4696_v30 = vpop.eup %4695  ;;  %v2529_v60 = vadd.f32 1.0, %v4694_v34 }
 0x99c   :  { %2609 = vrot.lane.b32.xlu0 %v2587_v31, %s5076_s3  ;;  %v2525_v44 = vadd.f32 1.0, %v4696_v30  ;;  %v4698_v1 = vpop.eup %4697 }
 0x99d   :  { %4705 = vrcp.f32 %v2529_v60  ;;  %v4700_v11 = vpop.eup %4699  ;;  %v2526_v9 = vadd.f32 1.0, %v4698_v1 }
 0x99e   :  { %v2527_v17 = vadd.f32 1.0, %v4700_v11 }
 0x9f3   :  { %v2606_v41 = vpop.permute.xlu1 %2605 }
 0x9f4   :  { %v6079_v25 = vadd.f32 %v2606_v41, %v6033_v20  ;;  %v4702_v20 = vpop.eup %4701 }
 0x9f5   :  { %v2528_v52 = vadd.f32 1.0, %v4702_v20  ;;  %v4704_v6 = vpop.eup %4703 }
 0x9f6   :  { %4707 = vtanh.f32 %v6079_v25  ;;  %v2598_v28 = vpop.permute.xlu0 %2597  ;;  %v4706_v32 = vpop.eup %4705  ;;  %v2530_v45 = vadd.f32 1.0, %v4704_v6 }
 0x9f7   :  { %4709 = vrcp.f32 %v2525_v44  ;;  %v6084_v22 = vadd.f32 %v2598_v28, %v6039_v51 }
 0x9f8   :  { %4711 = vpow2.f32 %v3979_v19  ;;  %v2600_v49 = vpop.permute.xlu1 %2599 }
 0x9f9   :  { %4713 = vtanh.f32 %v6084_v22  ;;  %v6088_v50 = vadd.f32 %v2600_v49, %v6046_v15 }
 0x9fa   :  { %4715 = vrcp.f32 %v2526_v9 }
 0x9fb   :  { %4717 = vtanh.f32 %v6088_v50  ;;  %v2602_v21 = vpop.permute.xlu0 %2601 }
 0x9fc   :  { %4719 = vrcp.f32 %v2527_v17  ;;  %v6092_v51 = vadd.f32 %v2602_v21, %v6052_v56 }
 0x9fd   :  { %4721 = vpow2.f32 %v3978_v39  ;;  %v2604_v2 = vpop.permute.xlu1 %2603 }
 0x9fe   :  { %4723 = vtanh.f32 %v6092_v51  ;;  %v6096_v26 = vadd.f32 %v2604_v2, %v6057_v3 }
 0x9ff   :  { %4725 = vrcp.f32 %v2528_v52 }
 0xa00   :  { %4727 = vtanh.f32 %v6096_v26 }
 0xa01   :  { %4729 = vrcp.f32 %v2530_v45 }
 0xa03   :  { %v4708_v15 = vpop.eup %4707 }
 0xa04   :  { %v2641_v63 = vmul.f32 %v4708_v15, %v4706_v32  ;;  %v4710_v27 = vpop.eup %4709  ;;  %v2608_v43 = vpop.permute.xlu0 %2607 }
 0xa05   :  { %v4712_v31 = vpop.eup %4711  ;;  %v6100_v56 = vadd.f32 %v2608_v43, %v6061_v53 }
 0xa06   :  { %v4714_v24 = vpop.eup %4713  ;;  %v2532_v37 = vadd.f32 1.0, %v4712_v31  ;;  %v2649_v43 = vpack.c.bf16 %v2641_v63, %v2641_v63 }
 0xa07   :  { %v2637_v58 = vmul.f32 %v4714_v24, %v4710_v27  ;;  %4731 = vtanh.f32 %v6100_v56  ;;  %v4716_v48 = vpop.eup %4715 }
 0xa08   :  { %v4718_v13 = vpop.eup %4717  ;;  %4733 = vrcp.f32 %v2532_v37  ;;  %v2665_v37 = vunpack.c.l.b16 %v2649_v43 }
 0xa09   :  { %v2645_v3 = vpack.c.bf16 %v2637_v58, %v2637_v58  ;;  %v4720_v34 = vpop.eup %4719  ;;  %v2638_v33 = vmul.f32 %v4718_v13, %v4716_v48  ;;  %v2612_v30 = vpop.permute.xlu1 %2611 }
 0xa0a   :  { %v4722_v60 = vpop.eup %4721  ;;  %v6104_v41 = vadd.f32 %v2612_v30, %v6065_v40 }
 0xa0b   :  { %v4724_v44 = vpop.eup %4723  ;;  %v2661_v19 = vunpack.c.l.b16 %v2645_v3  ;;  %v2646_v53 = vpack.c.bf16 %v2638_v33, %v2638_v33  ;;  %v2531_v17 = vadd.f32 1.0, %v4722_v60 }
 0xa0c   :  { %v2639_v1 = vmul.f32 %v4724_v44, %v4720_v34  ;;  %4735 = vtanh.f32 %v6104_v41  ;;  %v4726_v28 = vpop.eup %4725 }
 0xa0d   :  { %v2662_v11 = vunpack.c.l.b16 %v2646_v53  ;;  %v4728_v9 = vpop.eup %4727  ;;  %v2669_v20 = vrot.slane %v2661_v19, 4  ;;  %4737 = vrcp.f32 %v2531_v17 }
 0xa0e   :  { %v2647_v49 = vpack.c.bf16 %v2639_v1, %v2639_v1  ;;  %v2640_v21 = vmul.f32 %v4728_v9, %v4726_v28  ;;  %v2610_v6 = vpop.permute.xlu0 %2609  ;;  %v4730_v2 = vpop.eup %4729 }
 0xa0f   :  { %v2670_v39 = vrot.slane %v2662_v11, 3  ;;  %v6108_v32 = vadd.f32 %v2610_v6, %v6069_v57 }
 0xa10   :  { %v2663_v52 = vunpack.c.l.b16 %v2647_v49  ;;  %v2648_v40 = vpack.c.bf16 %v2640_v21, %v2640_v21 }
 0xa11   :  { %v2671_v15 = vsel %vm1331_vm0, %v2670_v39, %v2669_v20  ;;  %4739 = vtanh.f32 %v6108_v32 }
 0xa12   :  { %v2672_v27 = vrot.slane %v2663_v52, 2  ;;  %v2664_v31 = vunpack.c.l.b16 %v2648_v40 }
 0xa14   :  { %v4732_v45 = vpop.eup %4731  ;;  %v2673_v58 = vsel %vm1334_vm1, %v2672_v27, %v2671_v15  ;;  %v2674_v3 = vrot.slane %v2664_v31, 1 }
 0xa15   :  { %v2642_v24 = vmul.f32 %v4732_v45, %v4730_v2  ;;  %v4734_v57 = vpop.eup %4733  ;;  %v5049_v2 = vld [vmem:[%s6523_s2 + $0x30] ss:$8 sps:$4 sm:$0xff]  }
 0xa16   :  { %v2675_v34 = vsel %vm1337_vm2, %v2674_v3, %v2673_v58 }
 0xa17   :  { %v2650_v48 = vpack.c.bf16 %v2642_v24, %v2642_v24  ;;  %v2676_v33 = vsel %vm1340_vm3, %v2665_v37, %v2675_v34 }
 0xa19   :  { %v2666_v13 = vunpack.c.l.b16 %v2650_v48  ;;  %v4736_v30 = vpop.eup %4735 }
 0xa1a   :  { %v2644_v44 = vmul.f32 %v4736_v30, %v4734_v57  ;;  %v4738_v19 = vpop.eup %4737 }
 0xa1b   :  { %v2677_v60 = vrot.slane %v2666_v13, 7 }
 0xa1c   :  { %v2652_v1 = vpack.c.bf16 %v2644_v44, %v2644_v44 }
 0xa1d   :  { %v2678_v63 = vsel %vm1343_vm4, %v2677_v60, %v2676_v33 }
 0xa1e   :  { %v4740_v53 = vpop.eup %4739  ;;  %v2668_v9 = vunpack.c.l.b16 %v2652_v1 }
 0xa1f   :  { %v2643_v28 = vmul.f32 %v4740_v53, %v4738_v19 }
 0xa20   :  { %v2681_v20 = vrot.slane %v2668_v9, 5 }
 0xa21   :  { %v2651_v11 = vpack.c.bf16 %v2643_v28, %v2643_v28 }
 0xa23   :  { %v2667_v17 = vunpack.c.l.b16 %v2651_v11 }
 0xa25   :  { %v2679_v49 = vrot.slane %v2667_v17, 6 }
 0xa27   :  { %v2680_v39 = vsel %vm1346_vm5, %v2679_v49, %v2678_v63 }
 0xa28   :  { %v2682_v21 = vsel %vm1349_vm6, %v2681_v20, %v2680_v39 }
 0xa29   :  { %v2683_v52 = vpack.c.b16 %v2682_v21, %v2682_v21 }
 0xa2b   :  { %2684 = vrot.lane.b32.xlu0 %v2683_v52, %s5076_s3 }
 0xa9d   :  { %v2685_v6 = vpop.permute.xlu0 %2684 }
 0xa9e   :  { %3980 = vmatmul.mubr.msk.bf16.vlgmr.msra.gmra.mxu1 %vm1037_vm7, %v2685_v6 }
 0xa9f   :  { %3364 = vmatpush1.bf16.msra.mxu1 %v5049_v2  ;;  %3387 = vmatprep.mubr.bf16.mxu1 %v5075_v42 }
 0xaa0   :  { %3365 = vmatprep.subr.bf16.mxu1 %v5960_v23 }
 0xaa3   :  { %3366 = vmatpush1.bf16.msra.mxu1 %v5966_v4 }
 0xaa4   :  { %3367 = vmatprep.subr.bf16.mxu1 %v5972_v18 }
 0xaa7   :  { %3368 = vmatpush1.bf16.msra.mxu1 %v5978_v10 }
 0xaa8   :  { %3369 = vmatprep.subr.bf16.mxu1 %v5984_v14 }
 0xaab   :  { %3370 = vmatpush1.bf16.msra.mxu1 %v5990_v59 }
 0xb5e   :  { %v2723_v40 = vpop.f32.mrf.mxu1 }
 0xb5f   :  { %v2732_v15 = vrot.slane %v2723_v40, 3  ;;  %v2734_v45 = vrot.slane %v2723_v40, 4  ;;  %v2738_v23 = vrot.slane %v2723_v40, 6  ;;  %v2736_v58 = vrot.slane %v2723_v40, 5 }
 0xb60   :  { %v6130_v27 = vpop.f32.mrf.mxu1  ;;  %v2742_v14 = vrot.slane %v2723_v40, 1  ;;  %v2772_v3 = vadd.f32 %v2723_v40, %v5358_v38  ;;  %v2740_v57 = vrot.slane %v2723_v40, 7  ;;  %v2744_v9 = vrot.slane %v2723_v40, 2 }
 0xb61   :  { %v2762_v43 = vadd.f32 %v2732_v15, %v5308_v54  ;;  %v2764_v42 = vadd.f32 %v2734_v45, %v5316_v62  ;;  %v2768_v10 = vadd.f32 %v2738_v23, %v5330_v5  ;;  %v2766_v59 = vadd.f32 %v2736_v58, %v5322_v36 }
 0xb62   :  { %v2727_v31 = vpop.f32.mrf.mxu1  ;;  %v2774_v37 = vadd.f32 %v2742_v14, %v5373_v29  ;;  %v2735_v34 = vrot.slane %v6130_v27, 4  ;;  %v2733_v33 = vrot.slane %v6130_v27, 3  ;;  %v3986_v30 = vmul.f32 -1.442695, %v2772_v3 }
 0xb63   :  { %v3982_v4 = vmul.f32 -1.442695, %v2764_v42  ;;  %v3981_v24 = vmul.f32 -1.442695, %v2762_v43  ;;  %v3984_v48 = vmul.f32 -1.442695, %v2768_v10  ;;  %v2770_v63 = vadd.f32 %v2740_v57, %v5340_v61 }
 0xb64   :  { %v2728_v18 = vpop.f32.mrf.mxu1  ;;  %v3983_v13 = vmul.f32 -1.442695, %v2766_v59  ;;  %v3987_v60 = vmul.f32 -1.442695, %v2774_v37  ;;  %v6141_v44 = vadd.f32 %v2735_v34, %v5343_v0  ;;  %v6145_v19 = vadd.f32 %v2733_v33, %v5334_v55 }
 0xb65   :  { %4741 = vpow2.f32 %v3982_v4  ;;  %v2739_v28 = vrot.slane %v6130_v27, 6  ;;  %v3985_v17 = vmul.f32 -1.442695, %v2770_v63  ;;  %v2737_v20 = vrot.slane %v6130_v27, 5 }
 0xb66   :  { %4743 = vpow2.f32 %v3981_v24  ;;  %v2776_v21 = vadd.f32 %v2744_v9, %v5385_v16  ;;  %v2743_v6 = vrot.slane %v6130_v27, 1  ;;  %v2741_v4 = vrot.slane %v6130_v27, 7 }
 0xb67   :  { %4745 = vpow2.f32 %v3984_v48  ;;  %v6152_v39 = vadd.f32 %v2739_v28, %v5379_v47  ;;  %v6157_v40 = vadd.f32 %v2737_v20, %v5356_v35  ;;  %v2891_v10 = vrot.slane %v6088_v50, 7 }
 0xb68   :  { %4747 = vpow2.f32 %v3983_v13  ;;  %v3988_v45 = vmul.f32 -1.442695, %v2776_v21  ;;  %v6161_v42 = vadd.f32 %v2743_v6, %v5420_v46  ;;  %v2890_v48 = vrot.slane %v6084_v22, 7 }
 0xb69   :  { %4749 = vpow2.f32 %v3986_v30  ;;  %v6169_v13 = vadd.f32 %v2741_v4, %v5394_v8  ;;  %v2745_v22 = vrot.slane %v6130_v27, 2  ;;  %v2893_v63 = vrot.slane %v6096_v26, 7 }
 0xb6a   :  { %4751 = vpow2.f32 %v3987_v60  ;;  %v2896_v6 = vrot.slane %v6108_v32, 7  ;;  %v2894_v32 = vrot.slane %v6079_v25, 7  ;;  %v3990_v25 = vmul.f32 -1.442695, %v6141_v44 }
 0xb6b   :  { %4753 = vtanh.f32 %v6141_v44 }
 0xb6c   :  { %4755 = vtanh.f32 %v6145_v19 }
 0xb72   :  { %v4742_v53 = vpop.eup %4741 }
 0xb73   :  { %v4744_v1 = vpop.eup %4743  ;;  %v2803_v11 = vadd.f32 1.0, %v4742_v53  ;;  %v2773_v53 = vadd.f32 %v6130_v27, %v5407_v7 }
 0xb74   :  { %v2802_v49 = vadd.f32 1.0, %v4744_v1  ;;  %v4746_v52 = vpop.eup %4745 }
 0xb75   :  { %4757 = vrcp.f32 %v2803_v11  ;;  %v2805_v2 = vadd.f32 1.0, %v4746_v52  ;;  %v4748_v15 = vpop.eup %4747 }
 0xb76   :  { %4759 = vrcp.f32 %v2802_v49  ;;  %v2804_v43 = vadd.f32 1.0, %v4748_v15  ;;  %v4750_v23 = vpop.eup %4749  ;;  %v6186_v49 = vadd.f32 %v2745_v22, %v5432_v12 }
 0xb77   :  { %4761 = vpow2.f32 %v3985_v17  ;;  %v4752_v31 = vpop.eup %4751  ;;  %v2807_v14 = vadd.f32 1.0, %v4750_v23  ;;  %v2892_v17 = vrot.slane %v6092_v51, 7 }
 0xb78   :  { %4763 = vtanh.f32 %v6152_v39  ;;  %v4754_v24 = vpop.eup %4753  ;;  %v2808_v18 = vadd.f32 1.0, %v4752_v31 }
 0xb79   :  { %4765 = vrcp.f32 %v2805_v2  ;;  %v4756_v58 = vpop.eup %4755 }
 0xb7a   :  { %4767 = vtanh.f32 %v6157_v40 }
 0xb7b   :  { %4769 = vrcp.f32 %v2804_v43  ;;  %v2895_v43 = vrot.slane %v6100_v56, 7 }
 0xb7c   :  { %4771 = vpow2.f32 %v3988_v45 }
 0xb7d   :  { %4773 = vtanh.f32 %v6161_v42 }
 0xb7e   :  { %4775 = vrcp.f32 %v2808_v18 }
 0xb7f   :  { %4777 = vrcp.f32 %v2807_v14 }
 0xb80   :  { %4779 = vtanh.f32 %v6169_v13 }
 0xb82   :  { %v4758_v59 = vpop.eup %4757 }
 0xb83   :  { %v4760_v3 = vpop.eup %4759  ;;  %v2915_v37 = vmul.f32 %v4758_v59, %v4754_v24  ;;  %v6171_v34 = vmul.f32 %v4758_v59, %v2891_v10 }
 0xb84   :  { %v2914_v57 = vmul.f32 %v4760_v3, %v4756_v58  ;;  %v6173_v33 = vmul.f32 %v4760_v3, %v2890_v48  ;;  %v4762_v30 = vpop.eup %4761  ;;  %v2897_v48 = vrot.slane %v6104_v41, 7  ;;  %v3995_v41 = vmul.f32 -1.442695, %v6161_v42 }
 0xb85   :  { %2932 = vrot.lane.b32.xlu0 %v2915_v37, %s5076_s3  ;;  %v2806_v50 = vadd.f32 1.0, %v4762_v30  ;;  %v4764_v60 = vpop.eup %4763  ;;  %v3992_v30 = vmul.f32 -1.442695, %v6152_v39 }
 0xb86   :  { %2930 = vrot.lane.b32.xlu1 %v2914_v57, %s5076_s3  ;;  %v4766_v1 = vpop.eup %4765  ;;  %v3989_v57 = vmul.f32 -1.442695, %v6145_v19 }
 0xb87   :  { %4781 = vrcp.f32 %v2806_v50  ;;  %v2917_v28 = vmul.f32 %v4766_v1, %v4764_v60  ;;  %v6182_v11 = vmul.f32 %v4766_v1, %v2893_v63  ;;  %v4768_v9 = vpop.eup %4767  ;;  %v3991_v50 = vmul.f32 -1.442695, %v6157_v40 }
 0xb88   :  { %v4770_v20 = vpop.eup %4769  ;;  %4783 = vtanh.f32 %v2773_v53  ;;  %v3993_v1 = vmul.f32 -1.442695, %v6169_v13 }
 0xb89   :  { %2936 = vrot.lane.b32.xlu0 %v2917_v28, %s5076_s3  ;;  %v4772_v21 = vpop.eup %4771  ;;  %v2916_v26 = vmul.f32 %v4770_v20, %v4768_v9  ;;  %v6189_v52 = vmul.f32 %v4770_v20, %v2892_v17  ;;  %4785 = vtanh.f32 %v6186_v49  ;;  %v3994_v9 = vmul.f32 -1.442695, %v2773_v53 }
 0xb8a   :  { %v4774_v27 = vpop.eup %4773  ;;  %v2809_v2 = vadd.f32 1.0, %v4772_v21  ;;  %v3996_v20 = vmul.f32 -1.442695, %v6186_v49 }
 0xb8b   :  { %v4776_v15 = vpop.eup %4775  ;;  %2934 = vrot.lane.b32.xlu1 %v2916_v26, %s5076_s3 }
 0xb8c   :  { %v2920_v51 = vmul.f32 %v4776_v15, %v4774_v27  ;;  %4787 = vrcp.f32 %v2809_v2  ;;  %v6194_v45 = vmul.f32 %v4776_v15, %v2896_v6  ;;  %v4778_v23 = vpop.eup %4777 }
 0xb8d   :  { %v6198_v31 = vmul.f32 %v4778_v23, %v2895_v43  ;;  %v4780_v4 = vpop.eup %4779  ;;  %4789 = vpow2.f32 %v3990_v25 }
 0xb8e   :  { %2942 = vrot.lane.b32.xlu0 %v2920_v51, %s5076_s3  ;;  %4791 = vpow2.f32 %v3989_v57 }
 0xb8f   :  { %4793 = vpow2.f32 %v3992_v30 }
 0xb90   :  { %4795 = vpow2.f32 %v3991_v50 }
 0xb91   :  { %4797 = vpow2.f32 %v3995_v41 }
 0xb94   :  { %v4782_v24 = vpop.eup %4781 }
 0xb95   :  { %v2918_v18 = vmul.f32 %v4782_v24, %v4780_v4  ;;  %v6201_v58 = vmul.f32 %v4782_v24, %v2894_v32  ;;  %v4784_v10 = vpop.eup %4783 }
 0xb96   :  { %v2919_v14 = vmul.f32 %v4784_v10, %v4778_v23  ;;  %v4786_v59 = vpop.eup %4785 }
 0xb97   :  { %2938 = vrot.lane.b32.xlu1 %v2918_v18, %s5076_s3 }
 0xb99   :  { %v4788_v56 = vpop.eup %4787 }
 0xb9a   :  { %v2921_v3 = vmul.f32 %v4788_v56, %v4786_v59  ;;  %v6206_v37 = vmul.f32 %v4788_v56, %v2897_v48  ;;  %v4790_v22 = vpop.eup %4789 }
 0xb9b   :  { %2940 = vrot.lane.b32.xlu1 %v2919_v14, %s5076_s3  ;;  %v4792_v60 = vpop.eup %4791  ;;  %v2859_v63 = vadd.f32 1.0, %v4790_v22 }
 0xb9c   :  { %2944 = vrot.lane.b32.xlu0 %v2921_v3, %s5076_s3  ;;  %v2858_v28 = vadd.f32 1.0, %v4792_v60  ;;  %v4794_v19 = vpop.eup %4793 }
 0xb9d   :  { %4799 = vrcp.f32 %v2859_v63  ;;  %v2861_v42 = vadd.f32 1.0, %v4794_v19  ;;  %v4796_v13 = vpop.eup %4795 }
 0xb9e   :  { %4801 = vpow2.f32 %v3993_v1  ;;  %v4798_v53 = vpop.eup %4797  ;;  %v2860_v26 = vadd.f32 1.0, %v4796_v13 }
 0xb9f   :  { %4803 = vrcp.f32 %v2858_v28  ;;  %v2864_v27 = vadd.f32 1.0, %v4798_v53 }
 0xbaa   :  { %v4800_v2 = vpop.eup %4799 }
 0xbab   :  { %v4802_v15 = vpop.eup %4801 }
 0xbac   :  { %v4804_v43 = vpop.eup %4803  ;;  %v2862_v4 = vadd.f32 1.0, %v4802_v15 }
 0xbf7   :  { %v2933_v44 = vpop.permute.xlu0 %2932 }
 0xbf8   :  { %v6216_v39 = vadd.f32 %v2933_v44, %v6171_v34  ;;  %v2931_v17 = vpop.permute.xlu1 %2930 }
 0xbf9   :  { %v6219_v40 = vadd.f32 %v2931_v17, %v6173_v33 }
 0xbfa   :  { %4805 = vtanh.f32 %v6216_v39 }
 0xbfb   :  { %4807 = vtanh.f32 %v6219_v40  ;;  %v2937_v21 = vpop.permute.xlu0 %2936 }
 0xbfc   :  { %4809 = vpow2.f32 %v3994_v9  ;;  %v6225_v34 = vadd.f32 %v2937_v21, %v6182_v11 }
 0xbfd   :  { %4811 = vrcp.f32 %v2861_v42  ;;  %v2935_v33 = vpop.permute.xlu1 %2934 }
 0xbfe   :  { %4813 = vpow2.f32 %v3996_v20  ;;  %v6229_v6 = vadd.f32 %v2935_v33, %v6189_v52 }
 0xbff   :  { %4815 = vtanh.f32 %v6225_v34 }
 0xc00   :  { %4817 = vrcp.f32 %v2860_v26  ;;  %v2943_v49 = vpop.permute.xlu0 %2942 }
 0xc01   :  { %4819 = vtanh.f32 %v6229_v6  ;;  %v6233_v51 = vadd.f32 %v2943_v49, %v6194_v45 }
 0xc02   :  { %4821 = vrcp.f32 %v2864_v27 }
 0xc03   :  { %4823 = vtanh.f32 %v6233_v51 }
 0xc04   :  { %4825 = vrcp.f32 %v2862_v4 }
 0xc07   :  { %v4806_v11 = vpop.eup %4805 }
 0xc08   :  { %v4808_v23 = vpop.eup %4807  ;;  %v2971_v32 = vmul.f32 %v4806_v11, %v4800_v2 }
 0xc09   :  { %v4810_v24 = vpop.eup %4809  ;;  %v2970_v52 = vmul.f32 %v4808_v23, %v4804_v43  ;;  %v2939_v10 = vpop.permute.xlu1 %2938 }
 0xc0a   :  { %v2979_v18 = vpack.c.bf16 %v2971_v32, %v2971_v32  ;;  %v6237_v59 = vadd.f32 %v2939_v10, %v6201_v58  ;;  %v4812_v48 = vpop.eup %4811  ;;  %v2863_v56 = vadd.f32 1.0, %v4810_v24 }
 0xc0b   :  { %v2978_v14 = vpack.c.bf16 %v2970_v52, %v2970_v52  ;;  %v4814_v3 = vpop.eup %4813 }
 0xc0c   :  { %v2995_v45 = vunpack.c.l.b16 %v2979_v18  ;;  %4827 = vtanh.f32 %v6237_v59  ;;  %v4816_v57 = vpop.eup %4815  ;;  %v2865_v58 = vadd.f32 1.0, %v4814_v3 }
 0xc0d   :  { %v2994_v25 = vunpack.c.l.b16 %v2978_v14  ;;  %v2941_v50 = vpop.permute.xlu1 %2940  ;;  %v2973_v22 = vmul.f32 %v4816_v57, %v4812_v48  ;;  %v4818_v63 = vpop.eup %4817  ;;  %4829 = vrcp.f32 %v2863_v56 }
 0xc0e   :  { %v3003_v30 = vrot.slane %v2995_v45, 4  ;;  %v6241_v60 = vadd.f32 %v2941_v50, %v6198_v31  ;;  %v4820_v1 = vpop.eup %4819  ;;  %v2945_v9 = vpop.permute.xlu0 %2944 }
 0xc0f   :  { %v3002_v41 = vrot.slane %v2994_v25, 5  ;;  %v2981_v28 = vpack.c.bf16 %v2973_v22, %v2973_v22  ;;  %v2972_v19 = vmul.f32 %v4820_v1, %v4818_v63  ;;  %v4822_v17 = vpop.eup %4821  ;;  %v6246_v13 = vadd.f32 %v2945_v9, %v6206_v37 }
 0xc10   :  { %4831 = vtanh.f32 %v6241_v60  ;;  %v4824_v20 = vpop.eup %4823 }
 0xc11   :  { %v3004_v44 = vsel %vm1331_vm0, %v3003_v30, %v3002_v41  ;;  %v2997_v42 = vunpack.c.l.b16 %v2981_v28  ;;  %v2980_v21 = vpack.c.bf16 %v2972_v19, %v2972_v19  ;;  %4833 = vrcp.f32 %v2865_v58  ;;  %v4826_v27 = vpop.eup %4825 }
 0xc12   :  { %4835 = vtanh.f32 %v6246_v13  ;;  %v2976_v31 = vmul.f32 %v4824_v20, %v4822_v17 }
 0xc13   :  { %v2996_v53 = vunpack.c.l.b16 %v2980_v21  ;;  %v3007_v26 = vrot.slane %v2997_v42, 2 }
 0xc14   :  { %v2984_v11 = vpack.c.bf16 %v2976_v31, %v2976_v31 }
 0xc15   :  { %v3005_v33 = vrot.slane %v2996_v53, 3 }
 0xc16   :  { %v3000_v52 = vunpack.c.l.b16 %v2984_v11 }
 0xc17   :  { %v3006_v49 = vsel %vm1334_vm1, %v3005_v33, %v3004_v44 }
 0xc18   :  { %v3008_v43 = vsel %vm1337_vm2, %v3007_v26, %v3006_v49  ;;  %v3012_v25 = vrot.slane %v3000_v52, 7 }
 0xc19   :  { %v4828_v2 = vpop.eup %4827 }
 0xc1a   :  { %v2974_v15 = vmul.f32 %v4828_v2, %v4826_v27  ;;  %v4830_v23 = vpop.eup %4829 }
 0xc1c   :  { %v2982_v37 = vpack.c.bf16 %v2974_v15, %v2974_v15 }
 0xc1d   :  { %v4832_v4 = vpop.eup %4831 }
 0xc1e   :  { %v2975_v32 = vmul.f32 %v4832_v4, %v4830_v23  ;;  %v2998_v24 = vunpack.c.l.b16 %v2982_v37  ;;  %v4834_v18 = vpop.eup %4833 }
 0xc1f   :  { %v4836_v48 = vpop.eup %4835 }
 0xc20   :  { %v2983_v10 = vpack.c.bf16 %v2975_v32, %v2975_v32  ;;  %v3009_v14 = vrot.slane %v2998_v24, 1  ;;  %v2977_v56 = vmul.f32 %v4836_v48, %v4834_v18 }
 0xc22   :  { %v2999_v45 = vunpack.c.l.b16 %v2983_v10  ;;  %v3010_v3 = vsel %vm1340_vm3, %v3009_v14, %v3008_v43  ;;  %v2985_v57 = vpack.c.bf16 %v2977_v56, %v2977_v56 }
 0xc24   :  { %v3011_v30 = vsel %vm1343_vm4, %v2999_v45, %v3010_v3  ;;  %v3001_v41 = vunpack.c.l.b16 %v2985_v57 }
 0xc25   :  { %v3013_v50 = vsel %vm1346_vm5, %v3012_v25, %v3011_v30 }
 0xc26   :  { %v3014_v22 = vrot.slane %v3001_v41, 6 }
 0xc28   :  { %v3015_v63 = vsel %vm1349_vm6, %v3014_v22, %v3013_v50 }
 0xc29   :  { %v3016_v58 = vpack.c.b16 %v3015_v63, %v3015_v63 }
 0xc2b   :  { %3017 = vrot.lane.b32.xlu1 %v3016_v58, %s5076_s3 }
 0xc9d   :  { %v3018_v1 = vpop.permute.xlu1 %3017 }
 0xc9e   :  { %3997 = vmatmul.mubr.msk.bf16.vlgmr.msra.gmra.mxu0 %vm1037_vm7, %v3018_v1 }
 0xd5e   :  { %v3056_v28 = vpop.f32.mrf.mxu0 }
 0xd5f   :  { %v3065_v44 = vrot.slane %v3056_v28, 2  ;;  %v3067_v19 = vrot.slane %v3056_v28, 3  ;;  %v3071_v20 = vrot.slane %v3056_v28, 5  ;;  %v3107_v31 = vadd.f32 %v3056_v28, %v5373_v29 }
 0xd60   :  { %v6257_v9 = vpop.f32.mrf.mxu0  ;;  %v3069_v27 = vrot.slane %v3056_v28, 4  ;;  %v3075_v15 = vrot.slane %v3056_v28, 7  ;;  %v3073_v37 = vrot.slane %v3056_v28, 6  ;;  %v3077_v41 = vrot.slane %v3056_v28, 1 }
 0xd61   :  { %v3095_v17 = vadd.f32 %v3065_v44, %v5308_v54  ;;  %v3097_v42 = vadd.f32 %v3067_v19, %v5316_v62  ;;  %v3101_v2 = vadd.f32 %v3071_v20, %v5330_v5  ;;  %v4004_v49 = vmul.f32 -1.442695, %v3107_v31 }
 0xd62   :  { %v3060_v21 = vpop.f32.mrf.mxu0  ;;  %v3099_v43 = vadd.f32 %v3069_v27, %v5322_v36  ;;  %v3105_v23 = vadd.f32 %v3075_v15, %v5358_v38  ;;  %v3068_v32 = vrot.slane %v6257_v9, 3  ;;  %v3066_v24 = vrot.slane %v6257_v9, 2 }
 0xd63   :  { %v3999_v53 = vmul.f32 -1.442695, %v3097_v42  ;;  %v3998_v26 = vmul.f32 -1.442695, %v3095_v17  ;;  %v4001_v11 = vmul.f32 -1.442695, %v3101_v2  ;;  %v3103_v18 = vadd.f32 %v3073_v37, %v5340_v61 }
 0xd64   :  { %v3061_v33 = vpop.f32.mrf.mxu0  ;;  %v4000_v4 = vmul.f32 -1.442695, %v3099_v43  ;;  %v4003_v52 = vmul.f32 -1.442695, %v3105_v23  ;;  %v6269_v10 = vadd.f32 %v3068_v32, %v5343_v0  ;;  %v6272_v14 = vadd.f32 %v3066_v24, %v5334_v55 }
 0xd65   :  { %4837 = vpow2.f32 %v3999_v53  ;;  %v4002_v45 = vmul.f32 -1.442695, %v3103_v18  ;;  %v3072_v3 = vrot.slane %v6257_v9, 5  ;;  %v3070_v50 = vrot.slane %v6257_v9, 4 }
 0xd66   :  { %4839 = vpow2.f32 %v3998_v26  ;;  %v3076_v58 = vrot.slane %v6257_v9, 7  ;;  %v3109_v17 = vadd.f32 %v3077_v41, %v5385_v16  ;;  %v3074_v28 = vrot.slane %v6257_v9, 6 }
 0xd67   :  { %4841 = vpow2.f32 %v4004_v49  ;;  %v6279_v22 = vadd.f32 %v3072_v3, %v5379_v47  ;;  %v6283_v19 = vadd.f32 %v3070_v50, %v5356_v35  ;;  %v3224_v2 = vrot.slane %v6216_v39, 7 }
 0xd68   :  { %4843 = vpow2.f32 %v4001_v11  ;;  %v6289_v21 = vadd.f32 %v3076_v58, %v5407_v7  ;;  %v4005_v53 = vmul.f32 -1.442695, %v3109_v17  ;;  %v6295_v49 = vadd.f32 %v3074_v28, %v5394_v8 }
 0xd69   :  { %4845 = vpow2.f32 %v4000_v4  ;;  %v3223_v43 = vrot.slane %v6219_v40, 7  ;;  %v6300_v11 = vadd.f32 %v6257_v9, %v5420_v46  ;;  %v3226_v18 = vrot.slane %v6225_v34, 7 }
 0xd6a   :  { %4847 = vpow2.f32 %v4003_v52  ;;  %v3078_v3 = vrot.slane %v6257_v9, 1  ;;  %v3225_v50 = vrot.slane %v6229_v6, 7 }
 0xd6b   :  { %4849 = vtanh.f32 %v6269_v10 }
 0xd6c   :  { %4851 = vtanh.f32 %v6272_v14 }
 0xd72   :  { %v4838_v48 = vpop.eup %4837 }
 0xd73   :  { %v4840_v56 = vpop.eup %4839  ;;  %v3136_v25 = vadd.f32 1.0, %v4838_v48 }
 0xd74   :  { %v3135_v57 = vadd.f32 1.0, %v4840_v56  ;;  %v4842_v30 = vpop.eup %4841  ;;  %v3229_v56 = vrot.slane %v6233_v51, 7  ;;  %v3228_v51 = vrot.slane %v6241_v60, 7 }
 0xd75   :  { %4853 = vrcp.f32 %v3136_v25  ;;  %v4844_v63 = vpop.eup %4843  ;;  %v3141_v1 = vadd.f32 1.0, %v4842_v30 }
 0xd76   :  { %4855 = vrcp.f32 %v3135_v57  ;;  %v3138_v44 = vadd.f32 1.0, %v4844_v63  ;;  %v4846_v42 = vpop.eup %4845 }
 0xd77   :  { %4857 = vpow2.f32 %v4002_v45  ;;  %v3137_v20 = vadd.f32 1.0, %v4846_v42  ;;  %v4848_v31 = vpop.eup %4847 }
 0xd78   :  { %4859 = vtanh.f32 %v6279_v22  ;;  %v4850_v26 = vpop.eup %4849  ;;  %v3140_v33 = vadd.f32 1.0, %v4848_v31 }
 0xd79   :  { %4861 = vrcp.f32 %v3138_v44  ;;  %v4852_v27 = vpop.eup %4851  ;;  %v3110_v44 = vadd.f32 %v3078_v3, %v5432_v12 }
 0xd7a   :  { %4863 = vrcp.f32 %v3141_v1 }
 0xd7b   :  { %4865 = vtanh.f32 %v6283_v19 }
 0xd7c   :  { %4867 = vrcp.f32 %v3137_v20 }
 0xd7d   :  { %4869 = vtanh.f32 %v6289_v21 }
 0xd7e   :  { %4871 = vrcp.f32 %v3140_v33 }
 0xd7f   :  { %4873 = vpow2.f32 %v4005_v53  ;;  %v3227_v53 = vrot.slane %v6237_v59, 7  ;;  %v4007_v59 = vmul.f32 -1.442695, %v6269_v10 }
 0xd80   :  { %4875 = vtanh.f32 %v6295_v49 }
 0xd81   :  { %4877 = vtanh.f32 %v6300_v11 }
 0xd82   :  { %v4854_v15 = vpop.eup %4853 }
 0xd83   :  { %v4856_v23 = vpop.eup %4855  ;;  %v3248_v37 = vmul.f32 %v4854_v15, %v4850_v26  ;;  %v6302_v4 = vmul.f32 %v4854_v15, %v3224_v2  ;;  %v3230_v15 = vrot.slane %v6246_v13, 7  ;;  %v4011_v13 = vmul.f32 -1.442695, %v6289_v21 }
 0xd84   :  { %v4858_v32 = vpop.eup %4857  ;;  %v3247_v39 = vmul.f32 %v4856_v23, %v4852_v27  ;;  %v6304_v24 = vmul.f32 %v4856_v23, %v3223_v43 }
 0xd85   :  { %3265 = vrot.lane.b32.xlu1 %v3248_v37, %s5076_s3  ;;  %v3139_v52 = vadd.f32 1.0, %v4858_v32  ;;  %v4860_v40 = vpop.eup %4859  ;;  %v4006_v32 = vmul.f32 -1.442695, %v6272_v14 }
 0xd86   :  { %3263 = vrot.lane.b32.xlu0 %v3247_v39, %s5076_s3  ;;  %v4862_v48 = vpop.eup %4861  ;;  %v4009_v39 = vmul.f32 -1.442695, %v6279_v22 }
 0xd87   :  { %4879 = vrcp.f32 %v3139_v52  ;;  %v4864_v45 = vpop.eup %4863  ;;  %v3250_v25 = vmul.f32 %v4862_v48, %v4860_v40  ;;  %v6313_v57 = vmul.f32 %v4862_v48, %v3226_v18  ;;  %v4008_v52 = vmul.f32 -1.442695, %v6283_v19 }
 0xd88   :  { %v4866_v30 = vpop.eup %4865  ;;  %v6316_v41 = vmul.f32 %v4864_v45, %v3229_v56  ;;  %4881 = vtanh.f32 %v3110_v44  ;;  %v4012_v18 = vmul.f32 -1.442695, %v6300_v11  ;;  %v4010_v56 = vmul.f32 -1.442695, %v6295_v49 }
 0xd89   :  { %v4868_v63 = vpop.eup %4867  ;;  %3269 = vrot.lane.b32.xlu1 %v3250_v25, %s5076_s3 }
 0xd8a   :  { %v3249_v58 = vmul.f32 %v4868_v63, %v4866_v30  ;;  %v6319_v1 = vmul.f32 %v4868_v63, %v3225_v50  ;;  %v4870_v34 = vpop.eup %4869  ;;  %v4013_v63 = vmul.f32 -1.442695, %v3110_v44 }
 0xd8b   :  { %v4872_v9 = vpop.eup %4871 }
 0xd8c   :  { %3267 = vrot.lane.b32.xlu0 %v3249_v58, %s5076_s3  ;;  %v4874_v17 = vpop.eup %4873  ;;  %v3252_v42 = vmul.f32 %v4872_v9, %v4870_v34  ;;  %v6324_v28 = vmul.f32 %v4872_v9, %v3228_v51 }
 0xd8d   :  { %v3142_v6 = vadd.f32 1.0, %v4874_v17  ;;  %v4876_v20 = vpop.eup %4875 }
 0xd8e   :  { %3273 = vrot.lane.b32.xlu1 %v3252_v42, %s5076_s3  ;;  %v4878_v31 = vpop.eup %4877 }
 0xd8f   :  { %4883 = vrcp.f32 %v3142_v6  ;;  %v3253_v60 = vmul.f32 %v4878_v31, %v4864_v45 }
 0xd90   :  { %4885 = vpow2.f32 %v4007_v59 }
 0xd91   :  { %4887 = vpow2.f32 %v4006_v32 }
 0xd92   :  { %3275 = vrot.lane.b32.xlu1 %v3253_v60, %s5076_s3  ;;  %4889 = vpow2.f32 %v4009_v39 }
 0xd93   :  { %4891 = vpow2.f32 %v4008_v52 }
 0xd94   :  { %v4880_v26 = vpop.eup %4879  ;;  %4893 = vpow2.f32 %v4011_v13 }
 0xd95   :  { %v3251_v33 = vmul.f32 %v4880_v26, %v4876_v20  ;;  %v6328_v27 = vmul.f32 %v4880_v26, %v3227_v53  ;;  %v4882_v2 = vpop.eup %4881  ;;  %4895 = vpow2.f32 %v4012_v18 }
 0xd96   :  { %4897 = vpow2.f32 %v4010_v56 }
 0xd97   :  { %3271 = vrot.lane.b32.xlu0 %v3251_v33, %s5076_s3 }
 0xd9c   :  { %v4884_v43 = vpop.eup %4883 }
 0xd9d   :  { %v3254_v23 = vmul.f32 %v4884_v43, %v4882_v2  ;;  %v6333_v37 = vmul.f32 %v4884_v43, %v3230_v15  ;;  %v4886_v40 = vpop.eup %4885 }
 0xd9e   :  { %v4888_v48 = vpop.eup %4887  ;;  %v3192_v10 = vadd.f32 1.0, %v4886_v40 }
 0xd9f   :  { %3277 = vrot.lane.b32.xlu0 %v3254_v23, %s5076_s3  ;;  %v3191_v14 = vadd.f32 1.0, %v4888_v48  ;;  %v4890_v3 = vpop.eup %4889 }
 0xda0   :  { %4899 = vrcp.f32 %v3192_v10  ;;  %v4892_v11 = vpop.eup %4891  ;;  %v3194_v49 = vadd.f32 1.0, %v4890_v3 }
 0xda1   :  { %4901 = vrcp.f32 %v3191_v14  ;;  %v3193_v25 = vadd.f32 1.0, %v4892_v11  ;;  %v4894_v50 = vpop.eup %4893 }
 0xda2   :  { %v4896_v34 = vpop.eup %4895 }
 0xda3   :  { %v4898_v9 = vpop.eup %4897  ;;  %v3197_v44 = vadd.f32 1.0, %v4896_v34 }
 0xda4   :  { %v3195_v20 = vadd.f32 1.0, %v4898_v9 }
 0xdad   :  { %v4900_v42 = vpop.eup %4899 }
 0xdae   :  { %v4902_v6 = vpop.eup %4901 }
 0xdf7   :  { %v3266_v45 = vpop.permute.xlu1 %3265 }
 0xdf8   :  { %v6344_v22 = vadd.f32 %v3266_v45, %v6302_v4  ;;  %v3264_v19 = vpop.permute.xlu0 %3263 }
 0xdf9   :  { %v6347_v21 = vadd.f32 %v3264_v19, %v6304_v24  ;;  %v3196_v24 = vadd.f32 1.0, %v4894_v50 }
 0xdfa   :  { %4903 = vtanh.f32 %v6344_v22 }
 0xdfb   :  { %4905 = vtanh.f32 %v6347_v21  ;;  %v3270_v30 = vpop.permute.xlu1 %3269 }
 0xdfc   :  { %v6352_v58 = vadd.f32 %v3270_v30, %v6313_v57  ;;  %4907 = vrcp.f32 %v3194_v49 }
 0xdfe   :  { %4909 = vtanh.f32 %v6352_v58  ;;  %v3268_v4 = vpop.permute.xlu0 %3267 }
 0xdff   :  { %4911 = vrcp.f32 %v3193_v25  ;;  %v6356_v51 = vadd.f32 %v3268_v4, %v6319_v1 }
 0xe00   :  { %4913 = vpow2.f32 %v4013_v63  ;;  %v3274_v17 = vpop.permute.xlu1 %3273 }
 0xe01   :  { %4915 = vtanh.f32 %v6356_v51  ;;  %v6360_v57 = vadd.f32 %v3274_v17, %v6324_v28 }
 0xe02   :  { %4917 = vrcp.f32 %v3196_v24 }
 0xe03   :  { %4919 = vtanh.f32 %v6360_v57 }
 0xe04   :  { %v3276_v1 = vpop.permute.xlu1 %3275  ;;  %4921 = vrcp.f32 %v3197_v44 }
 0xe05   :  { %v6364_v2 = vadd.f32 %v3276_v1, %v6316_v41  ;;  %4923 = vrcp.f32 %v3195_v20 }
 0xe07   :  { %v4904_v31 = vpop.eup %4903  ;;  %4925 = vtanh.f32 %v6364_v2 }
 0xe08   :  { %v4906_v53 = vpop.eup %4905  ;;  %v3304_v26 = vmul.f32 %v4904_v31, %v4900_v42 }
 0xe09   :  { %v3303_v60 = vmul.f32 %v4906_v53, %v4902_v6  ;;  %v3272_v33 = vpop.permute.xlu0 %3271  ;;  %v4908_v59 = vpop.eup %4907 }
 0xe0a   :  { %v3312_v15 = vpack.c.bf16 %v3304_v26, %v3304_v26  ;;  %v6367_v28 = vadd.f32 %v3272_v33, %v6328_v27 }
 0xe0b   :  { %v3311_v43 = vpack.c.bf16 %v3303_v60, %v3303_v60  ;;  %v4910_v39 = vpop.eup %4909 }
 0xe0c   :  { %v3328_v23 = vunpack.c.l.b16 %v3312_v15  ;;  %4927 = vtanh.f32 %v6367_v28  ;;  %v4912_v13 = vpop.eup %4911  ;;  %v3306_v41 = vmul.f32 %v4910_v39, %v4908_v59 }
 0xe0d   :  { %v3327_v32 = vunpack.c.l.b16 %v3311_v43  ;;  %v4914_v18 = vpop.eup %4913 }
 0xe0e   :  { %v3336_v52 = vrot.slane %v3328_v23, 5  ;;  %v4916_v48 = vpop.eup %4915  ;;  %v3314_v56 = vpack.c.bf16 %v3306_v41, %v3306_v41  ;;  %v3198_v19 = vadd.f32 1.0, %v4914_v18 }
 0xe0f   :  { %v3335_v40 = vrot.slane %v3327_v32, 6  ;;  %v3305_v27 = vmul.f32 %v4916_v48, %v4912_v13  ;;  %v4918_v14 = vpop.eup %4917 }
 0xe10   :  { %v3330_v45 = vunpack.c.l.b16 %v3314_v56  ;;  %v4920_v3 = vpop.eup %4919  ;;  %4929 = vrcp.f32 %v3198_v19 }
 0xe11   :  { %v3337_v10 = vsel %vm1331_vm0, %v3336_v52, %v3335_v40  ;;  %v3313_v11 = vpack.c.bf16 %v3305_v27, %v3305_v27  ;;  %v3278_v49 = vpop.permute.xlu0 %3277  ;;  %v3308_v25 = vmul.f32 %v4920_v3, %v4918_v14  ;;  %v4922_v30 = vpop.eup %4921 }
 0xe12   :  { %v6373_v63 = vadd.f32 %v3278_v49, %v6333_v37  ;;  %v4924_v4 = vpop.eup %4923  ;;  %v3340_v24 = vrot.slane %v3330_v45, 3 }
 0xe13   :  { %v3329_v50 = vunpack.c.l.b16 %v3313_v11  ;;  %v3316_v34 = vpack.c.bf16 %v3308_v25, %v3308_v25 }
 0xe14   :  { %v4926_v9 = vpop.eup %4925  ;;  %4931 = vtanh.f32 %v6373_v63 }
 0xe15   :  { %v3338_v17 = vrot.slane %v3329_v50, 4  ;;  %v3309_v44 = vmul.f32 %v4926_v9, %v4922_v30  ;;  %v3332_v31 = vunpack.c.l.b16 %v3316_v34 }
 0xe17   :  { %v3339_v20 = vsel %vm1334_vm1, %v3338_v17, %v3337_v10  ;;  %v3317_v1 = vpack.c.bf16 %v3309_v44, %v3309_v44  ;;  %v3344_v60 = vrot.slane %v3332_v31, 1 }
 0xe18   :  { %v3341_v53 = vsel %vm1337_vm2, %v3340_v24, %v3339_v20 }
 0xe19   :  { %v4928_v42 = vpop.eup %4927  ;;  %v3333_v33 = vunpack.c.l.b16 %v3317_v1 }
 0xe1a   :  { %v3307_v6 = vmul.f32 %v4928_v42, %v4924_v4 }
 0xe1c   :  { %v3315_v26 = vpack.c.bf16 %v3307_v6, %v3307_v6 }
 0xe1d   :  { %v4930_v59 = vpop.eup %4929 }
 0xe1e   :  { %v3331_v37 = vunpack.c.l.b16 %v3315_v26 }
 0xe20   :  { %v3342_v15 = vrot.slane %v3331_v37, 2 }
 0xe21   :  { %v4932_v39 = vpop.eup %4931 }
 0xe22   :  { %v3343_v43 = vsel %vm1340_vm3, %v3342_v15, %v3341_v53  ;;  %v3310_v52 = vmul.f32 %v4932_v39, %v4930_v59 }
 0xe23   :  { %v3345_v23 = vsel %vm1343_vm4, %v3344_v60, %v3343_v43 }
 0xe24   :  { %v3346_v32 = vsel %vm1346_vm5, %v3333_v33, %v3345_v23  ;;  %v3318_v13 = vpack.c.bf16 %v3310_v52, %v3310_v52 }
 0xe26   :  { %v3334_v40 = vunpack.c.l.b16 %v3318_v13 }
 0xe28   :  { %v3347_v41 = vrot.slane %v3334_v40, 7 }
 0xe2a   :  { %v3348_v18 = vsel %vm1349_vm6, %v3347_v41, %v3346_v32 }
 0xe2b   :  { %v3349_v48 = vpack.c.b16 %v3348_v18, %v3348_v18 }
 0xe2d   :  { %3350 = vrot.lane.b32.xlu0 %v3349_v48, %s5076_s3 }
 0xe9f   :  { %v3351_v56 = vpop.permute.xlu0 %3350 }
 0xea0   :  { %4014 = vmatmul.mubr.msk.bf16.vlgmr.msra.gmra.mxu1 %vm1037_vm7, %v3351_v56 }
 0xf60   :  { %v3389_v10 = vpop.f32.mrf.mxu1 }
 0xf61   :  { %v3398_v27 = vrot.slane %v3389_v10, 1  ;;  %v3400_v14 = vrot.slane %v3389_v10, 2  ;;  %v3404_v11 = vrot.slane %v3389_v10, 4  ;;  %v3442_v25 = vadd.f32 %v3389_v10, %v5385_v16 }
 0xf62   :  { %v6384_v45 = vpop.f32.mrf.mxu1  ;;  %v3402_v34 = vrot.slane %v3389_v10, 3  ;;  %v3408_v17 = vrot.slane %v3389_v10, 6  ;;  %v3410_v15 = vrot.slane %v3389_v10, 7 }
 0xf63   :  { %v3428_v19 = vadd.f32 %v3398_v27, %v5308_v54  ;;  %v3430_v3 = vadd.f32 %v3400_v14, %v5316_v62  ;;  %v3434_v24 = vadd.f32 %v3404_v11, %v5330_v5  ;;  %v4022_v9 = vmul.f32 -1.442695, %v3442_v25 }
 0xf64   :  { %v3393_v49 = vpop.f32.mrf.mxu1  ;;  %v3432_v42 = vadd.f32 %v3402_v34, %v5322_v36  ;;  %v3438_v54 = vadd.f32 %v3408_v17, %v5358_v38  ;;  %v3406_v62 = vrot.slane %v3389_v10, 5  ;;  %v3401_v16 = vrot.slane %v6384_v45, 2 }
 0xf65   :  { %v4016_v30 = vmul.f32 -1.442695, %v3430_v3  ;;  %v4015_v50 = vmul.f32 -1.442695, %v3428_v19  ;;  %v4018_v44 = vmul.f32 -1.442695, %v3434_v24  ;;  %v3440_v52 = vadd.f32 %v3410_v15, %v5373_v29 }
 0xf66   :  { %v3394_v4 = vpop.f32.mrf.mxu1  ;;  %v4017_v6 = vmul.f32 -1.442695, %v3432_v42  ;;  %v3399_v20 = vrot.slane %v6384_v45, 1  ;;  %v4020_v31 = vmul.f32 -1.442695, %v3438_v54  ;;  %v3436_v5 = vadd.f32 %v3406_v62, %v5340_v61 }
 0xf67   :  { %4933 = vpow2.f32 %v4016_v30  ;;  %v6396_v53 = vadd.f32 %v3401_v16, %v5343_v0  ;;  %v3405_v37 = vrot.slane %v6384_v45, 4  ;;  %v3403_v0 = vrot.slane %v6384_v45, 3 }
 0xf68   :  { %4935 = vpow2.f32 %v4015_v50  ;;  %v6399_v36 = vadd.f32 %v3399_v20, %v5334_v55  ;;  %v4019_v1 = vmul.f32 -1.442695, %v3436_v5  ;;  %v3409_v23 = vrot.slane %v6384_v45, 6 }
 0xf69   :  { %4937 = vpow2.f32 %v4022_v9  ;;  %v6406_v55 = vadd.f32 %v3405_v37, %v5379_v47  ;;  %v6410_v39 = vadd.f32 %v3403_v0, %v5356_v35  ;;  %v3407_v40 = vrot.slane %v6384_v45, 5 }
 0xf6a   :  { %4939 = vpow2.f32 %v4018_v44  ;;  %v6416_v47 = vadd.f32 %v3409_v23, %v5407_v7  ;;  %v4021_v48 = vmul.f32 -1.442695, %v3440_v52  ;;  %v3557_v29 = vrot.slane %v6344_v22, 7  ;;  %v3648_v52 = vld [vmem:[%s6525_s4 + $0x20] sm:$0xff] }
 0xf6b   :  { %4941 = vpow2.f32 %v4017_v6  ;;  %v6422_v27 = vadd.f32 %v3407_v40, %v5394_v8  ;;  %v3556_v7 = vrot.slane %v6347_v21, 7  ;;  %v6427_v19 = vadd.f32 %v6384_v45, %v5432_v12  ;;  %v3646_v40 = vld [vmem:[%s6525_s4 + $0x10] sm:$0xff] }
 0xf6c   :  { %4943 = vpow2.f32 %v4020_v31  ;;  %v3559_v21 = vrot.slane %v6352_v58, 7  ;;  %v3563_v4 = vrot.slane %v6373_v63, 7  ;;  %v3411_v24 = vrot.slane %v6384_v45, 7 }
 0xf6d   :  { %4945 = vtanh.f32 %v6396_v53  ;;  %v3558_v44 = vrot.slane %v6356_v51, 7  ;;  %v3561_v63 = vrot.slane %v6360_v57, 7  ;;  %v3560_v37 = vrot.slane %v6367_v28, 7  ;;  %v3651_v28 = vld [vmem:[%s6525_s4 + $0x38] sm:$0xff] }
 0xf6e   :  { %4947 = vtanh.f32 %v6399_v36  ;;  %v6450_v20 = vadd.f32 %v3411_v24, %v5420_v46  ;;  %v3562_v0 = vrot.slane %v6364_v2, 7  ;;  %v3649_v2 = vld [vmem:[%s6525_s4 + $0x28] sm:$0xff] }
 0xf74   :  { %v4934_v26 = vpop.eup %4933 }
 0xf75   :  { %v4936_v38 = vpop.eup %4935  ;;  %v3469_v60 = vadd.f32 1.0, %v4934_v26 }
 0xf76   :  { %v3468_v33 = vadd.f32 1.0, %v4936_v38  ;;  %v4938_v61 = vpop.eup %4937 }
 0xf77   :  { %4949 = vrcp.f32 %v3469_v60  ;;  %v4940_v43 = vpop.eup %4939  ;;  %v3475_v59 = vadd.f32 1.0, %v4938_v61 }
 0xf78   :  { %4951 = vrcp.f32 %v3468_v33  ;;  %v3471_v32 = vadd.f32 1.0, %v4940_v43  ;;  %v4942_v13 = vpop.eup %4941 }
 0xf79   :  { %4953 = vpow2.f32 %v4019_v1  ;;  %v3470_v41 = vadd.f32 1.0, %v4942_v13  ;;  %v4944_v18 = vpop.eup %4943  ;;  %v3647_v13 = vld [vmem:[%s6525_s4 + $0x18] sm:$0xff] }
 0xf7a   :  { %4955 = vtanh.f32 %v6406_v55  ;;  %v4946_v35 = vpop.eup %4945  ;;  %v3473_v56 = vadd.f32 1.0, %v4944_v18  ;;  %v3644_v18 = vld [vmem:[%s6525_s4] sm:$0xff] }
 0xf7b   :  { %4957 = vrcp.f32 %v3471_v32  ;;  %v4948_v10 = vpop.eup %4947  ;;  %v3650_v32 = vld [vmem:[%s6525_s4 + $0x30] sm:$0xff] }
 0xf7c   :  { %4959 = vrcp.f32 %v3475_v59  ;;  %v5077_v59 = vmov 0.0  }
 0xf7d   :  { %4961 = vtanh.f32 %v6410_v39  ;;  %4043 = vmatprep.subr.mxu0 %v5077_v59  ;;  %4059 = vmatprep.mubr.msk.f32.mxu0 %vm5078_vm8, %v5077_v59 }
 0xf7e   :  { %4963 = vrcp.f32 %v3470_v41  ;;  %4044 = vmatpush3.msra.mxu0 %v3651_v28  ;;  %v3645_v41 = vld [vmem:[%s6525_s4 + $0x8] sm:$0xff] }
 0xf7f   :  { %4965 = vtanh.f32 %v6416_v47  ;;  %4045 = vmatprep.subr.mxu0 %v5077_v59 }
 0xf80   :  { %4967 = vrcp.f32 %v3473_v56  ;;  %4046 = vmatpush3.msra.mxu0 %v3650_v32  ;;  %v4026_v56 = vmul.f32 -1.442695, %v6406_v55 }
 0xf81   :  { %4969 = vpow2.f32 %v4021_v48  ;;  %4047 = vmatprep.subr.mxu0 %v5077_v59  ;;  %v4024_v48 = vmul.f32 -1.442695, %v6396_v53 }
 0xf82   :  { %4971 = vtanh.f32 %v6422_v27  ;;  %4048 = vmatpush3.msra.mxu0 %v3649_v2 }
 0xf83   :  { %4973 = vtanh.f32 %v6427_v19  ;;  %4049 = vmatprep.subr.mxu0 %v5077_v59 }
 0xf84   :  { %v4950_v14 = vpop.eup %4949  ;;  %4050 = vmatpush3.msra.mxu0 %v3648_v52 }
 0xf85   :  { %v4952_v3 = vpop.eup %4951  ;;  %v3581_v11 = vmul.f32 %v4950_v14, %v4946_v35  ;;  %v6429_v49 = vmul.f32 %v4950_v14, %v3557_v29  ;;  %4051 = vmatprep.subr.mxu0 %v5077_v59  ;;  %v4023_v35 = vmul.f32 -1.442695, %v6399_v36  ;;  %v4028_v29 = vmul.f32 -1.442695, %v6416_v47 }
 0xf86   :  { %v4954_v25 = vpop.eup %4953  ;;  %v3580_v22 = vmul.f32 %v4952_v3, %v4948_v10  ;;  %v6431_v30 = vmul.f32 %v4952_v3, %v3556_v7  ;;  %4052 = vmatpush3.msra.mxu0 %v3647_v13  ;;  %v4025_v10 = vmul.f32 -1.442695, %v6410_v39  ;;  %v4030_v7 = vmul.f32 -1.442695, %v6427_v19 }
 0xf87   :  { %3598 = vrot.lane.b32.xlu0 %v3581_v11, %s5076_s3  ;;  %v3472_v8 = vadd.f32 1.0, %v4954_v25  ;;  %v4956_v12 = vpop.eup %4955  ;;  %4053 = vmatprep.subr.mxu0 %v5077_v59  ;;  %v4027_v11 = vmul.f32 -1.442695, %v6422_v27 }
 0xf88   :  { %3596 = vrot.lane.b32.xlu1 %v3580_v22, %s5076_s3  ;;  %v4958_v50 = vpop.eup %4957  ;;  %4054 = vmatpush3.msra.mxu0 %v3646_v40 }
 0xf89   :  { %4975 = vrcp.f32 %v3472_v8  ;;  %v4960_v34 = vpop.eup %4959  ;;  %v3583_v9 = vmul.f32 %v4958_v50, %v4956_v12  ;;  %v6440_v17 = vmul.f32 %v4958_v50, %v3559_v21  ;;  %4055 = vmatprep.subr.mxu0 %v5077_v59  ;;  %v4029_v50 = vmul.f32 -1.442695, %v6450_v20 }
 0xf8a   :  { %v4962_v42 = vpop.eup %4961  ;;  %v6443_v54 = vmul.f32 %v4960_v34, %v3563_v4  ;;  %4977 = vtanh.f32 %v6450_v20  ;;  %4056 = vmatpush3.msra.mxu0 %v3645_v41 }
 0xf8b   :  { %v4964_v62 = vpop.eup %4963  ;;  %3602 = vrot.lane.b32.xlu0 %v3583_v9, %s5076_s3  ;;  %4057 = vmatprep.subr.mxu0 %v5077_v59 }
 0xf8c   :  { %v3582_v6 = vmul.f32 %v4964_v62, %v4962_v42  ;;  %v6446_v16 = vmul.f32 %v4964_v62, %v3558_v44  ;;  %v4966_v58 = vpop.eup %4965  ;;  %4058 = vmatpush3.msra.mxu0 %v3644_v18 }
 0xf8d   :  { %v4968_v45 = vpop.eup %4967 }
 0xf8e   :  { %3600 = vrot.lane.b32.xlu1 %v3582_v6, %s5076_s3  ;;  %v4970_v31 = vpop.eup %4969  ;;  %v3585_v5 = vmul.f32 %v4968_v45, %v4966_v58  ;;  %v6453_v51 = vmul.f32 %v4968_v45, %v3561_v63 }
 0xf8f   :  { %v3474_v26 = vadd.f32 1.0, %v4970_v31  ;;  %v4972_v38 = vpop.eup %4971 }
 0xf90   :  { %3606 = vrot.lane.b32.xlu0 %v3585_v5, %s5076_s3  ;;  %v4974_v1 = vpop.eup %4973 }
 0xf91   :  { %4979 = vrcp.f32 %v3474_v26  ;;  %v3587_v46 = vmul.f32 %v4974_v1, %v4960_v34 }
 0xf92   :  { %4981 = vpow2.f32 %v4024_v48 }
 0xf93   :  { %4983 = vpow2.f32 %v4023_v35 }
 0xf94   :  { %3610 = vrot.lane.b32.xlu0 %v3587_v46, %s5076_s3  ;;  %4985 = vpow2.f32 %v4026_v56 }
 0xf95   :  { %4987 = vpow2.f32 %v4025_v10 }
 0xf96   :  { %v4976_v57 = vpop.eup %4975  ;;  %4989 = vpow2.f32 %v4028_v29 }
 0xf97   :  { %v3584_v60 = vmul.f32 %v4976_v57, %v4972_v38  ;;  %v6458_v33 = vmul.f32 %v4976_v57, %v3560_v37  ;;  %v4978_v61 = vpop.eup %4977  ;;  %4991 = vpow2.f32 %v4030_v7 }
 0xf98   :  { %4993 = vpow2.f32 %v4027_v11 }
 0xf99   :  { %3604 = vrot.lane.b32.xlu1 %v3584_v60, %s5076_s3 }
 0xf9e   :  { %v4980_v15 = vpop.eup %4979 }
 0xf9f   :  { %v3586_v43 = vmul.f32 %v4980_v15, %v4978_v61  ;;  %v6463_v23 = vmul.f32 %v4980_v15, %v3562_v0  ;;  %v4982_v14 = vpop.eup %4981 }
 0xfa0   :  { %v4984_v3 = vpop.eup %4983  ;;  %v3525_v53 = vadd.f32 1.0, %v4982_v14 }
 0xfa1   :  { %3608 = vrot.lane.b32.xlu1 %v3586_v43, %s5076_s3  ;;  %v3524_v36 = vadd.f32 1.0, %v4984_v3  ;;  %v4986_v22 = vpop.eup %4985 }
 0xfa2   :  { %4995 = vrcp.f32 %v3525_v53  ;;  %v4988_v8 = vpop.eup %4987  ;;  %v3527_v19 = vadd.f32 1.0, %v4986_v22 }
 0xfa3   :  { %4997 = vrcp.f32 %v3524_v36  ;;  %v3526_v12 = vadd.f32 1.0, %v4988_v8  ;;  %v4990_v27 = vpop.eup %4989 }
 0xfa4   :  { %v3529_v9 = vadd.f32 1.0, %v4990_v27 }
 0xff9   :  { %v3599_v25 = vpop.permute.xlu0 %3598 }
 0xffa   :  { %v3621_v55 = vadd.f32 %v3599_v25, %v6429_v49  ;;  %v3597_v39 = vpop.permute.xlu1 %3596  ;;  %v4992_v49 = vpop.eup %4991 }
 0xffb   :  { %v3620_v47 = vadd.f32 %v3597_v39, %v6431_v30  ;;  %v4994_v30 = vpop.eup %4993  ;;  %v3531_v6 = vadd.f32 1.0, %v4992_v49 }
 0xffc   :  { %4999 = vtanh.f32 %v3621_v55  ;;  %v4996_v44 = vpop.eup %4995  ;;  %v3528_v63 = vadd.f32 1.0, %v4994_v30 }
 0xffd   :  { %5001 = vtanh.f32 %v3620_v47  ;;  %v3603_v21 = vpop.permute.xlu0 %3602  ;;  %v4998_v58 = vpop.eup %4997  ;;  %v4031_v47 = vld [vmem:[%s6526_s5] ss:$0 sm:$0xff] }
 0xffe   :  { %v3623_v4 = vadd.f32 %v3603_v21, %v6440_v17  ;;  %5003 = vrcp.f32 %v3527_v19 }
0x1000   :  { %5005 = vtanh.f32 %v3623_v4  ;;  %v3601_v34 = vpop.permute.xlu1 %3600 }
0x1001   :  { %5007 = vrcp.f32 %v3526_v12  ;;  %v3622_v24 = vadd.f32 %v3601_v34, %v6446_v16 }
0x1002   :  { %5009 = vpow2.f32 %v4029_v50  ;;  %v3607_v42 = vpop.permute.xlu0 %3606 }
0x1003   :  { %5011 = vtanh.f32 %v3622_v24  ;;  %v3625_v62 = vadd.f32 %v3607_v42, %v6453_v51 }
0x1004   :  { %5013 = vrcp.f32 %v3529_v9 }
0x1005   :  { %5015 = vtanh.f32 %v3625_v62 }
0x1006   :  { %v3611_v31 = vpop.permute.xlu0 %3610  ;;  %5017 = vrcp.f32 %v3531_v6 }
0x1007   :  { %v3627_v16 = vadd.f32 %v3611_v31, %v6443_v54  ;;  %5019 = vrcp.f32 %v3528_v63 }
0x1009   :  { %v5000_v17 = vpop.eup %4999  ;;  %5021 = vtanh.f32 %v3627_v16 }
0x100a   :  { %v5002_v20 = vpop.eup %5001  ;;  %v3637_v45 = vmul.f32 %v5000_v17, %v4996_v44 }
0x100b   :  { %v3636_v5 = vmul.f32 %v5002_v20, %v4998_v58  ;;  %v3605_v26 = vpop.permute.xlu1 %3604  ;;  %v5004_v51 = vpop.eup %5003 }
0x100c   :  { %v3668_v38 = vrot.slane %v3637_v45, 6  ;;  %v3624_v1 = vadd.f32 %v3605_v26, %v6458_v33 }
0x100d   :  { %v3667_v37 = vrot.slane %v3636_v5, 7  ;;  %v5006_v46 = vpop.eup %5005 }
0x100e   :  { %5023 = vtanh.f32 %v3624_v1  ;;  %v5008_v60 = vpop.eup %5007  ;;  %v3639_v61 = vmul.f32 %v5006_v46, %v5004_v51 }
0x100f   :  { %v3669_v57 = vsel %vm1331_vm0, %v3668_v38, %v3667_v37  ;;  %v5010_v0 = vpop.eup %5009 }
0x1010   :  { %v5012_v15 = vpop.eup %5011  ;;  %v3530_v59 = vadd.f32 1.0, %v5010_v0  ;;  %v3672_v54 = vrot.slane %v3639_v61, 4 }
0x1011   :  { %v3638_v43 = vmul.f32 %v5012_v15, %v5008_v60  ;;  %v5014_v28 = vpop.eup %5013 }
0x1012   :  { %v5016_v32 = vpop.eup %5015  ;;  %5025 = vrcp.f32 %v3530_v59 }
0x1013   :  { %v3670_v2 = vrot.slane %v3638_v43, 5  ;;  %v3609_v52 = vpop.permute.xlu1 %3608  ;;  %v3641_v13 = vmul.f32 %v5016_v32, %v5014_v28  ;;  %v5018_v33 = vpop.eup %5017 }
0x1014   :  { %v3626_v40 = vadd.f32 %v3609_v52, %v6463_v23  ;;  %v5020_v18 = vpop.eup %5019 }
0x1015   :  { %v3671_v41 = vsel %vm1334_vm1, %v3670_v2, %v3669_v57  ;;  %v3676_v14 = vrot.slane %v3641_v13, 2 }
0x1016   :  { %v3673_v48 = vsel %vm1337_vm2, %v3672_v54, %v3671_v41  ;;  %v5022_v35 = vpop.eup %5021  ;;  %5027 = vtanh.f32 %v3626_v40 }
0x1017   :  { %v3643_v10 = vmul.f32 %v5022_v35, %v5018_v33 }
0x101b   :  { %v5024_v56 = vpop.eup %5023 }
0x101c   :  { %v3640_v29 = vmul.f32 %v5024_v56, %v5020_v18 }
0x101e   :  { %v3674_v7 = vrot.slane %v3640_v29, 3 }
0x101f   :  { %v5026_v53 = vpop.eup %5025 }
0x1020   :  { %v3675_v3 = vsel %vm1340_vm3, %v3674_v7, %v3673_v48 }
0x1021   :  { %v3677_v11 = vsel %vm1343_vm4, %v3676_v14, %v3675_v3 }
0x1023   :  { %v5028_v36 = vpop.eup %5027 }
0x1024   :  { %v3642_v23 = vmul.f32 %v5028_v36, %v5026_v53 }
0x1026   :  { %v3678_v25 = vrot.slane %v3642_v23, 1 }
0x1028   :  { %v3679_v55 = vsel %vm1346_vm5, %v3678_v25, %v3677_v11 }
0x1029   :  { %v3680_v39 = vsel %vm1349_vm6, %v3643_v10, %v3679_v55 }
0x102a   :  { %3681 = vrot.lane.b32.xlu1 %v3680_v39, %s5076_s3 }
0x109c   :  { %v3682_v22 = vpop.permute.xlu1 %3681 }
0x109d   :  { %4060 = vmatmul.mubr.msk.f32.vlgmr.msra.gmra.mxu0 %vm1037_vm7, %v3682_v22 }
0x115d   :  { %v3751_v8 = vpop.f32.mrf.mxu0 }
0x115e   :  { %v3752_v19 = vadd.f32 %v4031_v47, %v3751_v8 }
0x115f   :  { %v4061_v12 = vpop.f32.mrf.mxu0 }
0x1160   :  { %v4033_v21 = vmul.f32 -1.442695, %v3752_v19 }
0x1162   :  { %5029 = vpow2.f32 %v4033_v21 }
0x116f   :  { %v5030_v27 = vpop.eup %5029 }
0x1170   :  { %v3758_v50 = vadd.f32 1.0, %v5030_v27 }
0x1172   :  { %5031 = vrcp.f32 %v3758_v50 }
0x117f   :  { %v5032_v4 = vpop.eup %5031 }
0x1180   :  { %3762 = vst.msk [vmem:[%s6527_s6] sm:$0xff] %vm3761_vm9, %v5032_v4 }
0x1181   :  { %3767 = vsyncpa [#allocation3], 1 }

</bundles_post_ra>
